<compile_context>
chip_gen: v7x
topology: tpu7x:2x2x1
jax: 0.10.0
libtpu: 0.0.40
codegen_flags: <defaults>
</compile_context>

<pallas_src>
import functools

import jax
import jax.numpy as jnp
from jax.experimental import pallas as pl
from jax.experimental.pallas import tpu as pltpu


def _round_up(x, m):
    return ((x + m - 1) // m) * m


def _full_spec(shape):
    # Full-array block for grid=(1,).
    return pl.BlockSpec(shape, lambda i: (0,) * len(shape))


# ----------------------------------------------------------------------------
# One-time ("offline") repack of PyTorch-layout params into the kernel layout.
# ----------------------------------------------------------------------------
def prepare_params(params, input_dim, batch):
    """Repack parameters for the fused kernel.

    Kernel data layout:
      * activations: 2-D (c_out*batch, H*W) -- channels x batch in sublanes,
        flattened spatial grid (lane-dense) in lanes.  The spatial grid keeps
        the ORIGINAL HxW extent through the conv stack; the valid region
        shrinks each layer and invalid positions are masked by zero weights.
      * conv weights: per-(kh, kw) Kronecker matrices kron(w[kh,kw].T, I_N),
        shape (K*K, c_out*N, c_in*N); biases replicated per batch element.
      * first Linear: rows scattered onto the (H, W) grid in NCHW order ->
        folds the transpose+flatten into the weight (no runtime transpose).
      * last Linear: output dim zero-padded to a multiple of 128 lanes.

    NOTE: the Kronecker conv weights bake in the batch size; re-run
    prepare_params if the batch changes.
    """
    c0, H, W = input_dim
    N = batch
    GRID = H * W

    conv_meta, arrays = [], []
    max_off = 0
    c_in, h, w = c0, H, W
    eye = jnp.eye(N, dtype=jnp.float32)
    for (wc, bc) in params["conv"]:
        K = int(wc.shape[0])
        c_out = int(wc.shape[-1])
        max_off = max(max_off, (K - 1) * (W + 1))
        wk = jnp.stack(
            [jnp.kron(wc[kh, kw].T, eye)          # (c_out*N, c_in*N)
             for kh in range(K) for kw in range(K)], axis=0)
        bk = jnp.repeat(bc, N)[:, None]            # (c_out*N, 1)
        arrays += [wk.astype(jnp.float32), bk.astype(jnp.float32)]
        conv_meta.append((K, c_in, c_out))
        c_in, h, w = c_out, h - K + 1, w - K + 1
    hf, wf, c_last = h, w, c_in

    padw = _round_up(GRID + max_off, 128)          # lane width incl. shift slack

    n_lin = len(params["linear"])
    lin_meta = []
    for i, (wl, bl) in enumerate(params["linear"]):
        d_in, d_out = int(wl.shape[0]), int(wl.shape[1])
        pad_out = _round_up(d_out, 128) if i == n_lin - 1 else d_out
        w_p = wl if pad_out == d_out else jnp.pad(wl, ((0, 0), (0, pad_out - d_out)))
        b_p = bl if pad_out == d_out else jnp.pad(bl, (0, pad_out - d_out))
        if i == 0:
            # Scatter NCHW-flatten rows (c*hf*wf + h*wf + w) onto the HxW grid.
            assert d_in == c_last * hf * wf, (d_in, c_last, hf, wf)
            w_g = w_p.reshape(c_last, hf, wf, pad_out)
            w_full = jnp.zeros((c_last, H, W, pad_out), jnp.float32)
            w_full = w_full.at[:, :hf, :wf, :].set(w_g)
            w_p = w_full.reshape(c_last, GRID, pad_out)
        arrays += [w_p.astype(jnp.float32), b_p.reshape(1, -1).astype(jnp.float32)]
        lin_meta.append((d_in, d_out, pad_out))

    cfg = dict(batch=N, c0=c0, H=H, W=W, grid=GRID, padw=padw,
               conv=tuple(conv_meta), n_lin=n_lin, lin=tuple(lin_meta),
               c_last=c_last, num_actions=int(params["linear"][-1][0].shape[1]))
    return {"cfg": cfg, "arrays": arrays}


# ----------------------------------------------------------------------------
# The single fused Pallas kernel: conv stack + flatten + linear stack.
# ----------------------------------------------------------------------------
def _make_fused_kernel(cfg):
    N = cfg["batch"]
    Wg = cfg["W"]
    GRID = cfg["grid"]
    conv_meta = cfg["conv"]
    n_conv = len(conv_meta)
    n_lin = cfg["n_lin"]
    c_last = cfg["c_last"]

    def kernel(*refs):
        # ref order: x, (w_conv, b_conv)*, (w_lin, b_lin)*, out, act_scratch*
        i = 0
        x_ref = refs[i]; i += 1
        cw, cb = [], []
        for _ in range(n_conv):
            cw.append(refs[i]); cb.append(refs[i + 1]); i += 2
        lw, lb = [], []
        for _ in range(n_lin):
            lw.append(refs[i]); lb.append(refs[i + 1]); i += 2
        o_ref = refs[i]; i += 1
        act = list(refs[i:i + n_conv])

        # ---- conv stack: shift-and-matmul, every batch element fused via the
        #      Kronecker-expanded weights; accumulation stays in f32 vregs.
        src = x_ref
        for l, (K, c_in, c_out) in enumerate(conv_meta):
            acc = jnp.zeros((c_out * N, GRID), jnp.float32)
            for kh in range(K):
                for kw in range(K):
                    off = kh * Wg + kw
                    acc = acc + jnp.dot(
                        cw[l][kh * K + kw],                  # (c_out*N, c_in*N)
                        src[:, off:off + GRID],              # (c_in*N, GRID)
                        preferred_element_type=jnp.float32)
            y = jnp.maximum(acc + cb[l][...], 0.0)           # bias + ReLU
            buf = act[l]
            if buf.shape[-1] > GRID:                         # keep shift slack zeroed
                buf[:, GRID:] = jnp.zeros(
                    (c_out * N, buf.shape[-1] - GRID), jnp.float32)
            buf[:, 0:GRID] = y
            src = buf

        # ---- first fully connected layer: accumulate one matmul per conv
        #      output channel; invalid grid positions are zero in the weight.
        h1 = lw[0].shape[-1]
        hid = jnp.zeros((N, h1), jnp.float32)
        for co in range(c_last):
            hid = hid + jnp.dot(
                src[co * N:(co + 1) * N, 0:GRID],            # (N, GRID)
                lw[0][co],                                   # (GRID, h1)
                preferred_element_type=jnp.float32)
        hid = hid + lb[0][...]
        if n_lin > 1:
            hid = jnp.maximum(hid, 0.0)

        # ---- remaining fully connected layers (no activation on the last).
        for li in range(1, n_lin):
            hid = jnp.dot(hid, lw[li][...],
                          preferred_element_type=jnp.float32) + lb[li][...]
            if li < n_lin - 1:
                hid = jnp.maximum(hid, 0.0)

        o_ref[...] = hid.astype(o_ref.dtype)                 # lane-dense (N, 128)

    return kernel


def softmax_policy_forward_fused(state_nchw, arrays, *, cfg):
    """Full forward pass (== Softmax.forward -> per-action logits)."""
    N, c0, H, W = state_nchw.shape
    assert (N, c0, H, W) == (cfg["batch"], cfg["c0"], cfg["H"], cfg["W"])
    GRID, PADW = cfg["grid"], cfg["padw"]
    n_conv = len(cfg["conv"])
    a_pad = cfg["lin"][-1][2]

    # (N, C, H, W) -> (C*N, H*W) with zero slack lanes for the in-kernel shifts.
    x0 = jnp.transpose(state_nchw, (1, 0, 2, 3)).reshape(c0 * N, GRID)
    x0 = jnp.pad(x0, ((0, 0), (0, PADW - GRID)))

    inputs = [x0] + list(arrays)

    scratch = []
    for l, (K, c_in, c_out) in enumerate(cfg["conv"]):
        width = GRID if l == n_conv - 1 else PADW
        scratch.append(pltpu.VMEM((c_out * N, width), jnp.float32))

    out = pl.pallas_call(
        _make_fused_kernel(cfg),
        grid=(1,),
        in_specs=[_full_spec(a.shape) for a in inputs],
        out_specs=_full_spec((N, a_pad)),
        out_shape=jax.ShapeDtypeStruct((N, a_pad), jnp.float32),
        scratch_shapes=scratch,
        compiler_params=pltpu.CompilerParams(
            dimension_semantics=("arbitrary",)),
    )(*inputs)
    return out[:, :cfg["num_actions"]]


# ----------------------------------------------------------------------------
# Deterministic parameter init (shapes follow the module's constructor args)
# ----------------------------------------------------------------------------
def init_params(key, input_dim, channels, kernel_sizes, hidden_sizes, num_actions):
    c_in, h, w = input_dim
    conv_params, lin_params = [], []
    for c_out, k in zip(channels, kernel_sizes):
        key, k1, k2 = jax.random.split(key, 3)
        scale = 1.0 / float(jnp.sqrt(jnp.float32(c_in * k * k)))
        conv_params.append((
            jax.random.uniform(k1, (k, k, c_in, c_out), jnp.float32, -scale, scale),
            jax.random.uniform(k2, (c_out,), jnp.float32, -scale, scale),
        ))
        c_in = c_out
        h, w = h - k + 1, w - k + 1
    d_in = c_in * h * w
    for d_out in list(hidden_sizes) + [num_actions]:
        key, k1, k2 = jax.random.split(key, 3)
        scale = 1.0 / float(jnp.sqrt(jnp.float32(d_in)))
        lin_params.append((
            jax.random.uniform(k1, (d_in, d_out), jnp.float32, -scale, scale),
            jax.random.uniform(k2, (d_out,), jnp.float32, -scale, scale),
        ))
        d_in = d_out
    return {"conv": conv_params, "linear": lin_params}


# ----------------------------------------------------------------------------
# Pure-JAX reference (correctness cross-check; matches the PyTorch module)
# ----------------------------------------------------------------------------
def reference_forward(state_nchw, params):
    x = jnp.transpose(state_nchw, (0, 2, 3, 1))
    for (w, b) in params["conv"]:
        x = jax.lax.conv_general_dilated(
            x, w, window_strides=(1, 1), padding="VALID",
            dimension_numbers=("NHWC", "HWIO", "NHWC"),
            precision=jax.lax.Precision.HIGHEST)
        x = jnp.maximum(x + b[None, None, None, :], 0.0)
    # torch.flatten(x, start_dim=1) on an NCHW tensor: (C, H, W) order.
    x = jnp.transpose(x, (0, 3, 1, 2)).reshape(x.shape[0], -1)
    n_lin = len(params["linear"])
    for i, (w, b) in enumerate(params["linear"]):
        x = jnp.dot(x, w, precision=jax.lax.Precision.HIGHEST) + b[None, :]
        if i < n_lin - 1:
            x = jnp.maximum(x, 0.0)
    return x


if __name__ == "__main__":
    key = jax.random.PRNGKey(0)
    k_param, k_state = jax.random.split(key)

    # Small, module-consistent shapes.
    batch = 2
    input_dim = (4, 16, 16)          # (channels, height, width)
    channels = [8, 16]
    kernel_sizes = [3, 3]
    hidden_sizes = [32]
    num_actions = 6

    params = init_params(k_param, input_dim, channels, kernel_sizes,
                         hidden_sizes, num_actions)
    state = jax.random.normal(k_state, (batch,) + input_dim, dtype=jnp.float32)

    # One-time offline repack (folds transpose/flatten into weights, pads lanes).
    prepared = prepare_params(params, input_dim, batch)
    fwd = jax.jit(functools.partial(softmax_policy_forward_fused,
                                    cfg=prepared["cfg"]))

    logits = fwd(state, prepared["arrays"])
    logits = jax.block_until_ready(logits)

    assert logits.shape == (batch, num_actions), logits.shape
    assert logits.dtype == jnp.float32

    ref = jax.block_until_ready(reference_forward(state, params))
    assert jnp.allclose(logits, ref, atol=1e-4, rtol=1e-4), (
        "Pallas forward disagrees with reference")

    print("KERNEL_OK")
</pallas_src>

<mosaic_0001>
module attributes {stable_mosaic.version = 11 : i64} {
  func.func @kernel(%arg0: i32, %arg1: memref<8x384xf32, #tpu.memory_space<vmem>>, %arg2: memref<9x16x8xf32, #tpu.memory_space<vmem>>, %arg3: memref<16x1xf32, #tpu.memory_space<vmem>>, %arg4: memref<9x32x16xf32, #tpu.memory_space<vmem>>, %arg5: memref<32x1xf32, #tpu.memory_space<vmem>>, %arg6: memref<16x256x32xf32, #tpu.memory_space<vmem>>, %arg7: memref<1x32xf32, #tpu.memory_space<vmem>>, %arg8: memref<32x128xf32, #tpu.memory_space<vmem>>, %arg9: memref<1x128xf32, #tpu.memory_space<vmem>>, %arg10: memref<2x128xf32, #tpu.memory_space<vmem>>, %arg11: memref<16x384xf32, #tpu.memory_space<vmem>>, %arg12: memref<32x256xf32, #tpu.memory_space<vmem>>) attributes {dimension_semantics = [#tpu.dimension_semantics<arbitrary>], iteration_bounds = array<i64: 1>, scalar_prefetch = 0 : i64, scratch_operands = 2 : i64, tpu.core_type = #tpu.core_type<tc>, window_params = [{pipeline_mode = #tpu.pipeline_mode<synchronous>, transform_indices = @transform_0, window_bounds = array<i64: 8, 384>}, {pipeline_mode = #tpu.pipeline_mode<synchronous>, transform_indices = @transform_1, window_bounds = array<i64: 9, 16, 8>}, {pipeline_mode = #tpu.pipeline_mode<synchronous>, transform_indices = @transform_2, window_bounds = array<i64: 16, 1>}, {pipeline_mode = #tpu.pipeline_mode<synchronous>, transform_indices = @transform_3, window_bounds = array<i64: 9, 32, 16>}, {pipeline_mode = #tpu.pipeline_mode<synchronous>, transform_indices = @transform_4, window_bounds = array<i64: 32, 1>}, {pipeline_mode = #tpu.pipeline_mode<synchronous>, transform_indices = @transform_5, window_bounds = array<i64: 16, 256, 32>}, {pipeline_mode = #tpu.pipeline_mode<synchronous>, transform_indices = @transform_6, window_bounds = array<i64: 1, 32>}, {pipeline_mode = #tpu.pipeline_mode<synchronous>, transform_indices = @transform_7, window_bounds = array<i64: 32, 128>}, {pipeline_mode = #tpu.pipeline_mode<synchronous>, transform_indices = @transform_8, window_bounds = array<i64: 1, 128>}, {pipeline_mode = #tpu.pipeline_mode<synchronous>, transform_indices = @transform_9, window_bounds = array<i64: 2, 128>}]} {
    %cst = arith.constant 0.000000e+00 : f32
    %0 = vector.broadcast %cst : f32 to vector<16x256xf32>
    %c0 = arith.constant 0 : index
    %c0_0 = arith.constant 0 : index
    %c0_1 = arith.constant 0 : index
    %1 = vector.load %arg2[%c0, %c0_0, %c0_1] : memref<9x16x8xf32, #tpu.memory_space<vmem>>, vector<1x16x8xf32>
    %2 = vector.shape_cast %1 : vector<1x16x8xf32> to vector<16x8xf32>
    %c0_2 = arith.constant 0 : index
    %c0_3 = arith.constant 0 : index
    %3 = vector.load %arg1[%c0_2, %c0_3] : memref<8x384xf32, #tpu.memory_space<vmem>>, vector<8x256xf32>
    %cst_4 = arith.constant dense<0.000000e+00> : vector<16x256xf32>
    %4 = tpu.matmul %2, %3, %cst_4 {dimension_numbers = #tpu.dot_dimension_numbers<[1], [0], [0], [1], [0, 0, 1, 1], [], []>} : vector<16x8xf32>, vector<8x256xf32>, vector<16x256xf32> -> vector<16x256xf32>
    %5 = arith.addf %0, %4 : vector<16x256xf32>
    %c1 = arith.constant 1 : index
    %c0_5 = arith.constant 0 : index
    %c0_6 = arith.constant 0 : index
    %6 = vector.load %arg2[%c1, %c0_5, %c0_6] : memref<9x16x8xf32, #tpu.memory_space<vmem>>, vector<1x16x8xf32>
    %7 = vector.shape_cast %6 : vector<1x16x8xf32> to vector<16x8xf32>
    %c0_7 = arith.constant 0 : index
    %c1_8 = arith.constant 1 : index
    %8 = vector.load %arg1[%c0_7, %c1_8] : memref<8x384xf32, #tpu.memory_space<vmem>>, vector<8x256xf32>
    %cst_9 = arith.constant dense<0.000000e+00> : vector<16x256xf32>
    %9 = tpu.matmul %7, %8, %cst_9 {dimension_numbers = #tpu.dot_dimension_numbers<[1], [0], [0], [1], [0, 0, 1, 1], [], []>} : vector<16x8xf32>, vector<8x256xf32>, vector<16x256xf32> -> vector<16x256xf32>
    %10 = arith.addf %5, %9 : vector<16x256xf32>
    %c2 = arith.constant 2 : index
    %c0_10 = arith.constant 0 : index
    %c0_11 = arith.constant 0 : index
    %11 = vector.load %arg2[%c2, %c0_10, %c0_11] : memref<9x16x8xf32, #tpu.memory_space<vmem>>, vector<1x16x8xf32>
    %12 = vector.shape_cast %11 : vector<1x16x8xf32> to vector<16x8xf32>
    %c0_12 = arith.constant 0 : index
    %c2_13 = arith.constant 2 : index
    %13 = vector.load %arg1[%c0_12, %c2_13] : memref<8x384xf32, #tpu.memory_space<vmem>>, vector<8x256xf32>
    %cst_14 = arith.constant dense<0.000000e+00> : vector<16x256xf32>
    %14 = tpu.matmul %12, %13, %cst_14 {dimension_numbers = #tpu.dot_dimension_numbers<[1], [0], [0], [1], [0, 0, 1, 1], [], []>} : vector<16x8xf32>, vector<8x256xf32>, vector<16x256xf32> -> vector<16x256xf32>
    %15 = arith.addf %10, %14 : vector<16x256xf32>
    %c3 = arith.constant 3 : index
    %c0_15 = arith.constant 0 : index
    %c0_16 = arith.constant 0 : index
    %16 = vector.load %arg2[%c3, %c0_15, %c0_16] : memref<9x16x8xf32, #tpu.memory_space<vmem>>, vector<1x16x8xf32>
    %17 = vector.shape_cast %16 : vector<1x16x8xf32> to vector<16x8xf32>
    %c0_17 = arith.constant 0 : index
    %c16 = arith.constant 16 : index
    %18 = vector.load %arg1[%c0_17, %c16] : memref<8x384xf32, #tpu.memory_space<vmem>>, vector<8x256xf32>
    %cst_18 = arith.constant dense<0.000000e+00> : vector<16x256xf32>
    %19 = tpu.matmul %17, %18, %cst_18 {dimension_numbers = #tpu.dot_dimension_numbers<[1], [0], [0], [1], [0, 0, 1, 1], [], []>} : vector<16x8xf32>, vector<8x256xf32>, vector<16x256xf32> -> vector<16x256xf32>
    %20 = arith.addf %15, %19 : vector<16x256xf32>
    %c4 = arith.constant 4 : index
    %c0_19 = arith.constant 0 : index
    %c0_20 = arith.constant 0 : index
    %21 = vector.load %arg2[%c4, %c0_19, %c0_20] : memref<9x16x8xf32, #tpu.memory_space<vmem>>, vector<1x16x8xf32>
    %22 = vector.shape_cast %21 : vector<1x16x8xf32> to vector<16x8xf32>
    %c0_21 = arith.constant 0 : index
    %c17 = arith.constant 17 : index
    %23 = vector.load %arg1[%c0_21, %c17] : memref<8x384xf32, #tpu.memory_space<vmem>>, vector<8x256xf32>
    %cst_22 = arith.constant dense<0.000000e+00> : vector<16x256xf32>
    %24 = tpu.matmul %22, %23, %cst_22 {dimension_numbers = #tpu.dot_dimension_numbers<[1], [0], [0], [1], [0, 0, 1, 1], [], []>} : vector<16x8xf32>, vector<8x256xf32>, vector<16x256xf32> -> vector<16x256xf32>
    %25 = arith.addf %20, %24 : vector<16x256xf32>
    %c5 = arith.constant 5 : index
    %c0_23 = arith.constant 0 : index
    %c0_24 = arith.constant 0 : index
    %26 = vector.load %arg2[%c5, %c0_23, %c0_24] : memref<9x16x8xf32, #tpu.memory_space<vmem>>, vector<1x16x8xf32>
    %27 = vector.shape_cast %26 : vector<1x16x8xf32> to vector<16x8xf32>
    %c0_25 = arith.constant 0 : index
    %c18 = arith.constant 18 : index
    %28 = vector.load %arg1[%c0_25, %c18] : memref<8x384xf32, #tpu.memory_space<vmem>>, vector<8x256xf32>
    %cst_26 = arith.constant dense<0.000000e+00> : vector<16x256xf32>
    %29 = tpu.matmul %27, %28, %cst_26 {dimension_numbers = #tpu.dot_dimension_numbers<[1], [0], [0], [1], [0, 0, 1, 1], [], []>} : vector<16x8xf32>, vector<8x256xf32>, vector<16x256xf32> -> vector<16x256xf32>
    %30 = arith.addf %25, %29 : vector<16x256xf32>
    %c6 = arith.constant 6 : index
    %c0_27 = arith.constant 0 : index
    %c0_28 = arith.constant 0 : index
    %31 = vector.load %arg2[%c6, %c0_27, %c0_28] : memref<9x16x8xf32, #tpu.memory_space<vmem>>, vector<1x16x8xf32>
    %32 = vector.shape_cast %31 : vector<1x16x8xf32> to vector<16x8xf32>
    %c0_29 = arith.constant 0 : index
    %c32 = arith.constant 32 : index
    %33 = vector.load %arg1[%c0_29, %c32] : memref<8x384xf32, #tpu.memory_space<vmem>>, vector<8x256xf32>
    %cst_30 = arith.constant dense<0.000000e+00> : vector<16x256xf32>
    %34 = tpu.matmul %32, %33, %cst_30 {dimension_numbers = #tpu.dot_dimension_numbers<[1], [0], [0], [1], [0, 0, 1, 1], [], []>} : vector<16x8xf32>, vector<8x256xf32>, vector<16x256xf32> -> vector<16x256xf32>
    %35 = arith.addf %30, %34 : vector<16x256xf32>
    %c7 = arith.constant 7 : index
    %c0_31 = arith.constant 0 : index
    %c0_32 = arith.constant 0 : index
    %36 = vector.load %arg2[%c7, %c0_31, %c0_32] : memref<9x16x8xf32, #tpu.memory_space<vmem>>, vector<1x16x8xf32>
    %37 = vector.shape_cast %36 : vector<1x16x8xf32> to vector<16x8xf32>
    %c0_33 = arith.constant 0 : index
    %c33 = arith.constant 33 : index
    %38 = vector.load %arg1[%c0_33, %c33] : memref<8x384xf32, #tpu.memory_space<vmem>>, vector<8x256xf32>
    %cst_34 = arith.constant dense<0.000000e+00> : vector<16x256xf32>
    %39 = tpu.matmul %37, %38, %cst_34 {dimension_numbers = #tpu.dot_dimension_numbers<[1], [0], [0], [1], [0, 0, 1, 1], [], []>} : vector<16x8xf32>, vector<8x256xf32>, vector<16x256xf32> -> vector<16x256xf32>
    %40 = arith.addf %35, %39 : vector<16x256xf32>
    %c8 = arith.constant 8 : index
    %c0_35 = arith.constant 0 : index
    %c0_36 = arith.constant 0 : index
    %41 = vector.load %arg2[%c8, %c0_35, %c0_36] : memref<9x16x8xf32, #tpu.memory_space<vmem>>, vector<1x16x8xf32>
    %42 = vector.shape_cast %41 : vector<1x16x8xf32> to vector<16x8xf32>
    %c0_37 = arith.constant 0 : index
    %c34 = arith.constant 34 : index
    %43 = vector.load %arg1[%c0_37, %c34] : memref<8x384xf32, #tpu.memory_space<vmem>>, vector<8x256xf32>
    %cst_38 = arith.constant dense<0.000000e+00> : vector<16x256xf32>
    %44 = tpu.matmul %42, %43, %cst_38 {dimension_numbers = #tpu.dot_dimension_numbers<[1], [0], [0], [1], [0, 0, 1, 1], [], []>} : vector<16x8xf32>, vector<8x256xf32>, vector<16x256xf32> -> vector<16x256xf32>
    %45 = arith.addf %40, %44 : vector<16x256xf32>
    %c0_39 = arith.constant 0 : index
    %c0_40 = arith.constant 0 : index
    %46 = vector.load %arg3[%c0_39, %c0_40] : memref<16x1xf32, #tpu.memory_space<vmem>>, vector<16x1xf32>
    %47 = vector.broadcast %46 : vector<16x1xf32> to vector<16x256xf32>
    %48 = arith.addf %45, %47 : vector<16x256xf32>
    %cst_41 = arith.constant 0.000000e+00 : f32
    %49 = vector.broadcast %cst_41 : f32 to vector<16x256xf32>
    %50 = arith.maximumf %48, %49 : vector<16x256xf32>
    %cst_42 = arith.constant 0.000000e+00 : f32
    %51 = vector.broadcast %cst_42 : f32 to vector<16x128xf32>
    %c0_43 = arith.constant 0 : index
    %c256 = arith.constant 256 : index
    %52 = vector.load %arg11[%c0_43, %c256] : memref<16x384xf32, #tpu.memory_space<vmem>>, vector<16x128xf32>
    tpu.vector_store %arg11[%c0_43, %c256], %51 {strides = array<i32>} : memref<16x384xf32, #tpu.memory_space<vmem>>, vector<16x128xf32>,
    %c0_44 = arith.constant 0 : index
    %c0_45 = arith.constant 0 : index
    %53 = vector.load %arg11[%c0_44, %c0_45] : memref<16x384xf32, #tpu.memory_space<vmem>>, vector<16x256xf32>
    tpu.vector_store %arg11[%c0_44, %c0_45], %50 {strides = array<i32>} : memref<16x384xf32, #tpu.memory_space<vmem>>, vector<16x256xf32>,
    %cst_46 = arith.constant 0.000000e+00 : f32
    %54 = vector.broadcast %cst_46 : f32 to vector<32x256xf32>
    %c0_47 = arith.constant 0 : index
    %c0_48 = arith.constant 0 : index
    %c0_49 = arith.constant 0 : index
    %55 = vector.load %arg4[%c0_47, %c0_48, %c0_49] : memref<9x32x16xf32, #tpu.memory_space<vmem>>, vector<1x32x16xf32>
    %56 = vector.shape_cast %55 : vector<1x32x16xf32> to vector<32x16xf32>
    %c0_50 = arith.constant 0 : index
    %c0_51 = arith.constant 0 : index
    %57 = vector.load %arg11[%c0_50, %c0_51] : memref<16x384xf32, #tpu.memory_space<vmem>>, vector<16x256xf32>
    %cst_52 = arith.constant dense<0.000000e+00> : vector<32x256xf32>
    %58 = tpu.matmul %56, %57, %cst_52 {dimension_numbers = #tpu.dot_dimension_numbers<[1], [0], [0], [1], [0, 0, 1, 1], [], []>} : vector<32x16xf32>, vector<16x256xf32>, vector<32x256xf32> -> vector<32x256xf32>
    %59 = arith.addf %54, %58 : vector<32x256xf32>
    %c1_53 = arith.constant 1 : index
    %c0_54 = arith.constant 0 : index
    %c0_55 = arith.constant 0 : index
    %60 = vector.load %arg4[%c1_53, %c0_54, %c0_55] : memref<9x32x16xf32, #tpu.memory_space<vmem>>, vector<1x32x16xf32>
    %61 = vector.shape_cast %60 : vector<1x32x16xf32> to vector<32x16xf32>
    %c0_56 = arith.constant 0 : index
    %c1_57 = arith.constant 1 : index
    %62 = vector.load %arg11[%c0_56, %c1_57] : memref<16x384xf32, #tpu.memory_space<vmem>>, vector<16x256xf32>
    %cst_58 = arith.constant dense<0.000000e+00> : vector<32x256xf32>
    %63 = tpu.matmul %61, %62, %cst_58 {dimension_numbers = #tpu.dot_dimension_numbers<[1], [0], [0], [1], [0, 0, 1, 1], [], []>} : vector<32x16xf32>, vector<16x256xf32>, vector<32x256xf32> -> vector<32x256xf32>
    %64 = arith.addf %59, %63 : vector<32x256xf32>
    %c2_59 = arith.constant 2 : index
    %c0_60 = arith.constant 0 : index
    %c0_61 = arith.constant 0 : index
    %65 = vector.load %arg4[%c2_59, %c0_60, %c0_61] : memref<9x32x16xf32, #tpu.memory_space<vmem>>, vector<1x32x16xf32>
    %66 = vector.shape_cast %65 : vector<1x32x16xf32> to vector<32x16xf32>
    %c0_62 = arith.constant 0 : index
    %c2_63 = arith.constant 2 : index
    %67 = vector.load %arg11[%c0_62, %c2_63] : memref<16x384xf32, #tpu.memory_space<vmem>>, vector<16x256xf32>
    %cst_64 = arith.constant dense<0.000000e+00> : vector<32x256xf32>
    %68 = tpu.matmul %66, %67, %cst_64 {dimension_numbers = #tpu.dot_dimension_numbers<[1], [0], [0], [1], [0, 0, 1, 1], [], []>} : vector<32x16xf32>, vector<16x256xf32>, vector<32x256xf32> -> vector<32x256xf32>
    %69 = arith.addf %64, %68 : vector<32x256xf32>
    %c3_65 = arith.constant 3 : index
    %c0_66 = arith.constant 0 : index
    %c0_67 = arith.constant 0 : index
    %70 = vector.load %arg4[%c3_65, %c0_66, %c0_67] : memref<9x32x16xf32, #tpu.memory_space<vmem>>, vector<1x32x16xf32>
    %71 = vector.shape_cast %70 : vector<1x32x16xf32> to vector<32x16xf32>
    %c0_68 = arith.constant 0 : index
    %c16_69 = arith.constant 16 : index
    %72 = vector.load %arg11[%c0_68, %c16_69] : memref<16x384xf32, #tpu.memory_space<vmem>>, vector<16x256xf32>
    %cst_70 = arith.constant dense<0.000000e+00> : vector<32x256xf32>
    %73 = tpu.matmul %71, %72, %cst_70 {dimension_numbers = #tpu.dot_dimension_numbers<[1], [0], [0], [1], [0, 0, 1, 1], [], []>} : vector<32x16xf32>, vector<16x256xf32>, vector<32x256xf32> -> vector<32x256xf32>
    %74 = arith.addf %69, %73 : vector<32x256xf32>
    %c4_71 = arith.constant 4 : index
    %c0_72 = arith.constant 0 : index
    %c0_73 = arith.constant 0 : index
    %75 = vector.load %arg4[%c4_71, %c0_72, %c0_73] : memref<9x32x16xf32, #tpu.memory_space<vmem>>, vector<1x32x16xf32>
    %76 = vector.shape_cast %75 : vector<1x32x16xf32> to vector<32x16xf32>
    %c0_74 = arith.constant 0 : index
    %c17_75 = arith.constant 17 : index
    %77 = vector.load %arg11[%c0_74, %c17_75] : memref<16x384xf32, #tpu.memory_space<vmem>>, vector<16x256xf32>
    %cst_76 = arith.constant dense<0.000000e+00> : vector<32x256xf32>
    %78 = tpu.matmul %76, %77, %cst_76 {dimension_numbers = #tpu.dot_dimension_numbers<[1], [0], [0], [1], [0, 0, 1, 1], [], []>} : vector<32x16xf32>, vector<16x256xf32>, vector<32x256xf32> -> vector<32x256xf32>
    %79 = arith.addf %74, %78 : vector<32x256xf32>
    %c5_77 = arith.constant 5 : index
    %c0_78 = arith.constant 0 : index
    %c0_79 = arith.constant 0 : index
    %80 = vector.load %arg4[%c5_77, %c0_78, %c0_79] : memref<9x32x16xf32, #tpu.memory_space<vmem>>, vector<1x32x16xf32>
    %81 = vector.shape_cast %80 : vector<1x32x16xf32> to vector<32x16xf32>
    %c0_80 = arith.constant 0 : index
    %c18_81 = arith.constant 18 : index
    %82 = vector.load %arg11[%c0_80, %c18_81] : memref<16x384xf32, #tpu.memory_space<vmem>>, vector<16x256xf32>
    %cst_82 = arith.constant dense<0.000000e+00> : vector<32x256xf32>
    %83 = tpu.matmul %81, %82, %cst_82 {dimension_numbers = #tpu.dot_dimension_numbers<[1], [0], [0], [1], [0, 0, 1, 1], [], []>} : vector<32x16xf32>, vector<16x256xf32>, vector<32x256xf32> -> vector<32x256xf32>
    %84 = arith.addf %79, %83 : vector<32x256xf32>
    %c6_83 = arith.constant 6 : index
    %c0_84 = arith.constant 0 : index
    %c0_85 = arith.constant 0 : index
    %85 = vector.load %arg4[%c6_83, %c0_84, %c0_85] : memref<9x32x16xf32, #tpu.memory_space<vmem>>, vector<1x32x16xf32>
    %86 = vector.shape_cast %85 : vector<1x32x16xf32> to vector<32x16xf32>
    %c0_86 = arith.constant 0 : index
    %c32_87 = arith.constant 32 : index
    %87 = vector.load %arg11[%c0_86, %c32_87] : memref<16x384xf32, #tpu.memory_space<vmem>>, vector<16x256xf32>
    %cst_88 = arith.constant dense<0.000000e+00> : vector<32x256xf32>
    %88 = tpu.matmul %86, %87, %cst_88 {dimension_numbers = #tpu.dot_dimension_numbers<[1], [0], [0], [1], [0, 0, 1, 1], [], []>} : vector<32x16xf32>, vector<16x256xf32>, vector<32x256xf32> -> vector<32x256xf32>
    %89 = arith.addf %84, %88 : vector<32x256xf32>
    %c7_89 = arith.constant 7 : index
    %c0_90 = arith.constant 0 : index
    %c0_91 = arith.constant 0 : index
    %90 = vector.load %arg4[%c7_89, %c0_90, %c0_91] : memref<9x32x16xf32, #tpu.memory_space<vmem>>, vector<1x32x16xf32>
    %91 = vector.shape_cast %90 : vector<1x32x16xf32> to vector<32x16xf32>
    %c0_92 = arith.constant 0 : index
    %c33_93 = arith.constant 33 : index
    %92 = vector.load %arg11[%c0_92, %c33_93] : memref<16x384xf32, #tpu.memory_space<vmem>>, vector<16x256xf32>
    %cst_94 = arith.constant dense<0.000000e+00> : vector<32x256xf32>
    %93 = tpu.matmul %91, %92, %cst_94 {dimension_numbers = #tpu.dot_dimension_numbers<[1], [0], [0], [1], [0, 0, 1, 1], [], []>} : vector<32x16xf32>, vector<16x256xf32>, vector<32x256xf32> -> vector<32x256xf32>
    %94 = arith.addf %89, %93 : vector<32x256xf32>
    %c8_95 = arith.constant 8 : index
    %c0_96 = arith.constant 0 : index
    %c0_97 = arith.constant 0 : index
    %95 = vector.load %arg4[%c8_95, %c0_96, %c0_97] : memref<9x32x16xf32, #tpu.memory_space<vmem>>, vector<1x32x16xf32>
    %96 = vector.shape_cast %95 : vector<1x32x16xf32> to vector<32x16xf32>
    %c0_98 = arith.constant 0 : index
    %c34_99 = arith.constant 34 : index
    %97 = vector.load %arg11[%c0_98, %c34_99] : memref<16x384xf32, #tpu.memory_space<vmem>>, vector<16x256xf32>
    %cst_100 = arith.constant dense<0.000000e+00> : vector<32x256xf32>
    %98 = tpu.matmul %96, %97, %cst_100 {dimension_numbers = #tpu.dot_dimension_numbers<[1], [0], [0], [1], [0, 0, 1, 1], [], []>} : vector<32x16xf32>, vector<16x256xf32>, vector<32x256xf32> -> vector<32x256xf32>
    %99 = arith.addf %94, %98 : vector<32x256xf32>
    %c0_101 = arith.constant 0 : index
    %c0_102 = arith.constant 0 : index
    %100 = vector.load %arg5[%c0_101, %c0_102] : memref<32x1xf32, #tpu.memory_space<vmem>>, vector<32x1xf32>
    %101 = vector.broadcast %100 : vector<32x1xf32> to vector<32x256xf32>
    %102 = arith.addf %99, %101 : vector<32x256xf32>
    %cst_103 = arith.constant 0.000000e+00 : f32
    %103 = vector.broadcast %cst_103 : f32 to vector<32x256xf32>
    %104 = arith.maximumf %102, %103 : vector<32x256xf32>
    %c0_104 = arith.constant 0 : index
    %c0_105 = arith.constant 0 : index
    %105 = vector.load %arg12[%c0_104, %c0_105] : memref<32x256xf32, #tpu.memory_space<vmem>>, vector<32x256xf32>
    tpu.vector_store %arg12[%c0_104, %c0_105], %104 {strides = array<i32>} : memref<32x256xf32, #tpu.memory_space<vmem>>, vector<32x256xf32>,
    %cst_106 = arith.constant 0.000000e+00 : f32
    %106 = vector.broadcast %cst_106 : f32 to vector<2x32xf32>
    %c0_107 = arith.constant 0 : index
    %c0_108 = arith.constant 0 : index
    %107 = vector.load %arg12[%c0_107, %c0_108] : memref<32x256xf32, #tpu.memory_space<vmem>>, vector<2x256xf32>
    %c0_109 = arith.constant 0 : index
    %c0_110 = arith.constant 0 : index
    %c0_111 = arith.constant 0 : index
    %108 = vector.load %arg6[%c0_109, %c0_110, %c0_111] : memref<16x256x32xf32, #tpu.memory_space<vmem>>, vector<1x256x32xf32>
    %109 = vector.shape_cast %108 : vector<1x256x32xf32> to vector<256x32xf32>
    %cst_112 = arith.constant dense<0.000000e+00> : vector<2x32xf32>
    %110 = tpu.matmul %107, %109, %cst_112 {dimension_numbers = #tpu.dot_dimension_numbers<[1], [0], [0], [1], [0, 0, 1, 1], [], []>} : vector<2x256xf32>, vector<256x32xf32>, vector<2x32xf32> -> vector<2x32xf32>
    %111 = arith.addf %106, %110 : vector<2x32xf32>
    %c2_113 = arith.constant 2 : index
    %c0_114 = arith.constant 0 : index
    %112 = vector.load %arg12[%c2_113, %c0_114] : memref<32x256xf32, #tpu.memory_space<vmem>>, vector<2x256xf32>
    %c1_115 = arith.constant 1 : index
    %c0_116 = arith.constant 0 : index
    %c0_117 = arith.constant 0 : index
    %113 = vector.load %arg6[%c1_115, %c0_116, %c0_117] : memref<16x256x32xf32, #tpu.memory_space<vmem>>, vector<1x256x32xf32>
    %114 = vector.shape_cast %113 : vector<1x256x32xf32> to vector<256x32xf32>
    %cst_118 = arith.constant dense<0.000000e+00> : vector<2x32xf32>
    %115 = tpu.matmul %112, %114, %cst_118 {dimension_numbers = #tpu.dot_dimension_numbers<[1], [0], [0], [1], [0, 0, 1, 1], [], []>} : vector<2x256xf32>, vector<256x32xf32>, vector<2x32xf32> -> vector<2x32xf32>
    %116 = arith.addf %111, %115 : vector<2x32xf32>
    %c4_119 = arith.constant 4 : index
    %c0_120 = arith.constant 0 : index
    %117 = vector.load %arg12[%c4_119, %c0_120] : memref<32x256xf32, #tpu.memory_space<vmem>>, vector<2x256xf32>
    %c2_121 = arith.constant 2 : index
    %c0_122 = arith.constant 0 : index
    %c0_123 = arith.constant 0 : index
    %118 = vector.load %arg6[%c2_121, %c0_122, %c0_123] : memref<16x256x32xf32, #tpu.memory_space<vmem>>, vector<1x256x32xf32>
    %119 = vector.shape_cast %118 : vector<1x256x32xf32> to vector<256x32xf32>
    %cst_124 = arith.constant dense<0.000000e+00> : vector<2x32xf32>
    %120 = tpu.matmul %117, %119, %cst_124 {dimension_numbers = #tpu.dot_dimension_numbers<[1], [0], [0], [1], [0, 0, 1, 1], [], []>} : vector<2x256xf32>, vector<256x32xf32>, vector<2x32xf32> -> vector<2x32xf32>
    %121 = arith.addf %116, %120 : vector<2x32xf32>
    %c6_125 = arith.constant 6 : index
    %c0_126 = arith.constant 0 : index
    %122 = vector.load %arg12[%c6_125, %c0_126] : memref<32x256xf32, #tpu.memory_space<vmem>>, vector<2x256xf32>
    %c3_127 = arith.constant 3 : index
    %c0_128 = arith.constant 0 : index
    %c0_129 = arith.constant 0 : index
    %123 = vector.load %arg6[%c3_127, %c0_128, %c0_129] : memref<16x256x32xf32, #tpu.memory_space<vmem>>, vector<1x256x32xf32>
    %124 = vector.shape_cast %123 : vector<1x256x32xf32> to vector<256x32xf32>
    %cst_130 = arith.constant dense<0.000000e+00> : vector<2x32xf32>
    %125 = tpu.matmul %122, %124, %cst_130 {dimension_numbers = #tpu.dot_dimension_numbers<[1], [0], [0], [1], [0, 0, 1, 1], [], []>} : vector<2x256xf32>, vector<256x32xf32>, vector<2x32xf32> -> vector<2x32xf32>
    %126 = arith.addf %121, %125 : vector<2x32xf32>
    %c8_131 = arith.constant 8 : index
    %c0_132 = arith.constant 0 : index
    %127 = vector.load %arg12[%c8_131, %c0_132] : memref<32x256xf32, #tpu.memory_space<vmem>>, vector<2x256xf32>
    %c4_133 = arith.constant 4 : index
    %c0_134 = arith.constant 0 : index
    %c0_135 = arith.constant 0 : index
    %128 = vector.load %arg6[%c4_133, %c0_134, %c0_135] : memref<16x256x32xf32, #tpu.memory_space<vmem>>, vector<1x256x32xf32>
    %129 = vector.shape_cast %128 : vector<1x256x32xf32> to vector<256x32xf32>
    %cst_136 = arith.constant dense<0.000000e+00> : vector<2x32xf32>
    %130 = tpu.matmul %127, %129, %cst_136 {dimension_numbers = #tpu.dot_dimension_numbers<[1], [0], [0], [1], [0, 0, 1, 1], [], []>} : vector<2x256xf32>, vector<256x32xf32>, vector<2x32xf32> -> vector<2x32xf32>
    %131 = arith.addf %126, %130 : vector<2x32xf32>
    %c10 = arith.constant 10 : index
    %c0_137 = arith.constant 0 : index
    %132 = vector.load %arg12[%c10, %c0_137] : memref<32x256xf32, #tpu.memory_space<vmem>>, vector<2x256xf32>
    %c5_138 = arith.constant 5 : index
    %c0_139 = arith.constant 0 : index
    %c0_140 = arith.constant 0 : index
    %133 = vector.load %arg6[%c5_138, %c0_139, %c0_140] : memref<16x256x32xf32, #tpu.memory_space<vmem>>, vector<1x256x32xf32>
    %134 = vector.shape_cast %133 : vector<1x256x32xf32> to vector<256x32xf32>
    %cst_141 = arith.constant dense<0.000000e+00> : vector<2x32xf32>
    %135 = tpu.matmul %132, %134, %cst_141 {dimension_numbers = #tpu.dot_dimension_numbers<[1], [0], [0], [1], [0, 0, 1, 1], [], []>} : vector<2x256xf32>, vector<256x32xf32>, vector<2x32xf32> -> vector<2x32xf32>
    %136 = arith.addf %131, %135 : vector<2x32xf32>
    %c12 = arith.constant 12 : index
    %c0_142 = arith.constant 0 : index
    %137 = vector.load %arg12[%c12, %c0_142] : memref<32x256xf32, #tpu.memory_space<vmem>>, vector<2x256xf32>
    %c6_143 = arith.constant 6 : index
    %c0_144 = arith.constant 0 : index
    %c0_145 = arith.constant 0 : index
    %138 = vector.load %arg6[%c6_143, %c0_144, %c0_145] : memref<16x256x32xf32, #tpu.memory_space<vmem>>, vector<1x256x32xf32>
    %139 = vector.shape_cast %138 : vector<1x256x32xf32> to vector<256x32xf32>
    %cst_146 = arith.constant dense<0.000000e+00> : vector<2x32xf32>
    %140 = tpu.matmul %137, %139, %cst_146 {dimension_numbers = #tpu.dot_dimension_numbers<[1], [0], [0], [1], [0, 0, 1, 1], [], []>} : vector<2x256xf32>, vector<256x32xf32>, vector<2x32xf32> -> vector<2x32xf32>
    %141 = arith.addf %136, %140 : vector<2x32xf32>
    %c14 = arith.constant 14 : index
    %c0_147 = arith.constant 0 : index
    %142 = vector.load %arg12[%c14, %c0_147] : memref<32x256xf32, #tpu.memory_space<vmem>>, vector<2x256xf32>
    %c7_148 = arith.constant 7 : index
    %c0_149 = arith.constant 0 : index
    %c0_150 = arith.constant 0 : index
    %143 = vector.load %arg6[%c7_148, %c0_149, %c0_150] : memref<16x256x32xf32, #tpu.memory_space<vmem>>, vector<1x256x32xf32>
    %144 = vector.shape_cast %143 : vector<1x256x32xf32> to vector<256x32xf32>
    %cst_151 = arith.constant dense<0.000000e+00> : vector<2x32xf32>
    %145 = tpu.matmul %142, %144, %cst_151 {dimension_numbers = #tpu.dot_dimension_numbers<[1], [0], [0], [1], [0, 0, 1, 1], [], []>} : vector<2x256xf32>, vector<256x32xf32>, vector<2x32xf32> -> vector<2x32xf32>
    %146 = arith.addf %141, %145 : vector<2x32xf32>
    %c16_152 = arith.constant 16 : index
    %c0_153 = arith.constant 0 : index
    %147 = vector.load %arg12[%c16_152, %c0_153] : memref<32x256xf32, #tpu.memory_space<vmem>>, vector<2x256xf32>
    %c8_154 = arith.constant 8 : index
    %c0_155 = arith.constant 0 : index
    %c0_156 = arith.constant 0 : index
    %148 = vector.load %arg6[%c8_154, %c0_155, %c0_156] : memref<16x256x32xf32, #tpu.memory_space<vmem>>, vector<1x256x32xf32>
    %149 = vector.shape_cast %148 : vector<1x256x32xf32> to vector<256x32xf32>
    %cst_157 = arith.constant dense<0.000000e+00> : vector<2x32xf32>
    %150 = tpu.matmul %147, %149, %cst_157 {dimension_numbers = #tpu.dot_dimension_numbers<[1], [0], [0], [1], [0, 0, 1, 1], [], []>} : vector<2x256xf32>, vector<256x32xf32>, vector<2x32xf32> -> vector<2x32xf32>
    %151 = arith.addf %146, %150 : vector<2x32xf32>
    %c18_158 = arith.constant 18 : index
    %c0_159 = arith.constant 0 : index
    %152 = vector.load %arg12[%c18_158, %c0_159] : memref<32x256xf32, #tpu.memory_space<vmem>>, vector<2x256xf32>
    %c9 = arith.constant 9 : index
    %c0_160 = arith.constant 0 : index
    %c0_161 = arith.constant 0 : index
    %153 = vector.load %arg6[%c9, %c0_160, %c0_161] : memref<16x256x32xf32, #tpu.memory_space<vmem>>, vector<1x256x32xf32>
    %154 = vector.shape_cast %153 : vector<1x256x32xf32> to vector<256x32xf32>
    %cst_162 = arith.constant dense<0.000000e+00> : vector<2x32xf32>
    %155 = tpu.matmul %152, %154, %cst_162 {dimension_numbers = #tpu.dot_dimension_numbers<[1], [0], [0], [1], [0, 0, 1, 1], [], []>} : vector<2x256xf32>, vector<256x32xf32>, vector<2x32xf32> -> vector<2x32xf32>
    %156 = arith.addf %151, %155 : vector<2x32xf32>
    %c20 = arith.constant 20 : index
    %c0_163 = arith.constant 0 : index
    %157 = vector.load %arg12[%c20, %c0_163] : memref<32x256xf32, #tpu.memory_space<vmem>>, vector<2x256xf32>
    %c10_164 = arith.constant 10 : index
    %c0_165 = arith.constant 0 : index
    %c0_166 = arith.constant 0 : index
    %158 = vector.load %arg6[%c10_164, %c0_165, %c0_166] : memref<16x256x32xf32, #tpu.memory_space<vmem>>, vector<1x256x32xf32>
    %159 = vector.shape_cast %158 : vector<1x256x32xf32> to vector<256x32xf32>
    %cst_167 = arith.constant dense<0.000000e+00> : vector<2x32xf32>
    %160 = tpu.matmul %157, %159, %cst_167 {dimension_numbers = #tpu.dot_dimension_numbers<[1], [0], [0], [1], [0, 0, 1, 1], [], []>} : vector<2x256xf32>, vector<256x32xf32>, vector<2x32xf32> -> vector<2x32xf32>
    %161 = arith.addf %156, %160 : vector<2x32xf32>
    %c22 = arith.constant 22 : index
    %c0_168 = arith.constant 0 : index
    %162 = vector.load %arg12[%c22, %c0_168] : memref<32x256xf32, #tpu.memory_space<vmem>>, vector<2x256xf32>
    %c11 = arith.constant 11 : index
    %c0_169 = arith.constant 0 : index
    %c0_170 = arith.constant 0 : index
    %163 = vector.load %arg6[%c11, %c0_169, %c0_170] : memref<16x256x32xf32, #tpu.memory_space<vmem>>, vector<1x256x32xf32>
    %164 = vector.shape_cast %163 : vector<1x256x32xf32> to vector<256x32xf32>
    %cst_171 = arith.constant dense<0.000000e+00> : vector<2x32xf32>
    %165 = tpu.matmul %162, %164, %cst_171 {dimension_numbers = #tpu.dot_dimension_numbers<[1], [0], [0], [1], [0, 0, 1, 1], [], []>} : vector<2x256xf32>, vector<256x32xf32>, vector<2x32xf32> -> vector<2x32xf32>
    %166 = arith.addf %161, %165 : vector<2x32xf32>
    %c24 = arith.constant 24 : index
    %c0_172 = arith.constant 0 : index
    %167 = vector.load %arg12[%c24, %c0_172] : memref<32x256xf32, #tpu.memory_space<vmem>>, vector<2x256xf32>
    %c12_173 = arith.constant 12 : index
    %c0_174 = arith.constant 0 : index
    %c0_175 = arith.constant 0 : index
    %168 = vector.load %arg6[%c12_173, %c0_174, %c0_175] : memref<16x256x32xf32, #tpu.memory_space<vmem>>, vector<1x256x32xf32>
    %169 = vector.shape_cast %168 : vector<1x256x32xf32> to vector<256x32xf32>
    %cst_176 = arith.constant dense<0.000000e+00> : vector<2x32xf32>
    %170 = tpu.matmul %167, %169, %cst_176 {dimension_numbers = #tpu.dot_dimension_numbers<[1], [0], [0], [1], [0, 0, 1, 1], [], []>} : vector<2x256xf32>, vector<256x32xf32>, vector<2x32xf32> -> vector<2x32xf32>
    %171 = arith.addf %166, %170 : vector<2x32xf32>
    %c26 = arith.constant 26 : index
    %c0_177 = arith.constant 0 : index
    %172 = vector.load %arg12[%c26, %c0_177] : memref<32x256xf32, #tpu.memory_space<vmem>>, vector<2x256xf32>
    %c13 = arith.constant 13 : index
    %c0_178 = arith.constant 0 : index
    %c0_179 = arith.constant 0 : index
    %173 = vector.load %arg6[%c13, %c0_178, %c0_179] : memref<16x256x32xf32, #tpu.memory_space<vmem>>, vector<1x256x32xf32>
    %174 = vector.shape_cast %173 : vector<1x256x32xf32> to vector<256x32xf32>
    %cst_180 = arith.constant dense<0.000000e+00> : vector<2x32xf32>
    %175 = tpu.matmul %172, %174, %cst_180 {dimension_numbers = #tpu.dot_dimension_numbers<[1], [0], [0], [1], [0, 0, 1, 1], [], []>} : vector<2x256xf32>, vector<256x32xf32>, vector<2x32xf32> -> vector<2x32xf32>
    %176 = arith.addf %171, %175 : vector<2x32xf32>
    %c28 = arith.constant 28 : index
    %c0_181 = arith.constant 0 : index
    %177 = vector.load %arg12[%c28, %c0_181] : memref<32x256xf32, #tpu.memory_space<vmem>>, vector<2x256xf32>
    %c14_182 = arith.constant 14 : index
    %c0_183 = arith.constant 0 : index
    %c0_184 = arith.constant 0 : index
    %178 = vector.load %arg6[%c14_182, %c0_183, %c0_184] : memref<16x256x32xf32, #tpu.memory_space<vmem>>, vector<1x256x32xf32>
    %179 = vector.shape_cast %178 : vector<1x256x32xf32> to vector<256x32xf32>
    %cst_185 = arith.constant dense<0.000000e+00> : vector<2x32xf32>
    %180 = tpu.matmul %177, %179, %cst_185 {dimension_numbers = #tpu.dot_dimension_numbers<[1], [0], [0], [1], [0, 0, 1, 1], [], []>} : vector<2x256xf32>, vector<256x32xf32>, vector<2x32xf32> -> vector<2x32xf32>
    %181 = arith.addf %176, %180 : vector<2x32xf32>
    %c30 = arith.constant 30 : index
    %c0_186 = arith.constant 0 : index
    %182 = vector.load %arg12[%c30, %c0_186] : memref<32x256xf32, #tpu.memory_space<vmem>>, vector<2x256xf32>
    %c15 = arith.constant 15 : index
    %c0_187 = arith.constant 0 : index
    %c0_188 = arith.constant 0 : index
    %183 = vector.load %arg6[%c15, %c0_187, %c0_188] : memref<16x256x32xf32, #tpu.memory_space<vmem>>, vector<1x256x32xf32>
    %184 = vector.shape_cast %183 : vector<1x256x32xf32> to vector<256x32xf32>
    %cst_189 = arith.constant dense<0.000000e+00> : vector<2x32xf32>
    %185 = tpu.matmul %182, %184, %cst_189 {dimension_numbers = #tpu.dot_dimension_numbers<[1], [0], [0], [1], [0, 0, 1, 1], [], []>} : vector<2x256xf32>, vector<256x32xf32>, vector<2x32xf32> -> vector<2x32xf32>
    %186 = arith.addf %181, %185 : vector<2x32xf32>
    %c0_190 = arith.constant 0 : index
    %c0_191 = arith.constant 0 : index
    %187 = vector.load %arg7[%c0_190, %c0_191] : memref<1x32xf32, #tpu.memory_space<vmem>>, vector<1x32xf32>
    %188 = vector.broadcast %187 : vector<1x32xf32> to vector<2x32xf32>
    %189 = arith.addf %186, %188 : vector<2x32xf32>
    %cst_192 = arith.constant 0.000000e+00 : f32
    %190 = vector.broadcast %cst_192 : f32 to vector<2x32xf32>
    %191 = arith.maximumf %189, %190 : vector<2x32xf32>
    %c0_193 = arith.constant 0 : index
    %c0_194 = arith.constant 0 : index
    %192 = vector.load %arg8[%c0_193, %c0_194] : memref<32x128xf32, #tpu.memory_space<vmem>>, vector<32x128xf32>
    %cst_195 = arith.constant dense<0.000000e+00> : vector<2x128xf32>
    %193 = tpu.matmul %191, %192, %cst_195 {dimension_numbers = #tpu.dot_dimension_numbers<[1], [0], [0], [1], [0, 0, 1, 1], [], []>} : vector<2x32xf32>, vector<32x128xf32>, vector<2x128xf32> -> vector<2x128xf32>
    %c0_196 = arith.constant 0 : index
    %c0_197 = arith.constant 0 : index
    %194 = vector.load %arg9[%c0_196, %c0_197] : memref<1x128xf32, #tpu.memory_space<vmem>>, vector<1x128xf32>
    %195 = vector.broadcast %194 : vector<1x128xf32> to vector<2x128xf32>
    %196 = arith.addf %193, %195 : vector<2x128xf32>
    %c0_198 = arith.constant 0 : index
    %c0_199 = arith.constant 0 : index
    %197 = vector.load %arg10[%c0_198, %c0_199] : memref<2x128xf32, #tpu.memory_space<vmem>>, vector<2x128xf32>
    tpu.vector_store %arg10[%c0_198, %c0_199], %196 {strides = array<i32>} : memref<2x128xf32, #tpu.memory_space<vmem>>, vector<2x128xf32>,
    return
  }
  func.func @transform_0(%arg0: i32) -> (i32, i32) {
    %c0_i32 = arith.constant 0 : i32
    %c0_i32_0 = arith.constant 0 : i32
    %c0_i32_1 = arith.constant 0 : i32
    return %c0_i32, %c0_i32_0 : i32, i32
  }
  func.func @transform_1(%arg0: i32) -> (i32, i32, i32) {
    %c0_i32 = arith.constant 0 : i32
    %c0_i32_0 = arith.constant 0 : i32
    %c0_i32_1 = arith.constant 0 : i32
    %c0_i32_2 = arith.constant 0 : i32
    return %c0_i32, %c0_i32_0, %c0_i32_1 : i32, i32, i32
  }
  func.func @transform_2(%arg0: i32) -> (i32, i32) {
    %c0_i32 = arith.constant 0 : i32
    %c0_i32_0 = arith.constant 0 : i32
    %c0_i32_1 = arith.constant 0 : i32
    return %c0_i32, %c0_i32_0 : i32, i32
  }
  func.func @transform_3(%arg0: i32) -> (i32, i32, i32) {
    %c0_i32 = arith.constant 0 : i32
    %c0_i32_0 = arith.constant 0 : i32
    %c0_i32_1 = arith.constant 0 : i32
    %c0_i32_2 = arith.constant 0 : i32
    return %c0_i32, %c0_i32_0, %c0_i32_1 : i32, i32, i32
  }
  func.func @transform_4(%arg0: i32) -> (i32, i32) {
    %c0_i32 = arith.constant 0 : i32
    %c0_i32_0 = arith.constant 0 : i32
    %c0_i32_1 = arith.constant 0 : i32
    return %c0_i32, %c0_i32_0 : i32, i32
  }
  func.func @transform_5(%arg0: i32) -> (i32, i32, i32) {
    %c0_i32 = arith.constant 0 : i32
    %c0_i32_0 = arith.constant 0 : i32
    %c0_i32_1 = arith.constant 0 : i32
    %c0_i32_2 = arith.constant 0 : i32
    return %c0_i32, %c0_i32_0, %c0_i32_1 : i32, i32, i32
  }
  func.func @transform_6(%arg0: i32) -> (i32, i32) {
    %c0_i32 = arith.constant 0 : i32
    %c0_i32_0 = arith.constant 0 : i32
    %c0_i32_1 = arith.constant 0 : i32
    return %c0_i32, %c0_i32_0 : i32, i32
  }
  func.func @transform_7(%arg0: i32) -> (i32, i32) {
    %c0_i32 = arith.constant 0 : i32
    %c0_i32_0 = arith.constant 0 : i32
    %c0_i32_1 = arith.constant 0 : i32
    return %c0_i32, %c0_i32_0 : i32, i32
  }
  func.func @transform_8(%arg0: i32) -> (i32, i32) {
    %c0_i32 = arith.constant 0 : i32
    %c0_i32_0 = arith.constant 0 : i32
    %c0_i32_1 = arith.constant 0 : i32
    return %c0_i32, %c0_i32_0 : i32, i32
  }
  func.func @transform_9(%arg0: i32) -> (i32, i32) {
    %c0_i32 = arith.constant 0 : i32
    %c0_i32_0 = arith.constant 0 : i32
    %c0_i32_1 = arith.constant 0 : i32
    return %c0_i32, %c0_i32_0 : i32, i32
  }
}

</mosaic_0001>

<bundles_post_ra>
// kernel: softmax_policy_forward_fused.1
= control target key start
LH: loop header
LB: loop body
LE: loop exit
PB: predicated region body
PF: predicated region fallthrough
CT: control target
= control target key end

     0   :  { %s6037_s13 = smov 127   ;;  %v6038_v3 = vmov 0.0   ;;  %s8091_s0 = inlined_call_operand.vmem [shape: f32[8,384], index: 0, kind: input, shape index: {}]   ;;  %s8092_s1 = inlined_call_operand.vmem [shape: f32[9,16,8], index: 1, kind: input, shape index: {}]   ;;  %s8093_s2 = inlined_call_operand.vmem [shape: f32[16,1], index: 2, kind: input, shape index: {}]   ;;  %s8094_s3 = inlined_call_operand.vmem [shape: f32[9,32,16], index: 3, kind: input, shape index: {}]   ;;  %s8095_s4 = inlined_call_operand.vmem [shape: f32[32,1], index: 4, kind: input, shape index: {}]   ;;  %s8096_s5 = inlined_call_operand.vmem [shape: f32[16,256,32], index: 5, kind: input, shape index: {}]   ;;  %s8097_s6 = inlined_call_operand.vmem [shape: f32[1,32], index: 6, kind: input, shape index: {}]   ;;  %s8098_s7 = inlined_call_operand.vmem [shape: f32[32,128], index: 7, kind: input, shape index: {}]   ;;  %s8099_s8 = inlined_call_operand.vmem [shape: f32[1,128], index: 8, kind: input, shape index: {}]   ;;  %s8100_s9 = inlined_call_operand.hbm [shape: f32[2,128], index: 9, kind: output, shape index: {}]  }
   0x1   :  { %v41_v0 = vld [vmem:[%s8091_s0 + $0x8] sm:$0xff]  ;;  %v6106_v1 = vld [vmem:[%s8091_s0] sm:$0xff]  ;;  %v42_v2 = vld [vmem:[%s8091_s0 + $0x10] sm:$0xff]  ;;  %128 = vmatprep.mubr.f32.mxu0 %v6038_v3  ;;  %134 = vmatprep.mubr.f32.mxu1 %v6038_v3 }
   0x2   :  { %48 = vrot.lane.b32.xlu0 %v41_v0, %s6037_s13  ;;  %46 = vrot.lane.b32.xlu1 %v6106_v1, %s6037_s13 }
   0x3   :  { %14 = vsyncpa [#allocation5], 0  ;;  %s6039_s16 = smov 126   ;;  %s6040_s17 = smov 112   ;;  %v931_v4 = vld [vmem:[%s8093_s2] sm:$0xff]  ;;  %v932_v5 = vld [vmem:[%s8093_s2 + $0x8] sm:$0xff] }
   0x4   :  { %s6041_s0 = smov 111   ;;  %s6042_s18 = smov 110   ;;  %v6046_v6 = vmov 0   ;;  %vm52_vm0 = vcmask 1039360   ;;  %v4065_v12 = vld [vmem:[%s8092_s1 + $0x10] sm:$0xff]  ;;  %vm57_vm1 = vcmask 64512  }
   0x5   :  { %s6043_s19 = smov 96   ;;  %s6044_s20 = smov 95   ;;  %5891 = vset.pattern.permute.xlu0 %v6046_v6  ;;  %5892 = vset.pattern.permute.xlu1 %v6046_v6  ;;  %vm233_vm2 = vcmask 1031168   ;;  %v4066_v14 = vld [vmem:[%s8092_s1 + $0x18] sm:$0xff]  ;;  %vm334_vm3 = vcmask 916480   ;;  %v33_v20 = vld [vmem:[%s8092_s1] sm:$0xff] }
   0x6   :  { %50 = vrot.lane.b32.xlu0 %v42_v2, %s6037_s13  ;;  %229 = vrot.lane.b32.xlu1 %v41_v0, %s6039_s16  ;;  %s6045_s21 = smov 94   ;;  %v34_v24 = vld [vmem:[%s8092_s1 + $0x8] sm:$0xff]  ;;  %vm435_vm4 = vcmask 908288   ;;  %v4071_v27 = vld [vmem:[%s8092_s1 + $0x20] sm:$0xff]  ;;  %vm536_vm5 = vcmask 900096   ;;  %vm637_vm6 = vcmask 785408  }
   0x7   :  { %v4072_v31 = vld [vmem:[%s8092_s1 + $0x28] sm:$0xff]  ;;  %v4075_v34 = vld [vmem:[%s8092_s1 + $0x30] sm:$0xff]  ;;  %v4076_v38 = vld [vmem:[%s8092_s1 + $0x38] sm:$0xff]  ;;  %vm738_vm7 = vcmask 777216   ;;  %vm839_vm8 = vcmask 769024   ;;  %vm1002_vm9 = vcmask 130048  }
   0x8   :  { %v4079_v41 = vld [vmem:[%s8092_s1 + $0x40] sm:$0xff]  ;;  %v4080_v45 = vld [vmem:[%s8092_s1 + $0x48] sm:$0xff]  ;;  %v4083_v48 = vld [vmem:[%s8092_s1 + $0x50] sm:$0xff]  ;;  %vm6048_vm10 = vmmov 0   ;;  %vm3976_vm11 = vcmask 261120  }
   0x9   :  { %v4084_v52 = vld [vmem:[%s8092_s1 + $0x58] sm:$0xff]  ;;  %v4087_v55 = vld [vmem:[%s8092_s1 + $0x60] sm:$0xff]  ;;  %v4088_v58 = vld [vmem:[%s8092_s1 + $0x68] sm:$0xff] }
   0xa   :  { %231 = vrot.lane.b32.xlu0 %v42_v2, %s6039_s16  ;;  %227 = vrot.lane.b32.xlu1 %v6106_v1, %s6039_s16  ;;  %v4091_v60 = vld [vmem:[%s8092_s1 + $0x70] sm:$0xff]  ;;  %v4092_v62 = vld [vmem:[%s8092_s1 + $0x78] sm:$0xff] }
   0xb   :  { %v4095_v63 = vld [vmem:[%s8092_s1 + $0x80] sm:$0xff] }
   0xe   :  { %330 = vrot.lane.b32.xlu0 %v41_v0, %s6040_s17  ;;  %332 = vrot.lane.b32.xlu1 %v42_v2, %s6040_s17 }
  0x12   :  { %328 = vrot.lane.b32.xlu0 %v6106_v1, %s6040_s17  ;;  %431 = vrot.lane.b32.xlu1 %v41_v0, %s6041_s0 }
  0x16   :  { %433 = vrot.lane.b32.xlu0 %v42_v2, %s6041_s0  ;;  %429 = vrot.lane.b32.xlu1 %v6106_v1, %s6041_s0 }
  0x1a   :  { %532 = vrot.lane.b32.xlu0 %v41_v0, %s6042_s18  ;;  %534 = vrot.lane.b32.xlu1 %v42_v2, %s6042_s18 }
  0x1e   :  { %530 = vrot.lane.b32.xlu0 %v6106_v1, %s6042_s18  ;;  %633 = vrot.lane.b32.xlu1 %v41_v0, %s6043_s19 }
  0x22   :  { %635 = vrot.lane.b32.xlu0 %v42_v2, %s6043_s19  ;;  %631 = vrot.lane.b32.xlu1 %v6106_v1, %s6043_s19 }
  0x26   :  { %734 = vrot.lane.b32.xlu0 %v41_v0, %s6044_s20  ;;  %736 = vrot.lane.b32.xlu1 %v42_v2, %s6044_s20 }
  0x2a   :  { %732 = vrot.lane.b32.xlu0 %v6106_v1, %s6044_s20  ;;  %835 = vrot.lane.b32.xlu1 %v41_v0, %s6045_s21 }
  0x2e   :  { %837 = vrot.lane.b32.xlu0 %v42_v2, %s6045_s21  ;;  %833 = vrot.lane.b32.xlu1 %v6106_v1, %s6045_s21 }
  0x32   :  { %935 = vperm.xlu0 %5891, %v931_v4   ;;  %940 = vperm.xlu1 %5892, %v932_v5  }
  0x74   :  { %v49_v7 = vpop.permute.xlu0 %48  ;;  %v47_v8 = vpop.permute.xlu1 %46 }
  0x75   :  { %v53_v13 = vsel %vm52_vm0, %v47_v8, %v49_v7 }
  0x78   :  { %v51_v9 = vpop.permute.xlu0 %50  ;;  %v230_v10 = vpop.permute.xlu1 %229 }
  0x79   :  { %v54_v11 = vsel %vm52_vm0, %v49_v7, %v51_v9 }
  0x7a   :  { %64 = vmatprep.subr.mxu0 %v54_v11  ;;  %5780 = vmatprep.subr.mxu1 %v54_v11 }
  0x7b   :  { %65 = vmatpush1.msra.mxu0 %v53_v13  ;;  %5781 = vmatpush1.msra.mxu1 %v53_v13 }
  0x7c   :  { %4067 = vmatmul.mubr.msk.f32.vlgmr.msra.gmra.mrb[0].mxu0 %vm57_vm1, %v4065_v12  ;;  %147 = vmatprep.subr.mxu0 %v41_v0  ;;  %v232_v15 = vpop.permute.xlu0 %231  ;;  %v228_v16 = vpop.permute.xlu1 %227  ;;  %v4096_v0 = vld [vmem:[%s8092_s1 + $0x88] sm:$0xff] }
  0x7d   :  { %148 = vmatpush1.msra.mxu0 %v6106_v1  ;;  %v235_v17 = vsel %vm233_vm2, %v230_v10, %v232_v15  ;;  %211 = vmatprep.mubr.f32.mxu0 %v6038_v3  ;;  %v234_v21 = vsel %vm233_vm2, %v228_v16, %v230_v10 }
  0x7e   :  { %244 = vmatprep.subr.mxu0 %v235_v17  ;;  %4068 = vmatmul.mubr.msk.f32.vlgmr.msra.gmra.mrb[0].mxu1 %vm57_vm1, %v4066_v14 }
  0x7f   :  { %1079 = vmatprep.mubr.f32.mxu1 %v6038_v3 }
  0x80   :  { %v331_v18 = vpop.permute.xlu0 %330  ;;  %v333_v19 = vpop.permute.xlu1 %332 }
  0x81   :  { %v336_v22 = vsel %vm334_vm3, %v331_v18, %v333_v19 }
  0x84   :  { %4069 = vmatmul.mubr.msk.f32.vlgmr.msra.gmra.mrb[0].mxu0 %vm57_vm1, %v33_v20  ;;  %v329_v23 = vpop.permute.xlu0 %328  ;;  %v432_v25 = vpop.permute.xlu1 %431 }
  0x85   :  { %245 = vmatpush1.msra.mxu0 %v234_v21  ;;  %217 = vmatprep.mubr.f32.mxu0 %v6038_v3  ;;  %v335_v28 = vsel %vm334_vm3, %v329_v23, %v331_v18 }
  0x86   :  { %345 = vmatprep.subr.mxu0 %v336_v22 }
  0x88   :  { %4070 = vmatmul.mubr.msk.f32.gmra.mrb[2].mxu0 %vm57_vm1, %v34_v24  ;;  %v434_v26 = vpop.permute.xlu0 %433  ;;  %v430_v30 = vpop.permute.xlu1 %429 }
  0x89   :  { %308 = vmatprep.mubr.f32.mxu0 %v6038_v3  ;;  %v437_v29 = vsel %vm435_vm4, %v432_v25, %v434_v26  ;;  %v436_v35 = vsel %vm435_vm4, %v430_v30, %v432_v25  ;;  %v2143_v25 = vld [vmem:[%s8095_s4] sm:$0xff]  ;;  %v2145_v26 = vld [vmem:[%s8095_s4 + $0x10] sm:$0xff] }
  0x8c   :  { %4073 = vmatmul.mubr.msk.f32.vlgmr.msra.gmra.mrb[0].mxu0 %vm57_vm1, %v4071_v27  ;;  %v533_v32 = vpop.permute.xlu0 %532  ;;  %v535_v33 = vpop.permute.xlu1 %534  ;;  %v2144_v27 = vld [vmem:[%s8095_s4 + $0x8] sm:$0xff] }
  0x8d   :  { %346 = vmatpush1.msra.mxu0 %v335_v28  ;;  %314 = vmatprep.mubr.f32.mxu0 %v6038_v3  ;;  %v538_v36 = vsel %vm536_vm5, %v533_v32, %v535_v33  ;;  %v2146_v28 = vld [vmem:[%s8095_s4 + $0x18] sm:$0xff] }
  0x8e   :  { %446 = vmatprep.subr.mxu0 %v437_v29 }
  0x90   :  { %4074 = vmatmul.mubr.msk.f32.gmra.mrb[2].mxu0 %vm57_vm1, %v4072_v31  ;;  %v531_v37 = vpop.permute.xlu0 %530  ;;  %v634_v39 = vpop.permute.xlu1 %633 }
  0x91   :  { %409 = vmatprep.mubr.f32.mxu0 %v6038_v3  ;;  %v537_v42 = vsel %vm536_vm5, %v531_v37, %v533_v32 }
  0x94   :  { %4077 = vmatmul.mubr.msk.f32.vlgmr.msra.gmra.mrb[0].mxu0 %vm57_vm1, %v4075_v34  ;;  %v636_v40 = vpop.permute.xlu0 %635  ;;  %v632_v44 = vpop.permute.xlu1 %631 }
  0x95   :  { %447 = vmatpush1.msra.mxu0 %v436_v35  ;;  %415 = vmatprep.mubr.f32.mxu0 %v6038_v3  ;;  %v639_v43 = vsel %vm637_vm6, %v634_v39, %v636_v40  ;;  %v638_v49 = vsel %vm637_vm6, %v632_v44, %v634_v39 }
  0x96   :  { %547 = vmatprep.subr.mxu0 %v538_v36 }
  0x98   :  { %4078 = vmatmul.mubr.msk.f32.gmra.mrb[2].mxu0 %vm57_vm1, %v4076_v38  ;;  %v735_v46 = vpop.permute.xlu0 %734  ;;  %v737_v47 = vpop.permute.xlu1 %736 }
  0x99   :  { %510 = vmatprep.mubr.f32.mxu0 %v6038_v3  ;;  %v740_v50 = vsel %vm738_vm7, %v735_v46, %v737_v47 }
  0x9c   :  { %4081 = vmatmul.mubr.msk.f32.vlgmr.msra.gmra.mrb[0].mxu0 %vm57_vm1, %v4079_v41  ;;  %v733_v51 = vpop.permute.xlu0 %732  ;;  %v836_v54 = vpop.permute.xlu1 %835 }
  0x9d   :  { %548 = vmatpush1.msra.mxu0 %v537_v42  ;;  %516 = vmatprep.mubr.f32.mxu0 %v6038_v3  ;;  %v739_v56 = vsel %vm738_vm7, %v733_v51, %v735_v46 }
  0x9e   :  { %648 = vmatprep.subr.mxu0 %v639_v43 }
  0xa0   :  { %4082 = vmatmul.mubr.msk.f32.gmra.mrb[2].mxu0 %vm57_vm1, %v4080_v45  ;;  %v838_v53 = vpop.permute.xlu0 %837  ;;  %v834_v59 = vpop.permute.xlu1 %833 }
  0xa1   :  { %611 = vmatprep.mubr.f32.mxu0 %v6038_v3  ;;  %v841_v57 = vsel %vm839_vm8, %v836_v54, %v838_v53  ;;  %v840_v61 = vsel %vm839_vm8, %v834_v59, %v836_v54 }
  0xa4   :  { %4085 = vmatmul.mubr.msk.f32.vlgmr.msra.gmra.mrb[0].mxu0 %vm57_vm1, %v4083_v48 }
  0xa5   :  { %649 = vmatpush1.msra.mxu0 %v638_v49  ;;  %617 = vmatprep.mubr.f32.mxu0 %v6038_v3 }
  0xa6   :  { %749 = vmatprep.subr.mxu0 %v740_v50  ;;  %v4099_v50 = vld [vmem:[%s8094_s3 + $0x20] sm:$0xff] }
  0xa8   :  { %4086 = vmatmul.mubr.msk.f32.gmra.mrb[2].mxu0 %vm57_vm1, %v4084_v52 }
  0xa9   :  { %712 = vmatprep.mubr.f32.mxu0 %v6038_v3 }
  0xac   :  { %4089 = vmatmul.mubr.msk.f32.vlgmr.msra.gmra.mrb[0].mxu0 %vm57_vm1, %v4087_v55  ;;  %v4100_v55 = vld [vmem:[%s8094_s3 + $0x28] sm:$0xff] }
  0xad   :  { %750 = vmatpush1.msra.mxu0 %v739_v56  ;;  %718 = vmatprep.mubr.f32.mxu0 %v6038_v3  ;;  %v4101_v56 = vld [vmem:[%s8094_s3 + $0x30] sm:$0xff] }
  0xae   :  { %850 = vmatprep.subr.mxu0 %v841_v57 }
  0xb0   :  { %4090 = vmatmul.mubr.msk.f32.gmra.mrb[2].mxu0 %vm57_vm1, %v4088_v58 }
  0xb1   :  { %813 = vmatprep.mubr.f32.mxu0 %v6038_v3  ;;  %v936_v4 = vpop.permute.xlu0 %935  ;;  %v941_v10 = vpop.permute.xlu1 %940 }
  0xb4   :  { %4093 = vmatmul.mubr.msk.f32.vlgmr.msra.gmra.mrb[0].mxu0 %vm57_vm1, %v4091_v60 }
  0xb5   :  { %851 = vmatpush1.msra.mxu0 %v840_v61  ;;  %819 = vmatprep.mubr.f32.mxu0 %v6038_v3 }
  0xb8   :  { %4094 = vmatmul.mubr.msk.f32.gmra.mrb[2].mxu0 %vm57_vm1, %v4092_v62 }
  0xb9   :  { %914 = vmatprep.mubr.f32.mxu0 %v6038_v3 }
  0xbc   :  { %4097 = vmatmul.mubr.msk.f32.vlgmr.msra.gmra.mrb[0].mxu0 %vm57_vm1, %v4095_v63  ;;  %v4102_v63 = vld [vmem:[%s8094_s3 + $0x38] sm:$0xff] }
  0xbd   :  { %920 = vmatprep.mubr.f32.mxu0 %v6038_v3 }
  0xc0   :  { %4098 = vmatmul.mubr.msk.f32.gmra.mrb[2].mxu0 %vm57_vm1, %v4096_v0 }
 0x151   :  { %v136_v1 = vpop.f32.mrb[0].mxu1 }
 0x152   :  { %v138_v2 = vpop.f32.mrb[1].mxu1 }
 0x18f   :  { %v916_v5 = vpop.f32.mrb[0].mxu0 }
 0x190   :  { %v918_v6 = vpop.f32.mrb[1].mxu0  ;;  %v943_v11 = vadd.f32 %v936_v4, %v916_v5  ;;  %v4183_v5 = vld [vmem:[%s8096_s5 + $0x180] sm:$0xff] }
 0x191   :  { %v944_v7 = vadd.f32 %v936_v4, %v918_v6  ;;  %v4184_v6 = vld [vmem:[%s8096_s5 + $0x188] sm:$0xff] }
 0x192   :  { %v947_v18 = vmax.f32 %v943_v11, 0.0  ;;  %v4168_v11 = vld [vmem:[%s8096_s5 + $0x108] sm:$0xff] }
 0x193   :  { %v948_v8 = vmax.f32 %v944_v7, 0.0  ;;  %v922_v9 = vpop.f32.mrb[2].mxu0  ;;  %v957_v7 = vld [vmem:[%s8094_s3] sm:$0xff] }
 0x194   :  { %v5782_v12 = vadd.f32 %v922_v9, %v136_v1  ;;  %v924_v13 = vpop.f32.mrb[3].mxu0  ;;  %v5262_v9 = vpack.c.bf16 %v4184_v6, %v4183_v5 }
 0x195   :  { %v5783_v14 = vadd.f32 %v924_v13, %v138_v2  ;;  %v5893_v15 = vpack.i.bf16 %v6038_v3, %v948_v8 }
 0x196   :  { %v945_v16 = vadd.f32 %v5782_v12, %v941_v10  ;;  %v4185_v12 = vld [vmem:[%s8096_s5 + $0x190] sm:$0xff]  ;;  %5263 = vmatprep.subr.bf16.mxu0 %v5262_v9 }
 0x197   :  { %v946_v17 = vadd.f32 %v5783_v14, %v941_v10  ;;  %5894 = vrot.lane.b32.xlu1 %v5893_v15, %s6037_s13  ;;  %v4167_v10 = vld [vmem:[%s8096_s5 + $0x100] sm:$0xff] }
 0x198   :  { %v949_v19 = vmax.f32 %v945_v16, 0.0  ;;  %v4186_v16 = vld [vmem:[%s8096_s5 + $0x198] sm:$0xff] }
 0x199   :  { %v950_v20 = vmax.f32 %v946_v17, 0.0 }
 0x19a   :  { %v5903_v21 = vpack.i.bf16 %v949_v19, %v947_v18  ;;  %v5232_v24 = vpack.c.bf16 %v949_v19, %v947_v18  ;;  %v5266_v19 = vpack.c.bf16 %v4186_v16, %v4185_v12 }
 0x19b   :  { %v5898_v22 = vpack.i.bf16 %v6038_v3, %v950_v20  ;;  %v5230_v23 = vpack.c.bf16 %v950_v20, %v948_v8  ;;  %v4169_v20 = vld [vmem:[%s8096_s5 + $0x110] sm:$0xff] }
 0x19c   :  { %5904 = vrot.lane.b32.xlu1 %v5903_v21, %s6037_s13 }
 0x19d   :  { %5899 = vrot.lane.b32.xlu0 %v5898_v22, %s6037_s13  ;;  %s6049_s13 = smov [#allocation4]  }
 0x1a0   :  { %5914 = vrot.lane.b32.xlu1 %v5898_v22, %s6039_s16 }
 0x1a1   :  { %5909 = vrot.lane.b32.xlu0 %v5893_v15, %s6039_s16 }
 0x1a4   :  { %5924 = vrot.lane.b32.xlu1 %v5893_v15, %s6040_s17 }
 0x1a5   :  { %5919 = vrot.lane.b32.xlu0 %v5903_v21, %s6039_s16  ;;  %s4057_s16 = sshll.u32 %s6049_s13, 4  ;;  %s4058_s16 = int_to_ptr.vmem [resolvable:$true] %s4057_s16 }
 0x1a6   :  { %p6018_p1 = scmp.lt.s32.totalorder %s4058_s16, %s4058_s16 }
 0x1a8   :  { %5934 = vrot.lane.b32.xlu1 %v5903_v21, %s6040_s17 }
 0x1a9   :  { %5929 = vrot.lane.b32.xlu0 %v5898_v22, %s6040_s17  ;;  %s6013_s17 = scalar_lea.vmem %s4058_s16, 32 }
 0x1aa   :  { %p6014_p0 = scmp.ne.s32.totalorder %s4058_s16, %s6013_s17  ;;  %p6019_p2 = scmp.lt.s32.totalorder %s6013_s17, %s6013_s17 }
 0x1ac   :  { %5944 = vrot.lane.b32.xlu1 %v5898_v22, %s6041_s0  ;;  %p6020_p3 = por %p6019_p2, %p6018_p1 }
 0x1ad   :  { %5939 = vrot.lane.b32.xlu0 %v5893_v15, %s6041_s0 }
 0x1ae   :  { %p6021_p4 = pnand %p6020_p3, %p6014_p0 }
 0x1b0   :  { %5954 = vrot.lane.b32.xlu1 %v5893_v15, %s6042_s18 }
 0x1b1   :  { %5949 = vrot.lane.b32.xlu0 %v5903_v21, %s6041_s0 }
 0x1b4   :  { %5964 = vrot.lane.b32.xlu1 %v5903_v21, %s6042_s18 }
 0x1b5   :  { %5959 = vrot.lane.b32.xlu0 %v5898_v22, %s6042_s18 }
 0x1b8   :  { %5974 = vrot.lane.b32.xlu1 %v5898_v22, %s6043_s19 }
 0x1b9   :  { %5969 = vrot.lane.b32.xlu0 %v5893_v15, %s6043_s19 }
 0x1bc   :  { %5984 = vrot.lane.b32.xlu1 %v5893_v15, %s6044_s20 }
 0x1bd   :  { %5979 = vrot.lane.b32.xlu0 %v5903_v21, %s6043_s19 }
 0x1c0   :  { %5994 = vrot.lane.b32.xlu1 %v5903_v21, %s6044_s20 }
 0x1c1   :  { %5989 = vrot.lane.b32.xlu0 %v5898_v22, %s6044_s20 }
 0x1c4   :  { %6004 = vrot.lane.b32.xlu1 %v5898_v22, %s6045_s21  ;;  %v958_v22 = vld [vmem:[%s8094_s3 + $0x8] sm:$0xff] }
 0x1c5   :  { %5999 = vrot.lane.b32.xlu0 %v5893_v15, %s6045_s21  ;;  %v5264_v15 = vpack.c.bf16 %v4168_v11, %v4167_v10  ;;  %v4120_v10 = vld [vmem:[%s8094_s3 + $0x68] sm:$0xff]  ;;  %v4121_v11 = vld [vmem:[%s8094_s3 + $0x70] sm:$0xff] }
 0x1c7   :  { %5265 = vmatpush3.bf16.msra.mxu0 %v5264_v15 }
 0x1c8   :  { %2149 = vperm.xlu1 %5892, %v2143_v25   ;;  %5267 = vmatprep.subr.bf16.mxu0 %v5266_v19 }
 0x1c9   :  { %6009 = vrot.lane.b32.xlu0 %v5903_v21, %s6045_s21  ;;  %v4170_v21 = vld [vmem:[%s8096_s5 + $0x118] sm:$0xff] }
 0x1ca   :  { %v5268_v25 = vpack.c.bf16 %v4170_v21, %v4169_v20  ;;  %v4122_v20 = vld [vmem:[%s8094_s3 + $0x78] sm:$0xff] }
 0x1cc   :  { %2159 = vperm.xlu1 %5892, %v2145_v26   ;;  %5269 = vmatpush3.bf16.msra.mxu0 %v5268_v25 }
 0x1cd   :  { %2154 = vperm.xlu0 %5891, %v2144_v27   ;;  %v4171_v27 = vld [vmem:[%s8096_s5 + $0x120] sm:$0xff] }
 0x1d1   :  { %2164 = vperm.xlu0 %5891, %v2146_v28   ;;  %v4172_v28 = vld [vmem:[%s8096_s5 + $0x128] sm:$0xff] }
 0x209   :  { %v5895_v29 = vpop.permute.xlu1 %5894 }
 0x20a   :  { %v5897_v30 = vunpack.i.h.bf16 %v5895_v29  ;;  %v5896_v31 = vunpack.i.l.bf16 %v5895_v29  ;;  %v4189_v29 = vld [vmem:[%s8096_s5 + $0x1b0] sm:$0xff] }
 0x20c   :  { %v995_v41 = vsel %vm52_vm0, %v5896_v31, %v5897_v30  ;;  %v4190_v30 = vld [vmem:[%s8096_s5 + $0x1b8] sm:$0xff] }
 0x20e   :  { %v5905_v32 = vpop.permute.xlu1 %5904 }
 0x20f   :  { %v5907_v33 = vunpack.i.h.bf16 %v5905_v32  ;;  %v5906_v34 = vunpack.i.l.bf16 %v5905_v32  ;;  %v5900_v35 = vpop.permute.xlu0 %5899 }
 0x210   :  { %v5902_v36 = vunpack.i.h.bf16 %v5900_v35  ;;  %v5901_v37 = vunpack.i.l.bf16 %v5900_v35  ;;  %v5274_v35 = vpack.c.bf16 %v4190_v30, %v4189_v29  ;;  %v4128_v29 = vld [vmem:[%s8094_s3 + $0x88] sm:$0xff]  ;;  %v4129_v30 = vld [vmem:[%s8094_s3 + $0x90] sm:$0xff] }
 0x211   :  { %v994_v38 = vsel %vm52_vm0, %v5906_v34, %v5896_v31  ;;  %v959_v31 = vld [vmem:[%s8094_s3 + $0x10] sm:$0xff]  ;;  %v5272_v34 = vpack.c.bf16 %v4172_v28, %v4171_v27 }
 0x212   :  { %v996_v39 = vsel %vm52_vm0, %v5907_v33, %v5901_v37  ;;  %v5915_v40 = vpop.permute.xlu1 %5914  ;;  %v997_v42 = vsel %vm52_vm0, %v5901_v37, %v5902_v36  ;;  %v4173_v36 = vld [vmem:[%s8096_s5 + $0x130] sm:$0xff]  ;;  %v4174_v37 = vld [vmem:[%s8096_s5 + $0x138] sm:$0xff] }
 0x213   :  { %v5228_v43 = vpack.c.bf16 %v996_v39, %v994_v38  ;;  %v5917_v44 = vunpack.i.h.bf16 %v5915_v40  ;;  %v5916_v45 = vunpack.i.l.bf16 %v5915_v40  ;;  %v5910_v46 = vpop.permute.xlu0 %5909  ;;  %v5226_v47 = vpack.c.bf16 %v997_v42, %v995_v41 }
 0x214   :  { %v5912_v48 = vunpack.i.h.bf16 %v5910_v46  ;;  %v5911_v49 = vunpack.i.l.bf16 %v5910_v46 }
 0x215   :  { %5227 = vmatprep.subr.bf16.mxu1 %v5226_v47  ;;  %v1225_v52 = vsel %vm233_vm2, %v5916_v45, %v5917_v44  ;;  %v960_v44 = vld [vmem:[%s8094_s3 + $0x18] sm:$0xff] }
 0x216   :  { %5229 = vmatpush1.bf16.msra.mxu1 %v5228_v43  ;;  %v1223_v51 = vsel %vm233_vm2, %v5911_v49, %v5912_v48  ;;  %v6316_v58 = vpop.permute.xlu1 %5924  ;;  %v4111_v48 = vld [vmem:[%s8094_s3 + $0x40] sm:$0xff] }
 0x217   :  { %5231 = vmatprep.subr.bf16.mxu1 %v5230_v23  ;;  %v5920_v53 = vpop.permute.xlu0 %5919  ;;  %v5234_v54 = vpack.c.bf16 %v1225_v52, %v1223_v51  ;;  %v5927_v0 = vunpack.i.h.bf16 %v6316_v58  ;;  %v5926_v1 = vunpack.i.l.bf16 %v6316_v58  ;;  %v4187_v23 = vld [vmem:[%s8096_s5 + $0x1a0] sm:$0xff] }
 0x218   :  { %v5922_v59 = vunpack.i.h.bf16 %v5920_v53  ;;  %v5921_v60 = vunpack.i.l.bf16 %v5920_v53 }
 0x219   :  { %4103 = vmatmul.mubr.msk.f32.vlgmr.msra.gmra.mrb[2].mxu1 %vm1002_vm9, %v4099_v50  ;;  %v1357_v14 = vsel %vm334_vm3, %v5926_v1, %v5927_v0 }
 0x21a   :  { %5233 = vmatpush1.bf16.msra.mxu1 %v5232_v24  ;;  %1085 = vmatprep.mubr.f32.mxu1 %v6038_v3  ;;  %v1224_v2 = vsel %vm233_vm2, %v5922_v59, %v5916_v45  ;;  %v1222_v4 = vsel %vm233_vm2, %v5921_v60, %v5911_v49  ;;  %v5935_v17 = vpop.permute.xlu1 %5934  ;;  %v4188_v24 = vld [vmem:[%s8096_s5 + $0x1a8] sm:$0xff]  ;;  %v5276_v45 = vpack.c.bf16 %v4174_v37, %v4173_v36  ;;  %v4130_v37 = vld [vmem:[%s8094_s3 + $0x98] sm:$0xff] }
 0x21b   :  { %5235 = vmatprep.subr.bf16.mxu1 %v5234_v54  ;;  %v6314_v57 = vpop.permute.xlu0 %5929  ;;  %v5236_v13 = vpack.c.bf16 %v1224_v2, %v1222_v4  ;;  %v5270_v26 = vpack.c.bf16 %v4188_v24, %v4187_v23  ;;  %v5937_v38 = vunpack.i.h.bf16 %v5935_v17  ;;  %v5936_v39 = vunpack.i.l.bf16 %v5935_v17  ;;  %v4112_v54 = vld [vmem:[%s8094_s3 + $0x48] sm:$0xff]  ;;  %v4119_v4 = vld [vmem:[%s8094_s3 + $0x60] sm:$0xff] }
 0x21c   :  { %v5932_v61 = vunpack.i.h.bf16 %v6314_v57  ;;  %v5931_v62 = vunpack.i.l.bf16 %v6314_v57  ;;  %v4127_v23 = vld [vmem:[%s8094_s3 + $0x80] sm:$0xff] }
 0x21d   :  { %4104 = vmatmul.mubr.msk.f32.gmra.mrb[4].mxu1 %vm1002_vm9, %v4100_v55  ;;  %5271 = vmatprep.subr.bf16.mxu0 %v5270_v26  ;;  %v1356_v46 = vsel %vm334_vm3, %v5936_v39, %v5926_v1  ;;  %v4113_v55 = vld [vmem:[%s8094_s3 + $0x50] sm:$0xff] }
 0x21e   :  { %1091 = vmatprep.mubr.f32.mxu1 %v6038_v3  ;;  %v1359_v8 = vsel %vm334_vm3, %v5931_v62, %v5932_v61  ;;  %v5945_v32 = vpop.permute.xlu1 %5944  ;;  %5273 = vmatpush3.bf16.msra.mxu0 %v5272_v34  ;;  %v1358_v47 = vsel %vm334_vm3, %v5937_v38, %v5931_v62  ;;  %v4114_v62 = vld [vmem:[%s8094_s3 + $0x58] sm:$0xff] }
 0x21f   :  { %v5238_v18 = vpack.c.bf16 %v1359_v8, %v1357_v14  ;;  %v5940_v33 = vpop.permute.xlu0 %5939  ;;  %v5947_v40 = vunpack.i.h.bf16 %v5945_v32  ;;  %v5946_v41 = vunpack.i.l.bf16 %v5945_v32  ;;  %5275 = vmatprep.subr.bf16.mxu0 %v5274_v35  ;;  %v5240_v51 = vpack.c.bf16 %v1358_v47, %v1356_v46 }
 0x220   :  { %v5942_v42 = vunpack.i.h.bf16 %v5940_v33  ;;  %v5941_v43 = vunpack.i.l.bf16 %v5940_v33 }
 0x221   :  { %4105 = vmatmul.mubr.msk.f32.gmra.mrb[6].mxu1 %vm1002_vm9, %v4101_v56  ;;  %v1493_v50 = vsel %vm435_vm4, %v5946_v41, %v5947_v40 }
 0x222   :  { %1097 = vmatprep.mubr.f32.mxu1 %v6038_v3  ;;  %v1491_v49 = vsel %vm435_vm4, %v5941_v43, %v5942_v42  ;;  %5277 = vmatpush3.bf16.msra.mxu0 %v5276_v45  ;;  %v5955_v57 = vpop.permute.xlu1 %5954  ;;  %v4135_v42 = vld [vmem:[%s8094_s3 + $0xa0] sm:$0xff] }
 0x223   :  { %v5950_v52 = vpop.permute.xlu0 %5949  ;;  %v5242_v53 = vpack.c.bf16 %v1493_v50, %v1491_v49  ;;  %v5956_v0 = vunpack.i.l.bf16 %v5955_v57  ;;  %v4137_v49 = vld [vmem:[%s8094_s3 + $0xb0] sm:$0xff] }
 0x224   :  { %v5952_v58 = vunpack.i.h.bf16 %v5950_v52  ;;  %v5951_v59 = vunpack.i.l.bf16 %v5950_v52 }
 0x225   :  { %4106 = vmatmul.mubr.msk.f32.gmra.mrb[8].mxu1 %vm1002_vm9, %v4102_v63  ;;  %v5957_v63 = vunpack.i.h.bf16 %v5955_v57 }
 0x226   :  { %1180 = vmatprep.mubr.f32.mxu1 %v6038_v3  ;;  %v1492_v1 = vsel %vm435_vm4, %v5952_v58, %v5946_v41  ;;  %v1490_v2 = vsel %vm435_vm4, %v5951_v59, %v5941_v43  ;;  %v5965_v8 = vpop.permute.xlu1 %5964  ;;  %v4138_v58 = vld [vmem:[%s8094_s3 + $0xb8] sm:$0xff] }
 0x227   :  { %v5960_v56 = vpop.permute.xlu0 %5959  ;;  %v5244_v6 = vpack.c.bf16 %v1492_v1, %v1490_v2  ;;  %v5967_v14 = vunpack.i.h.bf16 %v5965_v8  ;;  %v5966_v15 = vunpack.i.l.bf16 %v5965_v8  ;;  %v4144_v2 = vld [vmem:[%s8094_s3 + $0xc8] sm:$0xff]  ;;  %v4146_v8 = vld [vmem:[%s8094_s3 + $0xd8] sm:$0xff] }
 0x228   :  { %v5962_v60 = vunpack.i.h.bf16 %v5960_v56  ;;  %v5961_v61 = vunpack.i.l.bf16 %v5960_v56 }
 0x229   :  { %4107 = vmatmul.mubr.msk.f32.vlgmr.msra.gmra.mrb[2].mxu1 %vm1002_vm9, %v957_v7  ;;  %v1625_v7 = vsel %vm536_vm5, %v5956_v0, %v5957_v63  ;;  %v1624_v21 = vsel %vm536_vm5, %v5966_v15, %v5956_v0 }
 0x22a   :  { %5237 = vmatpush1.bf16.msra.mxu1 %v5236_v13  ;;  %1186 = vmatprep.mubr.f32.mxu1 %v6038_v3  ;;  %v1627_v5 = vsel %vm536_vm5, %v5961_v61, %v5962_v60  ;;  %v5975_v12 = vpop.permute.xlu1 %5974 }
 0x22b   :  { %5239 = vmatprep.subr.bf16.mxu1 %v5238_v18  ;;  %v5246_v9 = vpack.c.bf16 %v1627_v5, %v1625_v7  ;;  %v5970_v13 = vpop.permute.xlu0 %5969  ;;  %v5977_v16 = vunpack.i.h.bf16 %v5975_v12  ;;  %v5976_v17 = vunpack.i.l.bf16 %v5975_v12  ;;  %v4145_v5 = vld [vmem:[%s8094_s3 + $0xd0] sm:$0xff] }
 0x22c   :  { %v5972_v18 = vunpack.i.h.bf16 %v5970_v13  ;;  %v5971_v19 = vunpack.i.l.bf16 %v5970_v13  ;;  %v4151_v13 = vld [vmem:[%s8094_s3 + $0xe0] sm:$0xff] }
 0x22d   :  { %4108 = vmatmul.mubr.msk.f32.gmra.mrb[4].mxu1 %vm1002_vm9, %v958_v22  ;;  %v1626_v22 = vsel %vm536_vm5, %v5967_v14, %v5961_v61  ;;  %v1761_v25 = vsel %vm637_vm6, %v5976_v17, %v5977_v16  ;;  %v4143_v61 = vld [vmem:[%s8094_s3 + $0xc0] sm:$0xff]  ;;  %v4152_v16 = vld [vmem:[%s8094_s3 + $0xe8] sm:$0xff] }
 0x22e   :  { %1192 = vmatprep.mubr.f32.mxu1 %v6038_v3  ;;  %v1759_v24 = vsel %vm637_vm6, %v5971_v19, %v5972_v18  ;;  %v5248_v26 = vpack.c.bf16 %v1626_v22, %v1624_v21  ;;  %v5985_v32 = vpop.permute.xlu1 %5984  ;;  %v4154_v18 = vld [vmem:[%s8094_s3 + $0xf8] sm:$0xff]  ;;  %v4249_v21 = vld [vmem:[%s8096_s5 + $0x390] sm:$0xff] }
 0x22f   :  { %v5980_v27 = vpop.permute.xlu0 %5979  ;;  %v5250_v28 = vpack.c.bf16 %v1761_v25, %v1759_v24  ;;  %v5987_v38 = vunpack.i.h.bf16 %v5985_v32  ;;  %v5986_v39 = vunpack.i.l.bf16 %v5985_v32  ;;  %v4250_v22 = vld [vmem:[%s8096_s5 + $0x398] sm:$0xff] }
 0x230   :  { %v5982_v33 = vunpack.i.h.bf16 %v5980_v27  ;;  %v5981_v34 = vunpack.i.l.bf16 %v5980_v27  ;;  %v5362_v25 = vpack.c.bf16 %v4250_v22, %v4249_v21  ;;  %v4234_v27 = vld [vmem:[%s8096_s5 + $0x318] sm:$0xff]  ;;  %v4181_v22 = vld [vmem:[%s8096_s5 + $0x170] sm:$0xff] }
 0x231   :  { %4109 = vmatmul.mubr.msk.f32.gmra.mrb[6].mxu1 %vm1002_vm9, %v959_v31  ;;  %v1893_v45 = vsel %vm738_vm7, %v5986_v39, %v5987_v38  ;;  %v4262_v21 = vld [vmem:[%s8096_s5 + $0x3f8] sm:$0xff] }
 0x232   :  { %1198 = vmatprep.mubr.f32.mxu1 %v6038_v3  ;;  %v1760_v40 = vsel %vm637_vm6, %v5982_v33, %v5976_v17  ;;  %v1758_v41 = vsel %vm637_vm6, %v5981_v34, %v5971_v19  ;;  %v5995_v46 = vpop.permute.xlu1 %5994  ;;  %v4153_v17 = vld [vmem:[%s8094_s3 + $0xf0] sm:$0xff]  ;;  %v4231_v19 = vld [vmem:[%s8096_s5 + $0x300] sm:$0xff]  ;;  %v4236_v34 = vld [vmem:[%s8096_s5 + $0x328] sm:$0xff] }
 0x233   :  { %v5990_v31 = vpop.permute.xlu0 %5989  ;;  %v5997_v52 = vunpack.i.h.bf16 %v5995_v46  ;;  %v4235_v33 = vld [vmem:[%s8096_s5 + $0x320] sm:$0xff] }
 0x234   :  { %v5992_v35 = vunpack.i.h.bf16 %v5990_v31  ;;  %v5991_v36 = vunpack.i.l.bf16 %v5990_v31  ;;  %v5368_v38 = vpack.c.bf16 %v4236_v34, %v4235_v33  ;;  %v4312_v33 = vld [vmem:[%s8096_s5 + $0x588] sm:$0xff] }
 0x235   :  { %4110 = vmatmul.mubr.msk.f32.gmra.mrb[8].mxu1 %vm1002_vm9, %v960_v44  ;;  %v5252_v44 = vpack.c.bf16 %v1760_v40, %v1758_v41  ;;  %v4237_v40 = vld [vmem:[%s8096_s5 + $0x330] sm:$0xff]  ;;  %v4238_v41 = vld [vmem:[%s8096_s5 + $0x338] sm:$0xff] }
 0x236   :  { %1306 = vmatprep.mubr.f32.mxu1 %v6038_v3  ;;  %v1895_v43 = vsel %vm738_vm7, %v5991_v36, %v5992_v35  ;;  %v6005_v50 = vpop.permute.xlu1 %6004  ;;  %v1894_v60 = vsel %vm738_vm7, %v5997_v52, %v5991_v36  ;;  %v4253_v35 = vld [vmem:[%s8096_s5 + $0x3b0] sm:$0xff]  ;;  %v4254_v36 = vld [vmem:[%s8096_s5 + $0x3b8] sm:$0xff] }
 0x237   :  { %v5254_v47 = vpack.c.bf16 %v1895_v43, %v1893_v45  ;;  %v5372_v43 = vpack.c.bf16 %v4238_v41, %v4237_v40  ;;  %v4192_v45 = vld [vmem:[%s8096_s5 + $0x1c8] sm:$0xff] }
 0x239   :  { %4115 = vmatmul.mubr.msk.f32.vlgmr.msra.gmra.mrb[2].mxu1 %vm1002_vm9, %v4111_v48  ;;  %v4136_v48 = vld [vmem:[%s8094_s3 + $0xa8] sm:$0xff] }
 0x23a   :  { %5241 = vmatpush1.bf16.msra.mxu1 %v5240_v51  ;;  %1312 = vmatprep.mubr.f32.mxu1 %v6038_v3  ;;  %v6000_v51 = vpop.permute.xlu0 %5999 }
 0x23b   :  { %5243 = vmatprep.subr.bf16.mxu1 %v5242_v53  ;;  %v5996_v53 = vunpack.i.l.bf16 %v5995_v46  ;;  %v6002_v56 = vunpack.i.h.bf16 %v6000_v51  ;;  %v6001_v57 = vunpack.i.l.bf16 %v6000_v51  ;;  %v4255_v46 = vld [vmem:[%s8096_s5 + $0x3c0] sm:$0xff] }
 0x23d   :  { %4116 = vmatmul.mubr.msk.f32.gmra.mrb[4].mxu1 %vm1002_vm9, %v4112_v54  ;;  %v6007_v54 = vunpack.i.h.bf16 %v6005_v50  ;;  %v1892_v59 = vsel %vm738_vm7, %v5996_v53, %v5986_v39  ;;  %v5370_v39 = vpack.c.bf16 %v4254_v36, %v4253_v35  ;;  %v4239_v53 = vld [vmem:[%s8096_s5 + $0x340] sm:$0xff] }
 0x23e   :  { %1318 = vmatprep.mubr.f32.mxu1 %v6038_v3  ;;  %v5256_v0 = vpack.c.bf16 %v1894_v60, %v1892_v59  ;;  %v4258_v60 = vld [vmem:[%s8096_s5 + $0x3d8] sm:$0xff] }
 0x241   :  { %4117 = vmatmul.mubr.msk.f32.gmra.mrb[6].mxu1 %vm1002_vm9, %v4113_v55  ;;  %v6006_v55 = vunpack.i.l.bf16 %v6005_v50  ;;  %v4176_v50 = vld [vmem:[%s8096_s5 + $0x148] sm:$0xff] }
 0x242   :  { %1324 = vmatprep.mubr.f32.mxu1 %v6038_v3 }
 0x243   :  { %v2029_v63 = vsel %vm839_vm8, %v6006_v55, %v6007_v54  ;;  %v4240_v54 = vld [vmem:[%s8096_s5 + $0x348] sm:$0xff] }
 0x245   :  { %4118 = vmatmul.mubr.msk.f32.gmra.mrb[8].mxu1 %vm1002_vm9, %v4114_v62  ;;  %v2027_v62 = vsel %vm839_vm8, %v6001_v57, %v6002_v56  ;;  %v4193_v56 = vld [vmem:[%s8096_s5 + $0x1d0] sm:$0xff] }
 0x246   :  { %1440 = vmatprep.mubr.f32.mxu1 %v6038_v3  ;;  %v5258_v1 = vpack.c.bf16 %v2029_v63, %v2027_v62  ;;  %v4178_v62 = vld [vmem:[%s8096_s5 + $0x158] sm:$0xff] }
 0x247   :  { %v2150_v35 = vpop.permute.xlu1 %2149 }
 0x249   :  { %4123 = vmatmul.mubr.msk.f32.vlgmr.msra.gmra.mrb[2].mxu1 %vm1002_vm9, %v4119_v4  ;;  %v6010_v4 = vpop.permute.xlu0 %6009 }
 0x24a   :  { %5245 = vmatpush1.bf16.msra.mxu1 %v5244_v6  ;;  %1446 = vmatprep.mubr.f32.mxu1 %v6038_v3  ;;  %v6012_v6 = vunpack.i.h.bf16 %v6010_v4  ;;  %v6011_v7 = vunpack.i.l.bf16 %v6010_v4 }
 0x24b   :  { %5247 = vmatprep.subr.bf16.mxu1 %v5246_v9  ;;  %v4247_v9 = vld [vmem:[%s8096_s5 + $0x380] sm:$0xff] }
 0x24c   :  { %v2026_v12 = vsel %vm839_vm8, %v6011_v7, %v6001_v57  ;;  %v4194_v57 = vld [vmem:[%s8096_s5 + $0x1d8] sm:$0xff]  ;;  %v4259_v7 = vld [vmem:[%s8096_s5 + $0x3e0] sm:$0xff] }
 0x24d   :  { %4124 = vmatmul.mubr.msk.f32.gmra.mrb[4].mxu1 %vm1002_vm9, %v4120_v10  ;;  %v4248_v10 = vld [vmem:[%s8096_s5 + $0x388] sm:$0xff]  ;;  %v5282_v59 = vpack.c.bf16 %v4194_v57, %v4193_v56  ;;  %v2155_v41 = vpop.permute.xlu0 %2154  ;;  %v4295_v56 = vld [vmem:[%s8096_s5 + $0x500] sm:$0xff] }
 0x24e   :  { %1452 = vmatprep.mubr.f32.mxu1 %v6038_v3  ;;  %v5358_v14 = vpack.c.bf16 %v4248_v10, %v4247_v9  ;;  %v4260_v9 = vld [vmem:[%s8096_s5 + $0x3e8] sm:$0xff]  ;;  %v4179_v10 = vld [vmem:[%s8096_s5 + $0x160] sm:$0xff] }
 0x24f   :  { %v4296_v57 = vld [vmem:[%s8096_s5 + $0x508] sm:$0xff] }
 0x251   :  { %4125 = vmatmul.mubr.msk.f32.gmra.mrb[6].mxu1 %vm1002_vm9, %v4121_v11  ;;  %v2028_v11 = vsel %vm839_vm8, %v6012_v6, %v6006_v55  ;;  %v5376_v55 = vpack.c.bf16 %v4240_v54, %v4239_v53  ;;  %v4196_v6 = vld [vmem:[%s8096_s5 + $0x1e8] sm:$0xff]  ;;  %v2193_v53 = vld [vmem:[%s8096_s5] sm:$0xff] }
 0x252   :  { %1458 = vmatprep.mubr.f32.mxu1 %v6038_v3  ;;  %v5260_v15 = vpack.c.bf16 %v2028_v11, %v2026_v12  ;;  %v4180_v11 = vld [vmem:[%s8096_s5 + $0x168] sm:$0xff]  ;;  %v5382_v12 = vpack.c.bf16 %v4260_v9, %v4259_v7  ;;  %v4314_v9 = vld [vmem:[%s8096_s5 + $0x598] sm:$0xff] }
 0x255   :  { %4126 = vmatmul.mubr.msk.f32.gmra.mrb[8].mxu1 %vm1002_vm9, %v4122_v20  ;;  %v4232_v20 = vld [vmem:[%s8096_s5 + $0x308] sm:$0xff] }
 0x256   :  { %1574 = vmatprep.mubr.f32.mxu1 %v6038_v3  ;;  %v5360_v24 = vpack.c.bf16 %v4232_v20, %v4231_v19  ;;  %v4261_v19 = vld [vmem:[%s8096_s5 + $0x3f0] sm:$0xff] }
 0x259   :  { %4131 = vmatmul.mubr.msk.f32.vlgmr.msra.gmra.mrb[2].mxu1 %vm1002_vm9, %v4127_v23  ;;  %v4159_v23 = vld [vmem:[%s8094_s3 + $0x100] sm:$0xff] }
 0x25a   :  { %5249 = vmatpush1.bf16.msra.mxu1 %v5248_v26  ;;  %1580 = vmatprep.mubr.f32.mxu1 %v6038_v3  ;;  %v4233_v26 = vld [vmem:[%s8096_s5 + $0x310] sm:$0xff] }
 0x25b   :  { %5251 = vmatprep.subr.bf16.mxu1 %v5250_v28  ;;  %v4251_v28 = vld [vmem:[%s8096_s5 + $0x3a0] sm:$0xff]  ;;  %v5364_v31 = vpack.c.bf16 %v4234_v27, %v4233_v26  ;;  %v4245_v26 = vld [vmem:[%s8096_s5 + $0x370] sm:$0xff]  ;;  %v4246_v27 = vld [vmem:[%s8096_s5 + $0x378] sm:$0xff] }
 0x25d   :  { %4132 = vmatmul.mubr.msk.f32.gmra.mrb[4].mxu1 %vm1002_vm9, %v4128_v29  ;;  %v4252_v29 = vld [vmem:[%s8096_s5 + $0x3a8] sm:$0xff] }
 0x25e   :  { %1586 = vmatprep.mubr.f32.mxu1 %v6038_v3  ;;  %v5366_v32 = vpack.c.bf16 %v4252_v29, %v4251_v28  ;;  %v5388_v28 = vpack.c.bf16 %v4246_v27, %v4245_v26  ;;  %v2209_v29 = vld [vmem:[%s8096_s5 + $0x80] sm:$0xff]  ;;  %v4316_v27 = vld [vmem:[%s8096_s5 + $0x5a8] sm:$0xff] }
 0x25f   :  { %v4315_v26 = vld [vmem:[%s8096_s5 + $0x5a0] sm:$0xff] }
 0x261   :  { %4133 = vmatmul.mubr.msk.f32.gmra.mrb[6].mxu1 %vm1002_vm9, %v4129_v30  ;;  %v4160_v30 = vld [vmem:[%s8094_s3 + $0x108] sm:$0xff] }
 0x262   :  { %1592 = vmatprep.mubr.f32.mxu1 %v6038_v3 }
 0x265   :  { %4134 = vmatmul.mubr.msk.f32.gmra.mrb[8].mxu1 %vm1002_vm9, %v4130_v37  ;;  %v4161_v37 = vld [vmem:[%s8094_s3 + $0x110] sm:$0xff] }
 0x266   :  { %1708 = vmatprep.mubr.f32.mxu1 %v6038_v3 }
 0x269   :  { %4139 = vmatmul.mubr.msk.f32.vlgmr.msra.gmra.mrb[2].mxu1 %vm1002_vm9, %v4135_v42  ;;  %v4162_v42 = vld [vmem:[%s8094_s3 + $0x118] sm:$0xff] }
 0x26a   :  { %5253 = vmatpush1.bf16.msra.mxu1 %v5252_v44  ;;  %1714 = vmatprep.mubr.f32.mxu1 %v6038_v3  ;;  %v4191_v44 = vld [vmem:[%s8096_s5 + $0x1c0] sm:$0xff] }
 0x26b   :  { %5255 = vmatprep.subr.bf16.mxu1 %v5254_v47  ;;  %v5278_v47 = vpack.c.bf16 %v4192_v45, %v4191_v44 }
 0x26d   :  { %4140 = vmatmul.mubr.msk.f32.gmra.mrb[4].mxu1 %vm1002_vm9, %v4136_v48  ;;  %v4256_v48 = vld [vmem:[%s8096_s5 + $0x3c8] sm:$0xff]  ;;  %5279 = vmatprep.subr.bf16.mxu0 %v5278_v47 }
 0x26e   :  { %1720 = vmatprep.mubr.f32.mxu1 %v6038_v3  ;;  %v5374_v51 = vpack.c.bf16 %v4256_v48, %v4255_v46  ;;  %v2160_v48 = vpop.permute.xlu1 %2159 }
 0x271   :  { %4141 = vmatmul.mubr.msk.f32.gmra.mrb[6].mxu1 %vm1002_vm9, %v4137_v49  ;;  %v4175_v49 = vld [vmem:[%s8096_s5 + $0x140] sm:$0xff] }
 0x272   :  { %1726 = vmatprep.mubr.f32.mxu1 %v6038_v3  ;;  %v5280_v52 = vpack.c.bf16 %v4176_v50, %v4175_v49 }
 0x274   :  { %5281 = vmatpush3.bf16.msra.mxu0 %v5280_v52 }
 0x275   :  { %4142 = vmatmul.mubr.msk.f32.gmra.mrb[8].mxu1 %vm1002_vm9, %v4138_v58  ;;  %v4257_v58 = vld [vmem:[%s8096_s5 + $0x3d0] sm:$0xff]  ;;  %5283 = vmatprep.subr.bf16.mxu0 %v5282_v59 }
 0x276   :  { %1842 = vmatprep.mubr.f32.mxu1 %v6038_v3  ;;  %v5378_v63 = vpack.c.bf16 %v4258_v60, %v4257_v58  ;;  %v2211_v59 = vld [vmem:[%s8096_s5 + $0x90] sm:$0xff]  ;;  %v2212_v60 = vld [vmem:[%s8096_s5 + $0x98] sm:$0xff] }
 0x279   :  { %4147 = vmatmul.mubr.msk.f32.vlgmr.msra.gmra.mrb[2].mxu1 %vm1002_vm9, %v4143_v61  ;;  %v4177_v61 = vld [vmem:[%s8096_s5 + $0x150] sm:$0xff] }
 0x27a   :  { %5257 = vmatpush1.bf16.msra.mxu1 %v5256_v0  ;;  %1848 = vmatprep.mubr.f32.mxu1 %v6038_v3  ;;  %v5284_v0 = vpack.c.bf16 %v4178_v62, %v4177_v61  ;;  %v4313_v61 = vld [vmem:[%s8096_s5 + $0x590] sm:$0xff]  ;;  %v2165_v62 = vpop.permute.xlu0 %2164 }
 0x27b   :  { %5259 = vmatprep.subr.bf16.mxu1 %v5258_v1  ;;  %v4241_v1 = vld [vmem:[%s8096_s5 + $0x350] sm:$0xff] }
 0x27c   :  { %5285 = vmatpush3.bf16.msra.mxu0 %v5284_v0 }
 0x27d   :  { %4148 = vmatmul.mubr.msk.f32.gmra.mrb[4].mxu1 %vm1002_vm9, %v4144_v2  ;;  %v4242_v2 = vld [vmem:[%s8096_s5 + $0x358] sm:$0xff] }
 0x27e   :  { %1854 = vmatprep.mubr.f32.mxu1 %v6038_v3  ;;  %v5380_v4 = vpack.c.bf16 %v4242_v2, %v4241_v1 }
 0x281   :  { %4149 = vmatmul.mubr.msk.f32.gmra.mrb[6].mxu1 %vm1002_vm9, %v4145_v5  ;;  %v4195_v5 = vld [vmem:[%s8096_s5 + $0x1e0] sm:$0xff] }
 0x282   :  { %1860 = vmatprep.mubr.f32.mxu1 %v6038_v3 }
 0x285   :  { %4150 = vmatmul.mubr.msk.f32.gmra.mrb[8].mxu1 %vm1002_vm9, %v4146_v8  ;;  %v5286_v8 = vpack.c.bf16 %v4196_v6, %v4195_v5 }
 0x286   :  { %1976 = vmatprep.mubr.f32.mxu1 %v6038_v3 }
 0x287   :  { %5287 = vmatprep.subr.bf16.mxu0 %v5286_v8 }
 0x289   :  { %4155 = vmatmul.mubr.msk.f32.vlgmr.msra.gmra.mrb[2].mxu1 %vm1002_vm9, %v4151_v13  ;;  %v5288_v13 = vpack.c.bf16 %v4180_v11, %v4179_v10 }
 0x28a   :  { %5261 = vmatpush1.bf16.msra.mxu1 %v5260_v15  ;;  %1982 = vmatprep.mubr.f32.mxu1 %v6038_v3  ;;  %v4244_v15 = vld [vmem:[%s8096_s5 + $0x368] sm:$0xff] }
 0x28b   :  { %5359 = vmatprep.subr.bf16.mxu1 %v5358_v14  ;;  %v4243_v14 = vld [vmem:[%s8096_s5 + $0x360] sm:$0xff]  ;;  %5289 = vmatpush3.bf16.msra.mxu0 %v5288_v13  ;;  %v5424_v13 = vpack.c.bf16 %v4296_v57, %v4295_v56 }
 0x28c   :  { %v2201_v57 = vld [vmem:[%s8096_s5 + $0x40] sm:$0xff] }
 0x28d   :  { %4156 = vmatmul.mubr.msk.f32.gmra.mrb[4].mxu1 %vm1002_vm9, %v4152_v16  ;;  %v5384_v16 = vpack.c.bf16 %v4244_v15, %v4243_v14  ;;  %v2195_v14 = vld [vmem:[%s8096_s5 + $0x10] sm:$0xff]  ;;  %v2196_v15 = vld [vmem:[%s8096_s5 + $0x18] sm:$0xff] }
 0x28e   :  { %1988 = vmatprep.mubr.f32.mxu1 %v6038_v3 }
 0x291   :  { %4157 = vmatmul.mubr.msk.f32.gmra.mrb[6].mxu1 %vm1002_vm9, %v4153_v17  ;;  %v4197_v17 = vld [vmem:[%s8096_s5 + $0x1f0] sm:$0xff] }
 0x292   :  { %1994 = vmatprep.mubr.f32.mxu1 %v6038_v3 }
 0x295   :  { %4158 = vmatmul.mubr.msk.f32.gmra.mrb[8].mxu1 %vm1002_vm9, %v4154_v18  ;;  %v4198_v18 = vld [vmem:[%s8096_s5 + $0x1f8] sm:$0xff] }
 0x296   :  { %2110 = vmatprep.mubr.f32.mxu1 %v6038_v3  ;;  %v5290_v20 = vpack.c.bf16 %v4198_v18, %v4197_v17 }
 0x298   :  { %5291 = vmatprep.subr.bf16.mxu0 %v5290_v20  ;;  %v4297_v20 = vld [vmem:[%s8096_s5 + $0x510] sm:$0xff] }
 0x299   :  { %4163 = vmatmul.mubr.msk.f32.vlgmr.msra.gmra.mrb[2].mxu1 %vm1002_vm9, %v4159_v23  ;;  %v4182_v23 = vld [vmem:[%s8096_s5 + $0x178] sm:$0xff] }
 0x29a   :  { %2116 = vmatprep.mubr.f32.mxu1 %v6038_v3  ;;  %5361 = vmatpush3.bf16.msra.mxu1 %v5360_v24  ;;  %v5386_v24 = vpack.c.bf16 %v4262_v21, %v4261_v19  ;;  %v5298_v19 = vpack.c.bf16 %v2212_v60, %v2211_v59  ;;  %v4298_v21 = vld [vmem:[%s8096_s5 + $0x518] sm:$0xff] }
 0x29b   :  { %5363 = vmatprep.subr.bf16.mxu1 %v5362_v25  ;;  %v5292_v25 = vpack.c.bf16 %v4182_v23, %v4181_v22  ;;  %v2213_v22 = vld [vmem:[%s8096_s5 + $0xa0] sm:$0xff] }
 0x29d   :  { %4164 = vmatmul.mubr.msk.f32.gmra.mrb[4].mxu1 %vm1002_vm9, %v4160_v30  ;;  %5293 = vmatpush3.bf16.msra.mxu0 %v5292_v25  ;;  %v2210_v30 = vld [vmem:[%s8096_s5 + $0x88] sm:$0xff] }
 0x29e   :  { %2122 = vmatprep.mubr.f32.mxu1 %v6038_v3  ;;  %5365 = vmatpush3.bf16.msra.mxu1 %v5364_v31  ;;  %v4311_v31 = vld [vmem:[%s8096_s5 + $0x580] sm:$0xff]  ;;  %v2214_v25 = vld [vmem:[%s8096_s5 + $0xa8] sm:$0xff] }
 0x29f   :  { %5367 = vmatprep.subr.bf16.mxu1 %v5366_v32  ;;  %v5294_v32 = vpack.c.bf16 %v2210_v30, %v2209_v29  ;;  %v5422_v34 = vpack.c.bf16 %v4312_v33, %v4311_v31  ;;  %v5300_v31 = vpack.c.bf16 %v2196_v15, %v2195_v14  ;;  %v2197_v33 = vld [vmem:[%s8096_s5 + $0x20] sm:$0xff]  ;;  %v4324_v15 = vld [vmem:[%s8096_s5 + $0x5e8] sm:$0xff] }
 0x2a0   :  { %v4323_v14 = vld [vmem:[%s8096_s5 + $0x5e0] sm:$0xff] }
 0x2a1   :  { %4165 = vmatmul.mubr.msk.f32.gmra.mrb[6].mxu1 %vm1002_vm9, %v4161_v37  ;;  %5295 = vmatprep.subr.bf16.mxu0 %v5294_v32  ;;  %v5428_v32 = vpack.c.bf16 %v4298_v21, %v4297_v20  ;;  %v5446_v21 = vpack.c.bf16 %v4324_v15, %v4323_v14  ;;  %v4364_v15 = vld [vmem:[%s8096_s5 + $0x728] sm:$0xff] }
 0x2a2   :  { %2128 = vmatprep.mubr.f32.mxu1 %v6038_v3  ;;  %5369 = vmatpush3.bf16.msra.mxu1 %v5368_v38 }
 0x2a3   :  { %5371 = vmatprep.subr.bf16.mxu1 %v5370_v39 }
 0x2a5   :  { %4166 = vmatmul.mubr.msk.f32.gmra.mrb[8].mxu1 %vm1002_vm9, %v4162_v42 }
 0x2a6   :  { %5373 = vmatpush3.bf16.msra.mxu1 %v5372_v43 }
 0x2a7   :  { %5375 = vmatprep.subr.bf16.mxu1 %v5374_v51 }
 0x2aa   :  { %5377 = vmatpush3.bf16.msra.mxu1 %v5376_v55  ;;  %v2194_v55 = vld [vmem:[%s8096_s5 + $0x8] sm:$0xff] }
 0x2ab   :  { %5379 = vmatprep.subr.bf16.mxu1 %v5378_v63  ;;  %v5296_v8 = vpack.c.bf16 %v2194_v55, %v2193_v53  ;;  %v4319_v53 = vld [vmem:[%s8096_s5 + $0x5c0] sm:$0xff] }
 0x2ae   :  { %5381 = vmatpush3.bf16.msra.mxu1 %v5380_v4 }
 0x2af   :  { %5383 = vmatprep.subr.bf16.mxu1 %v5382_v12 }
 0x2b2   :  { %5385 = vmatpush3.bf16.msra.mxu1 %v5384_v16 }
 0x2b3   :  { %5387 = vmatprep.subr.bf16.mxu1 %v5386_v24  ;;  %v5426_v24 = vpack.c.bf16 %v4314_v9, %v4313_v61  ;;  %v4303_v61 = vld [vmem:[%s8096_s5 + $0x540] sm:$0xff] }
 0x2b6   :  { %5389 = vmatpush3.bf16.msra.mxu1 %v5388_v28 }
 0x2b7   :  { %5423 = vmatprep.subr.bf16.mxu1 %v5422_v34  ;;  %v2198_v34 = vld [vmem:[%s8096_s5 + $0x28] sm:$0xff] }
 0x36c   :  { %v2112_v36 = vpop.f32.mrb[2].mxu1 }
 0x36d   :  { %v2167_v37 = vadd.f32 %v2150_v35, %v2112_v36  ;;  %v2114_v38 = vpop.f32.mrb[3].mxu1  ;;  %v5430_v36 = vpack.c.bf16 %v4316_v27, %v4315_v26  ;;  %v4325_v26 = vld [vmem:[%s8096_s5 + $0x5f0] sm:$0xff]  ;;  %v4326_v27 = vld [vmem:[%s8096_s5 + $0x5f8] sm:$0xff] }
 0x36e   :  { %v2168_v39 = vadd.f32 %v2150_v35, %v2114_v38  ;;  %v5302_v35 = vpack.c.bf16 %v2214_v25, %v2213_v22  ;;  %v4300_v38 = vld [vmem:[%s8096_s5 + $0x528] sm:$0xff]  ;;  %v4307_v22 = vld [vmem:[%s8096_s5 + $0x560] sm:$0xff]  ;;  %v2224_v25 = vld [vmem:[%s8096_s5 + $0xf8] sm:$0xff] }
 0x36f   :  { %v2175_v40 = vmax.f32 %v2167_v37, 0.0  ;;  %v4299_v37 = vld [vmem:[%s8096_s5 + $0x520] sm:$0xff] }
 0x370   :  { %v2176_v42 = vmax.f32 %v2168_v39, 0.0  ;;  %v2118_v43 = vpop.f32.mrb[4].mxu1  ;;  %v2215_v39 = vld [vmem:[%s8096_s5 + $0xb0] sm:$0xff] }
 0x371   :  { %2183 = vst [vmem:[#allocation3] sm:$0xff] %v2175_v40  ;;  %v2169_v44 = vadd.f32 %v2155_v41, %v2118_v43  ;;  %v2120_v45 = vpop.f32.mrb[5].mxu1  ;;  %v2216_v40 = vld [vmem:[%s8096_s5 + $0xb8] sm:$0xff]  ;;  %v5304_v43 = vpack.c.bf16 %v2198_v34, %v2197_v33  ;;  %v5450_v33 = vpack.c.bf16 %v4326_v27, %v4325_v26  ;;  %v4309_v34 = vld [vmem:[%s8096_s5 + $0x570] sm:$0xff] }
 0x372   :  { %2184 = vst [vmem:[#allocation3 + $0x8] sm:$0xff] %v2176_v42  ;;  %v2170_v46 = vadd.f32 %v2155_v41, %v2120_v45  ;;  %v4317_v41 = vld [vmem:[%s8096_s5 + $0x5b0] sm:$0xff]  ;;  %v4318_v42 = vld [vmem:[%s8096_s5 + $0x5b8] sm:$0xff] }
 0x373   :  { %v2177_v47 = vmax.f32 %v2169_v44, 0.0  ;;  %v5432_v44 = vpack.c.bf16 %v4300_v38, %v4299_v37  ;;  %v2199_v45 = vld [vmem:[%s8096_s5 + $0x30] sm:$0xff]  ;;  %v4216_v37 = vld [vmem:[%s8096_s5 + $0x288] sm:$0xff]  ;;  %v4375_v38 = vld [vmem:[%s8096_s5 + $0x780] sm:$0xff] }
 0x374   :  { %v2178_v49 = vmax.f32 %v2170_v46, 0.0  ;;  %v2124_v50 = vpop.f32.mrb[6].mxu1  ;;  %v2200_v46 = vld [vmem:[%s8096_s5 + $0x38] sm:$0xff] }
 0x375   :  { %2185 = vst [vmem:[#allocation3 + $0x10] sm:$0xff] %v2177_v47  ;;  %v2171_v51 = vadd.f32 %v2160_v48, %v2124_v50  ;;  %v2126_v52 = vpop.f32.mrb[7].mxu1  ;;  %v5306_v47 = vpack.c.bf16 %v2216_v40, %v2215_v39  ;;  %v4302_v50 = vld [vmem:[%s8096_s5 + $0x538] sm:$0xff]  ;;  %v5308_v55 = vpack.c.bf16 %v2200_v46, %v2199_v45  ;;  %v4376_v39 = vld [vmem:[%s8096_s5 + $0x788] sm:$0xff]  ;;  %v4359_v46 = vld [vmem:[%s8096_s5 + $0x700] sm:$0xff] }
 0x376   :  { %2186 = vst [vmem:[#allocation3 + $0x18] sm:$0xff] %v2178_v49  ;;  %v2172_v54 = vadd.f32 %v2160_v48, %v2126_v52  ;;  %v5434_v48 = vpack.c.bf16 %v4318_v42, %v4317_v41  ;;  %v4301_v49 = vld [vmem:[%s8096_s5 + $0x530] sm:$0xff]  ;;  %v2218_v52 = vld [vmem:[%s8096_s5 + $0xc8] sm:$0xff]  ;;  %v4199_v42 = vld [vmem:[%s8096_s5 + $0x200] sm:$0xff] }
 0x377   :  { %v2179_v58 = vmax.f32 %v2171_v51, 0.0  ;;  %v2217_v51 = vld [vmem:[%s8096_s5 + $0xc0] sm:$0xff]  ;;  %v5436_v56 = vpack.c.bf16 %v4302_v50, %v4301_v49  ;;  %v4200_v45 = vld [vmem:[%s8096_s5 + $0x208] sm:$0xff]  ;;  %v4217_v49 = vld [vmem:[%s8096_s5 + $0x290] sm:$0xff] }
 0x378   :  { %v2180_v63 = vmax.f32 %v2172_v54, 0.0  ;;  %v2130_v0 = vpop.f32.mrb[8].mxu1  ;;  %v2225_v1 = vld [vmem:[#allocation3] sm:$0xc]  ;;  %v2518_v2 = vld [vmem:[#allocation3] sm:$0xc0]  ;;  %v5310_v59 = vpack.c.bf16 %v2218_v52, %v2217_v51 }
 0x379   :  { %2187 = vst [vmem:[#allocation3 + $0x20] sm:$0xff] %v2179_v58  ;;  %v2173_v4 = vadd.f32 %v2165_v62, %v2130_v0  ;;  %v2132_v5 = vpop.f32.mrb[9].mxu1  ;;  %v2226_v6 = vld [vmem:[#allocation3 + $0x8] sm:$0xc]  ;;  %v2519_v7 = vld [vmem:[#allocation3 + $0x8] sm:$0xc0] }
 0x37a   :  { %2188 = vst [vmem:[#allocation3 + $0x28] sm:$0xff] %v2180_v63  ;;  %v2174_v10 = vadd.f32 %v2165_v62, %v2132_v5  ;;  %v2263_v11 = vrot.slane %v2226_v6, 2  ;;  %v2556_v12 = vrot.slane %v2519_v7, 6  ;;  %v2262_v17 = vrot.slane %v2225_v1, 2  ;;  %v2192_v29 = vld [vmem:[#allocation3 + $0x8] sm:$0x3] }
 0x37b   :  { %v2181_v16 = vmax.f32 %v2173_v4, 0.0  ;;  %v2555_v18 = vrot.slane %v2518_v2, 6  ;;  %v4320_v54 = vld [vmem:[%s8096_s5 + $0x5c8] sm:$0xff]  ;;  %v2219_v63 = vld [vmem:[%s8096_s5 + $0xd0] sm:$0xff]  ;;  %v2220_v0 = vld [vmem:[%s8096_s5 + $0xd8] sm:$0xff] }
 0x37c   :  { %v2182_v23 = vmax.f32 %v2174_v10, 0.0  ;;  %2330 = vmatprep.mubr.f32.mxu0 %v2263_v11  ;;  %2623 = vmatprep.mubr.f32.mxu1 %v2556_v12  ;;  %v2202_v58 = vld [vmem:[%s8096_s5 + $0x48] sm:$0xff]  ;;  %v5438_v60 = vpack.c.bf16 %v4320_v54, %v4319_v53  ;;  %v4321_v1 = vld [vmem:[%s8096_s5 + $0x5d0] sm:$0xff]  ;;  %v4322_v2 = vld [vmem:[%s8096_s5 + $0x5d8] sm:$0xff]  ;;  %v5328_v54 = vpack.c.bf16 %v4200_v45, %v4199_v42 }
 0x37d   :  { %2189 = vst [vmem:[#allocation3 + $0x30] sm:$0xff] %v2181_v16  ;;  %2331 = vmatmul.mubr.f32.vlgmr.msra.gmra.mrb[4].mxu0 %v2262_v17  ;;  %2624 = vmatmul.mubr.f32.vlgmr.msra.gmra.mrb[10].mxu1 %v2555_v18  ;;  %v2737_v28 = vld [vmem:[#allocation3 + $0x18] sm:$0xc]  ;;  %v4304_v62 = vld [vmem:[%s8096_s5 + $0x548] sm:$0xff]  ;;  %v5312_v4 = vpack.c.bf16 %v2202_v58, %v2201_v57  ;;  %v2203_v6 = vld [vmem:[%s8096_s5 + $0x50] sm:$0xff]  ;;  %v5442_v9 = vpack.c.bf16 %v4322_v2, %v4321_v1 }
 0x37e   :  { %2190 = vst [vmem:[#allocation3 + $0x38] sm:$0xff] %v2182_v23  ;;  %5297 = vmatpush3.bf16.msra.mxu0 %v5296_v8  ;;  %5425 = vmatpush3.bf16.msra.mxu1 %v5424_v13  ;;  %v2774_v30 = vrot.slane %v2737_v28, 2  ;;  %v5440_v5 = vpack.c.bf16 %v4304_v62, %v4303_v61  ;;  %v2204_v7 = vld [vmem:[%s8096_s5 + $0x58] sm:$0xff]  ;;  %v5314_v8 = vpack.c.bf16 %v2220_v0, %v2219_v63  ;;  %v4305_v10 = vld [vmem:[%s8096_s5 + $0x550] sm:$0xff]  ;;  %v2221_v12 = vld [vmem:[%s8096_s5 + $0xe0] sm:$0xff] }
 0x37f   :  { %2400 = vmatprep.mubr.f32.mxu0 %v2192_v29  ;;  %5299 = vmatprep.subr.bf16.mxu0 %v5298_v19  ;;  %v4306_v11 = vld [vmem:[%s8096_s5 + $0x558] sm:$0xff]  ;;  %v2222_v13 = vld [vmem:[%s8096_s5 + $0xe8] sm:$0xff]  ;;  %v5316_v16 = vpack.c.bf16 %v2204_v7, %v2203_v6  ;;  %v2205_v18 = vld [vmem:[%s8096_s5 + $0x60] sm:$0xff] }
 0x380   :  { %5427 = vmatprep.subr.bf16.mxu1 %v5426_v24  ;;  %2841 = vmatprep.mubr.f32.mxu1 %v2774_v30  ;;  %v5444_v17 = vpack.c.bf16 %v4306_v11, %v4305_v10  ;;  %v2206_v19 = vld [vmem:[%s8096_s5 + $0x68] sm:$0xff]  ;;  %v5318_v20 = vpack.c.bf16 %v2222_v13, %v2221_v12  ;;  %v2223_v24 = vld [vmem:[%s8096_s5 + $0xf0] sm:$0xff]  ;;  %v4218_v50 = vld [vmem:[%s8096_s5 + $0x298] sm:$0xff] }
 0x381   :  { %v4308_v23 = vld [vmem:[%s8096_s5 + $0x568] sm:$0xff]  ;;  %v5320_v28 = vpack.c.bf16 %v2206_v19, %v2205_v18  ;;  %v2207_v30 = vld [vmem:[%s8096_s5 + $0x70] sm:$0xff]  ;;  %v4378_v53 = vld [vmem:[%s8096_s5 + $0x798] sm:$0xff]  ;;  %v5330_v0 = vpack.c.bf16 %v4218_v50, %v4217_v49 }
 0x382   :  { %5301 = vmatpush3.bf16.msra.mxu0 %v5300_v31  ;;  %5429 = vmatpush3.bf16.msra.mxu1 %v5428_v32  ;;  %v5448_v29 = vpack.c.bf16 %v4308_v23, %v4307_v22  ;;  %v2208_v31 = vld [vmem:[%s8096_s5 + $0x78] sm:$0xff]  ;;  %v5322_v32 = vpack.c.bf16 %v2224_v25, %v2223_v24  ;;  %v2407_v51 = vld [vmem:[#allocation3 + $0x8] sm:$0x30]  ;;  %v4377_v52 = vld [vmem:[%s8096_s5 + $0x790] sm:$0xff] }
 0x383   :  { %5303 = vmatprep.subr.bf16.mxu0 %v5302_v35  ;;  %5431 = vmatprep.subr.bf16.mxu1 %v5430_v36  ;;  %v4310_v35 = vld [vmem:[%s8096_s5 + $0x578] sm:$0xff]  ;;  %v4215_v36 = vld [vmem:[%s8096_s5 + $0x280] sm:$0xff]  ;;  %v5324_v40 = vpack.c.bf16 %v2208_v31, %v2207_v30  ;;  %v2444_v63 = vrot.slane %v2407_v51, 4  ;;  %v5490_v1 = vpack.c.bf16 %v4378_v53, %v4377_v52  ;;  %v4380_v7 = vld [vmem:[%s8096_s5 + $0x7a8] sm:$0xff] }
 0x384   :  { %v5452_v41 = vpack.c.bf16 %v4310_v35, %v4309_v34  ;;  %v4362_v61 = vld [vmem:[%s8096_s5 + $0x718] sm:$0xff]  ;;  %v2191_v62 = vld [vmem:[#allocation3] sm:$0x3]  ;;  %v4204_v12 = vld [vmem:[%s8096_s5 + $0x228] sm:$0xff] }
 0x385   :  { %v4219_v2 = vld [vmem:[%s8096_s5 + $0x2a0] sm:$0xff]  ;;  %v4381_v18 = vld [vmem:[%s8096_s5 + $0x7b0] sm:$0xff]  ;;  %v4382_v19 = vld [vmem:[%s8096_s5 + $0x7b8] sm:$0xff] }
 0x386   :  { %5305 = vmatpush3.bf16.msra.mxu0 %v5304_v43  ;;  %5433 = vmatpush3.bf16.msra.mxu1 %v5432_v44  ;;  %v5326_v43 = vpack.c.bf16 %v4216_v37, %v4215_v36  ;;  %v5486_v44 = vpack.c.bf16 %v4376_v39, %v4375_v38  ;;  %v4379_v6 = vld [vmem:[%s8096_s5 + $0x7a0] sm:$0xff]  ;;  %v4205_v23 = vld [vmem:[%s8096_s5 + $0x230] sm:$0xff]  ;;  %v4206_v24 = vld [vmem:[%s8096_s5 + $0x238] sm:$0xff]  ;;  %v5498_v26 = vpack.c.bf16 %v4382_v19, %v4381_v18 }
 0x387   :  { %5307 = vmatprep.subr.bf16.mxu0 %v5306_v47  ;;  %5435 = vmatprep.subr.bf16.mxu1 %v5434_v48  ;;  %v4360_v47 = vld [vmem:[%s8096_s5 + $0x708] sm:$0xff]  ;;  %v2736_v48 = vld [vmem:[#allocation3 + $0x10] sm:$0xc]  ;;  %v4203_v11 = vld [vmem:[%s8096_s5 + $0x220] sm:$0xff]  ;;  %v5494_v14 = vpack.c.bf16 %v4380_v7, %v4379_v6 }
 0x388   :  { %v2773_v57 = vrot.slane %v2736_v48, 2  ;;  %v5488_v58 = vpack.c.bf16 %v4360_v47, %v4359_v46  ;;  %v4363_v13 = vld [vmem:[%s8096_s5 + $0x720] sm:$0xff]  ;;  %v4365_v25 = vld [vmem:[%s8096_s5 + $0x730] sm:$0xff]  ;;  %v4366_v27 = vld [vmem:[%s8096_s5 + $0x738] sm:$0xff] }
 0x389   :  { %v4383_v30 = vld [vmem:[%s8096_s5 + $0x7c0] sm:$0xff]  ;;  %v4384_v31 = vld [vmem:[%s8096_s5 + $0x7c8] sm:$0xff]  ;;  %v4385_v42 = vld [vmem:[%s8096_s5 + $0x7d0] sm:$0xff] }
 0x38a   :  { %5309 = vmatpush3.bf16.msra.mxu0 %v5308_v55  ;;  %5437 = vmatpush3.bf16.msra.mxu1 %v5436_v56  ;;  %v2961_v55 = vld [vmem:[#allocation3 + $0x18] sm:$0xc0]  ;;  %v4201_v56 = vld [vmem:[%s8096_s5 + $0x210] sm:$0xff]  ;;  %v4207_v35 = vld [vmem:[%s8096_s5 + $0x240] sm:$0xff]  ;;  %v5502_v38 = vpack.c.bf16 %v4384_v31, %v4383_v30 }
 0x38b   :  { %5311 = vmatprep.subr.bf16.mxu0 %v5310_v59  ;;  %5439 = vmatprep.subr.bf16.mxu1 %v5438_v60  ;;  %v4202_v59 = vld [vmem:[%s8096_s5 + $0x218] sm:$0xff]  ;;  %v4361_v60 = vld [vmem:[%s8096_s5 + $0x710] sm:$0xff]  ;;  %v4208_v36 = vld [vmem:[%s8096_s5 + $0x248] sm:$0xff] }
 0x38c   :  { %v4367_v37 = vld [vmem:[%s8096_s5 + $0x740] sm:$0xff]  ;;  %v4368_v39 = vld [vmem:[%s8096_s5 + $0x748] sm:$0xff]  ;;  %v4209_v47 = vld [vmem:[%s8096_s5 + $0x250] sm:$0xff] }
 0x38d   :  { %v5504_v45 = vpack.c.bf16 %v4368_v39, %v4367_v37  ;;  %v4210_v48 = vld [vmem:[%s8096_s5 + $0x258] sm:$0xff]  ;;  %v4369_v49 = vld [vmem:[%s8096_s5 + $0x750] sm:$0xff]  ;;  %v4227_v52 = vld [vmem:[%s8096_s5 + $0x2e0] sm:$0xff] }
 0x38e   :  { %5313 = vmatpush3.bf16.msra.mxu0 %v5312_v4  ;;  %5441 = vmatpush3.bf16.msra.mxu1 %v5440_v5  ;;  %v4220_v4 = vld [vmem:[%s8096_s5 + $0x2a8] sm:$0xff]  ;;  %v2998_v5 = vrot.slane %v2961_v55, 6  ;;  %v4370_v51 = vld [vmem:[%s8096_s5 + $0x758] sm:$0xff]  ;;  %v4441_v30 = vld [vmem:[%s8096_s5 + $0x990] sm:$0xff] }
 0x38f   :  { %5315 = vmatprep.subr.bf16.mxu0 %v5314_v8  ;;  %5443 = vmatprep.subr.bf16.mxu1 %v5442_v9  ;;  %v5332_v8 = vpack.c.bf16 %v4202_v59, %v4201_v56  ;;  %v5492_v9 = vpack.c.bf16 %v4362_v61, %v4361_v60  ;;  %v5334_v10 = vpack.c.bf16 %v4220_v4, %v4219_v2  ;;  %v4228_v53 = vld [vmem:[%s8096_s5 + $0x2e8] sm:$0xff]  ;;  %v4211_v59 = vld [vmem:[%s8096_s5 + $0x260] sm:$0xff]  ;;  %v4389_v2 = vld [vmem:[%s8096_s5 + $0x7f0] sm:$0xff] }
 0x390   :  { %v4388_v55 = vld [vmem:[%s8096_s5 + $0x7e8] sm:$0xff]  ;;  %v5348_v56 = vpack.c.bf16 %v4210_v48, %v4209_v47  ;;  %v4371_v61 = vld [vmem:[%s8096_s5 + $0x760] sm:$0xff]  ;;  %v4390_v4 = vld [vmem:[%s8096_s5 + $0x7f8] sm:$0xff] }
 0x391   :  { %v4212_v60 = vld [vmem:[%s8096_s5 + $0x268] sm:$0xff]  ;;  %v4442_v31 = vld [vmem:[%s8096_s5 + $0x998] sm:$0xff]  ;;  %v4425_v37 = vld [vmem:[%s8096_s5 + $0x910] sm:$0xff] }
 0x392   :  { %5317 = vmatpush3.bf16.msra.mxu0 %v5316_v16  ;;  %5445 = vmatpush3.bf16.msra.mxu1 %v5444_v17  ;;  %v4221_v16 = vld [vmem:[%s8096_s5 + $0x2b0] sm:$0xff]  ;;  %v4222_v17 = vld [vmem:[%s8096_s5 + $0x2b8] sm:$0xff] }
 0x393   :  { %5319 = vmatprep.subr.bf16.mxu0 %v5318_v20  ;;  %5447 = vmatprep.subr.bf16.mxu1 %v5446_v21  ;;  %v5336_v20 = vpack.c.bf16 %v4204_v12, %v4203_v11  ;;  %v5496_v21 = vpack.c.bf16 %v4364_v15, %v4363_v13  ;;  %v5338_v22 = vpack.c.bf16 %v4222_v17, %v4221_v16  ;;  %v4374_v12 = vld [vmem:[%s8096_s5 + $0x778] sm:$0xff]  ;;  %v4279_v13 = vld [vmem:[%s8096_s5 + $0x480] sm:$0xff]  ;;  %v4440_v16 = vld [vmem:[%s8096_s5 + $0x988] sm:$0xff] }
 0x394   :  { %v5514_v11 = vpack.c.bf16 %v4390_v4, %v4389_v2  ;;  %v4439_v15 = vld [vmem:[%s8096_s5 + $0x980] sm:$0xff]  ;;  %v4430_v4 = vld [vmem:[%s8096_s5 + $0x938] sm:$0xff] }
 0x396   :  { %5321 = vmatpush3.bf16.msra.mxu0 %v5320_v28  ;;  %5449 = vmatpush3.bf16.msra.mxu1 %v5448_v29  ;;  %v4223_v28 = vld [vmem:[%s8096_s5 + $0x2c0] sm:$0xff]  ;;  %v4224_v29 = vld [vmem:[%s8096_s5 + $0x2c8] sm:$0xff] }
 0x397   :  { %5323 = vmatprep.subr.bf16.mxu0 %v5322_v32  ;;  %5451 = vmatprep.subr.bf16.mxu1 %v5450_v33  ;;  %v5340_v32 = vpack.c.bf16 %v4206_v24, %v4205_v23  ;;  %v5500_v33 = vpack.c.bf16 %v4366_v27, %v4365_v25  ;;  %v5342_v34 = vpack.c.bf16 %v4224_v29, %v4223_v28  ;;  %v4423_v24 = vld [vmem:[%s8096_s5 + $0x900] sm:$0xff]  ;;  %v4424_v25 = vld [vmem:[%s8096_s5 + $0x908] sm:$0xff]  ;;  %v4281_v27 = vld [vmem:[%s8096_s5 + $0x490] sm:$0xff] }
 0x398   :  { %v5550_v23 = vpack.c.bf16 %v4440_v16, %v4439_v15  ;;  %v4282_v28 = vld [vmem:[%s8096_s5 + $0x498] sm:$0xff]  ;;  %v4432_v16 = vld [vmem:[%s8096_s5 + $0x948] sm:$0xff] }
 0x399   :  { %v5394_v39 = vpack.c.bf16 %v4282_v28, %v4281_v27  ;;  %v4434_v28 = vld [vmem:[%s8096_s5 + $0x958] sm:$0xff] }
 0x39a   :  { %5325 = vmatpush3.bf16.msra.mxu0 %v5324_v40  ;;  %5453 = vmatpush3.bf16.msra.mxu1 %v5452_v41  ;;  %v4225_v40 = vld [vmem:[%s8096_s5 + $0x2d0] sm:$0xff]  ;;  %v4226_v41 = vld [vmem:[%s8096_s5 + $0x2d8] sm:$0xff] }
 0x39b   :  { %5327 = vmatprep.subr.bf16.mxu0 %v5326_v43  ;;  %5487 = vmatprep.subr.bf16.mxu1 %v5486_v44  ;;  %v4386_v43 = vld [vmem:[%s8096_s5 + $0x7d8] sm:$0xff]  ;;  %v5344_v44 = vpack.c.bf16 %v4208_v36, %v4207_v35  ;;  %v5346_v46 = vpack.c.bf16 %v4226_v41, %v4225_v40  ;;  %v3179_v35 = vld [vmem:[#allocation3 + $0x28] sm:$0xc]  ;;  %v4283_v41 = vld [vmem:[%s8096_s5 + $0x4a0] sm:$0xff] }
 0x39c   :  { %v5506_v50 = vpack.c.bf16 %v4386_v43, %v4385_v42  ;;  %v4266_v36 = vld [vmem:[%s8096_s5 + $0x418] sm:$0xff]  ;;  %v4284_v42 = vld [vmem:[%s8096_s5 + $0x4a8] sm:$0xff]  ;;  %v5554_v43 = vpack.c.bf16 %v4442_v31, %v4441_v30  ;;  %v3216_v47 = vrot.slane %v3179_v35, 2  ;;  %v4451_v31 = vld [vmem:[%s8096_s5 + $0x9e0] sm:$0xff] }
 0x39d   :  { %2401 = vmatmul.mubr.f32.vlgmr.msra.gmra.mrb[6].mxu0 %v2191_v62  ;;  %2842 = vmatmul.mubr.f32.vlgmr.msra.gmra.mrb[12].mxu1 %v2773_v57  ;;  %v5508_v57 = vpack.c.bf16 %v4370_v51, %v4369_v49  ;;  %v4426_v40 = vld [vmem:[%s8096_s5 + $0x918] sm:$0xff]  ;;  %v4267_v51 = vld [vmem:[%s8096_s5 + $0x420] sm:$0xff]  ;;  %v4292_v30 = vld [vmem:[%s8096_s5 + $0x4e8] sm:$0xff] }
 0x39e   :  { %5329 = vmatpush3.bf16.msra.mxu0 %v5328_v54  ;;  %2511 = vmatprep.mubr.f32.mxu0 %v2444_v63  ;;  %v4387_v54 = vld [vmem:[%s8096_s5 + $0x7e0] sm:$0xff]  ;;  %v4372_v63 = vld [vmem:[%s8096_s5 + $0x768] sm:$0xff]  ;;  %v5556_v49 = vpack.c.bf16 %v4426_v40, %v4425_v37 }
 0x39f   :  { %5489 = vmatpush3.bf16.msra.mxu1 %v5488_v58  ;;  %3065 = vmatprep.mubr.f32.mxu1 %v2998_v5  ;;  %v5350_v58 = vpack.c.bf16 %v4228_v53, %v4227_v52  ;;  %v5510_v62 = vpack.c.bf16 %v4388_v55, %v4387_v54  ;;  %v5352_v5 = vpack.c.bf16 %v4212_v60, %v4211_v59  ;;  %v4268_v52 = vld [vmem:[%s8096_s5 + $0x428] sm:$0xff]  ;;  %v4427_v53 = vld [vmem:[%s8096_s5 + $0x920] sm:$0xff]  ;;  %v4446_v59 = vld [vmem:[%s8096_s5 + $0x9b8] sm:$0xff] }
 0x3a0   :  { %5331 = vmatprep.subr.bf16.mxu0 %v5330_v0  ;;  %5491 = vmatprep.subr.bf16.mxu1 %v5490_v1  ;;  %v4229_v0 = vld [vmem:[%s8096_s5 + $0x2f0] sm:$0xff]  ;;  %v4230_v1 = vld [vmem:[%s8096_s5 + $0x2f8] sm:$0xff]  ;;  %v5512_v6 = vpack.c.bf16 %v4372_v63, %v4371_v61  ;;  %v4428_v55 = vld [vmem:[%s8096_s5 + $0x928] sm:$0xff]  ;;  %v5400_v60 = vpack.c.bf16 %v4268_v52, %v4267_v51 }
 0x3a1   :  { %v5354_v7 = vpack.c.bf16 %v4230_v1, %v4229_v0  ;;  %v5560_v61 = vpack.c.bf16 %v4428_v55, %v4427_v53  ;;  %v4269_v63 = vld [vmem:[%s8096_s5 + $0x430] sm:$0xff]  ;;  %v4270_v0 = vld [vmem:[%s8096_s5 + $0x438] sm:$0xff]  ;;  %v4276_v37 = vld [vmem:[%s8096_s5 + $0x468] sm:$0xff] }
 0x3a2   :  { %5333 = vmatpush3.bf16.msra.mxu0 %v5332_v8  ;;  %v4213_v8 = vld [vmem:[%s8096_s5 + $0x270] sm:$0xff]  ;;  %v4436_v40 = vld [vmem:[%s8096_s5 + $0x968] sm:$0xff]  ;;  %v4438_v52 = vld [vmem:[%s8096_s5 + $0x978] sm:$0xff] }
 0x3a3   :  { %5493 = vmatpush3.bf16.msra.mxu1 %v5492_v9  ;;  %5335 = vmatprep.subr.bf16.mxu0 %v5334_v10  ;;  %v4214_v9 = vld [vmem:[%s8096_s5 + $0x278] sm:$0xff]  ;;  %v4373_v10 = vld [vmem:[%s8096_s5 + $0x770] sm:$0xff]  ;;  %v4343_v53 = vld [vmem:[%s8096_s5 + $0x680] sm:$0xff] }
 0x3a4   :  { %5495 = vmatprep.subr.bf16.mxu1 %v5494_v14  ;;  %v4280_v14 = vld [vmem:[%s8096_s5 + $0x488] sm:$0xff]  ;;  %v5356_v17 = vpack.c.bf16 %v4214_v9, %v4213_v8  ;;  %v5516_v18 = vpack.c.bf16 %v4374_v12, %v4373_v10  ;;  %v4429_v1 = vld [vmem:[%s8096_s5 + $0x930] sm:$0xff]  ;;  %v5404_v9 = vpack.c.bf16 %v4270_v0, %v4269_v63  ;;  %v4271_v12 = vld [vmem:[%s8096_s5 + $0x440] sm:$0xff] }
 0x3a5   :  { %v5390_v19 = vpack.c.bf16 %v4280_v14, %v4279_v13  ;;  %v4448_v8 = vld [vmem:[%s8096_s5 + $0x9c8] sm:$0xff]  ;;  %v5564_v10 = vpack.c.bf16 %v4430_v4, %v4429_v1  ;;  %v4431_v14 = vld [vmem:[%s8096_s5 + $0x940] sm:$0xff]  ;;  %v4345_v1 = vld [vmem:[%s8096_s5 + $0x690] sm:$0xff] }
 0x3a6   :  { %5337 = vmatpush3.bf16.msra.mxu0 %v5336_v20  ;;  %v4263_v20 = vld [vmem:[%s8096_s5 + $0x400] sm:$0xff]  ;;  %v4272_v13 = vld [vmem:[%s8096_s5 + $0x448] sm:$0xff] }
 0x3a7   :  { %5497 = vmatpush3.bf16.msra.mxu1 %v5496_v21  ;;  %5339 = vmatprep.subr.bf16.mxu0 %v5338_v22  ;;  %v4264_v21 = vld [vmem:[%s8096_s5 + $0x408] sm:$0xff]  ;;  %v2406_v22 = vld [vmem:[#allocation3] sm:$0x30]  ;;  %v3178_v4 = vld [vmem:[#allocation3 + $0x20] sm:$0xc] }
 0x3a8   :  { %5499 = vmatprep.subr.bf16.mxu1 %v5498_v26  ;;  %v2960_v26 = vld [vmem:[#allocation3 + $0x10] sm:$0xc0]  ;;  %v5392_v29 = vpack.c.bf16 %v4264_v21, %v4263_v20  ;;  %v4450_v20 = vld [vmem:[%s8096_s5 + $0x9d8] sm:$0xff]  ;;  %v5408_v21 = vpack.c.bf16 %v4272_v13, %v4271_v12  ;;  %v4503_v55 = vld [vmem:[%s8096_s5 + $0xb80] sm:$0xff] }
 0x3a9   :  { %v4488_v0 = vld [vmem:[%s8096_s5 + $0xb08] sm:$0xff]  ;;  %v4489_v13 = vld [vmem:[%s8096_s5 + $0xb10] sm:$0xff] }
 0x3aa   :  { %5341 = vmatpush3.bf16.msra.mxu0 %v5340_v32  ;;  %v4265_v32 = vld [vmem:[%s8096_s5 + $0x410] sm:$0xff]  ;;  %v3403_v12 = vld [vmem:[#allocation3 + $0x28] sm:$0xc0] }
 0x3ab   :  { %5501 = vmatpush3.bf16.msra.mxu1 %v5500_v33  ;;  %5343 = vmatprep.subr.bf16.mxu0 %v5342_v34  ;;  %v2443_v33 = vrot.slane %v2406_v22, 4  ;;  %v5552_v34 = vpack.c.bf16 %v4424_v25, %v4423_v24  ;;  %v5396_v48 = vpack.c.bf16 %v4266_v36, %v4265_v32  ;;  %v5568_v22 = vpack.c.bf16 %v4432_v16, %v4431_v14  ;;  %v4273_v24 = vld [vmem:[%s8096_s5 + $0x450] sm:$0xff]  ;;  %v4274_v25 = vld [vmem:[%s8096_s5 + $0x458] sm:$0xff]  ;;  %v4452_v32 = vld [vmem:[%s8096_s5 + $0x9e8] sm:$0xff] }
 0x3ac   :  { %5503 = vmatprep.subr.bf16.mxu1 %v5502_v38  ;;  %v2997_v38 = vrot.slane %v2960_v26, 6  ;;  %v4433_v26 = vld [vmem:[%s8096_s5 + $0x950] sm:$0xff]  ;;  %v4275_v36 = vld [vmem:[%s8096_s5 + $0x460] sm:$0xff]  ;;  %v4490_v14 = vld [vmem:[%s8096_s5 + $0xb18] sm:$0xff]  ;;  %v3215_v16 = vrot.slane %v3178_v4, 2 }
 0x3ae   :  { %5345 = vmatpush3.bf16.msra.mxu0 %v5344_v44  ;;  %v4443_v44 = vld [vmem:[%s8096_s5 + $0x9a0] sm:$0xff] }
 0x3af   :  { %5505 = vmatpush3.bf16.msra.mxu1 %v5504_v45  ;;  %5347 = vmatprep.subr.bf16.mxu0 %v5346_v46  ;;  %v4444_v45 = vld [vmem:[%s8096_s5 + $0x9a8] sm:$0xff]  ;;  %v2631_v46 = vld [vmem:[#allocation3 + $0x18] sm:$0x3] }
 0x3b0   :  { %5507 = vmatprep.subr.bf16.mxu1 %v5506_v50  ;;  %v5398_v50 = vpack.c.bf16 %v4284_v42, %v4283_v41  ;;  %v5558_v54 = vpack.c.bf16 %v4444_v45, %v4443_v44  ;;  %v4293_v41 = vld [vmem:[%s8096_s5 + $0x4f0] sm:$0xff]  ;;  %v4294_v42 = vld [vmem:[%s8096_s5 + $0x4f8] sm:$0xff]  ;;  %v5416_v45 = vpack.c.bf16 %v4276_v37, %v4275_v36 }
 0x3b1   :  { %v4454_v44 = vld [vmem:[%s8096_s5 + $0x9f8] sm:$0xff] }
 0x3b2   :  { %5349 = vmatpush3.bf16.msra.mxu0 %v5348_v56  ;;  %v4285_v56 = vld [vmem:[%s8096_s5 + $0x4b0] sm:$0xff]  ;;  %v4510_v36 = vld [vmem:[%s8096_s5 + $0xbb8] sm:$0xff] }
 0x3b3   :  { %5509 = vmatpush3.bf16.msra.mxu1 %v5508_v57  ;;  %5351 = vmatprep.subr.bf16.mxu0 %v5350_v58  ;;  %v4286_v57 = vld [vmem:[%s8096_s5 + $0x4b8] sm:$0xff]  ;;  %v4445_v58 = vld [vmem:[%s8096_s5 + $0x9b0] sm:$0xff] }
 0x3b4   :  { %5511 = vmatprep.subr.bf16.mxu1 %v5510_v62  ;;  %v5402_v62 = vpack.c.bf16 %v4286_v57, %v4285_v56  ;;  %v5562_v2 = vpack.c.bf16 %v4446_v59, %v4445_v58  ;;  %v4504_v56 = vld [vmem:[%s8096_s5 + $0xb88] sm:$0xff] }
 0x3b5   :  { %v5614_v63 = vpack.c.bf16 %v4504_v56, %v4503_v55  ;;  %v4496_v56 = vld [vmem:[%s8096_s5 + $0xb48] sm:$0xff] }
 0x3b6   :  { %5353 = vmatpush3.bf16.msra.mxu0 %v5352_v5  ;;  %v4287_v5 = vld [vmem:[%s8096_s5 + $0x4c0] sm:$0xff] }
 0x3b7   :  { %5513 = vmatpush3.bf16.msra.mxu1 %v5512_v6  ;;  %5355 = vmatprep.subr.bf16.mxu0 %v5354_v7  ;;  %v4288_v6 = vld [vmem:[%s8096_s5 + $0x4c8] sm:$0xff]  ;;  %v4447_v7 = vld [vmem:[%s8096_s5 + $0x9c0] sm:$0xff] }
 0x3b8   :  { %5515 = vmatprep.subr.bf16.mxu1 %v5514_v11  ;;  %v5406_v11 = vpack.c.bf16 %v4288_v6, %v4287_v5  ;;  %v5566_v15 = vpack.c.bf16 %v4448_v8, %v4447_v7  ;;  %v4505_v5 = vld [vmem:[%s8096_s5 + $0xb90] sm:$0xff]  ;;  %v4506_v6 = vld [vmem:[%s8096_s5 + $0xb98] sm:$0xff] }
 0x3b9   :  { %v2849_v8 = vld [vmem:[#allocation3 + $0x18] sm:$0x30] }
 0x3ba   :  { %5357 = vmatpush3.bf16.msra.mxu0 %v5356_v17  ;;  %v4289_v17 = vld [vmem:[%s8096_s5 + $0x4d0] sm:$0xff] }
 0x3bb   :  { %5517 = vmatpush3.bf16.msra.mxu1 %v5516_v18  ;;  %5391 = vmatprep.subr.bf16.mxu0 %v5390_v19  ;;  %v4290_v18 = vld [vmem:[%s8096_s5 + $0x4d8] sm:$0xff]  ;;  %v4449_v19 = vld [vmem:[%s8096_s5 + $0x9d0] sm:$0xff] }
 0x3bc   :  { %5551 = vmatprep.subr.bf16.mxu1 %v5550_v23  ;;  %v5410_v23 = vpack.c.bf16 %v4290_v18, %v4289_v17  ;;  %v5570_v27 = vpack.c.bf16 %v4450_v20, %v4449_v19  ;;  %v4347_v18 = vld [vmem:[%s8096_s5 + $0x6a0] sm:$0xff]  ;;  %v4348_v19 = vld [vmem:[%s8096_s5 + $0x6a8] sm:$0xff]  ;;  %v2886_v20 = vrot.slane %v2849_v8, 4 }
 0x3bd   :  { %2512 = vmatmul.mubr.f32.vlgmr.msra.gmra.mrb[8].mxu0 %v2443_v33  ;;  %v5412_v33 = vpack.c.bf16 %v4274_v25, %v4273_v24  ;;  %v3440_v24 = vrot.slane %v3403_v12, 6  ;;  %v4515_v8 = vld [vmem:[%s8096_s5 + $0xbe0] sm:$0xff] }
 0x3be   :  { %3066 = vmatmul.mubr.f32.vlgmr.msra.gmra.mrb[14].mxu1 %v2997_v38  ;;  %5393 = vmatpush3.bf16.msra.mxu0 %v5392_v29  ;;  %v4291_v29 = vld [vmem:[%s8096_s5 + $0x4e0] sm:$0xff] }
 0x3bf   :  { %2729 = vmatprep.mubr.f32.mxu0 %v2631_v46  ;;  %5553 = vmatpush3.bf16.msra.mxu1 %v5552_v34  ;;  %v5572_v34 = vpack.c.bf16 %v4434_v28, %v4433_v26  ;;  %v5414_v35 = vpack.c.bf16 %v4292_v30, %v4291_v29  ;;  %v4435_v38 = vld [vmem:[%s8096_s5 + $0x960] sm:$0xff]  ;;  %v5620_v26 = vpack.c.bf16 %v4490_v14, %v4489_v13  ;;  %v4332_v29 = vld [vmem:[%s8096_s5 + $0x628] sm:$0xff] }
 0x3c0   :  { %3283 = vmatprep.mubr.f32.mxu1 %v3216_v47  ;;  %5395 = vmatprep.subr.bf16.mxu0 %v5394_v39  ;;  %v5574_v39 = vpack.c.bf16 %v4452_v32, %v4451_v31  ;;  %v5576_v46 = vpack.c.bf16 %v4436_v40, %v4435_v38  ;;  %v5418_v47 = vpack.c.bf16 %v4294_v42, %v4293_v41  ;;  %v4331_v28 = vld [vmem:[%s8096_s5 + $0x620] sm:$0xff]  ;;  %v4492_v32 = vld [vmem:[%s8096_s5 + $0xb28] sm:$0xff]  ;;  %v4333_v40 = vld [vmem:[%s8096_s5 + $0x630] sm:$0xff] }
 0x3c1   :  { %5555 = vmatprep.subr.bf16.mxu1 %v5554_v43  ;;  %v4453_v43 = vld [vmem:[%s8096_s5 + $0x9f0] sm:$0xff]  ;;  %v4491_v30 = vld [vmem:[%s8096_s5 + $0xb20] sm:$0xff]  ;;  %v5464_v37 = vpack.c.bf16 %v4332_v29, %v4331_v28  ;;  %v4334_v41 = vld [vmem:[%s8096_s5 + $0x638] sm:$0xff] }
 0x3c2   :  { %5397 = vmatpush3.bf16.msra.mxu0 %v5396_v48  ;;  %v4277_v48 = vld [vmem:[%s8096_s5 + $0x470] sm:$0xff]  ;;  %v5578_v51 = vpack.c.bf16 %v4454_v44, %v4453_v43  ;;  %v5624_v38 = vpack.c.bf16 %v4492_v32, %v4491_v30  ;;  %v4494_v44 = vld [vmem:[%s8096_s5 + $0xb38] sm:$0xff]  ;;  %v4339_v13 = vld [vmem:[%s8096_s5 + $0x660] sm:$0xff] }
 0x3c3   :  { %5557 = vmatpush3.bf16.msra.mxu1 %v5556_v49  ;;  %5399 = vmatprep.subr.bf16.mxu0 %v5398_v50  ;;  %v4278_v49 = vld [vmem:[%s8096_s5 + $0x478] sm:$0xff]  ;;  %v4437_v50 = vld [vmem:[%s8096_s5 + $0x970] sm:$0xff]  ;;  %v4340_v14 = vld [vmem:[%s8096_s5 + $0x668] sm:$0xff] }
 0x3c4   :  { %5559 = vmatprep.subr.bf16.mxu1 %v5558_v54  ;;  %v4344_v54 = vld [vmem:[%s8096_s5 + $0x688] sm:$0xff]  ;;  %v5420_v57 = vpack.c.bf16 %v4278_v49, %v4277_v48  ;;  %v5580_v58 = vpack.c.bf16 %v4438_v52, %v4437_v50  ;;  %v4493_v42 = vld [vmem:[%s8096_s5 + $0xb30] sm:$0xff]  ;;  %v5468_v49 = vpack.c.bf16 %v4334_v41, %v4333_v40  ;;  %v4335_v52 = vld [vmem:[%s8096_s5 + $0x640] sm:$0xff] }
 0x3c5   :  { %v5454_v59 = vpack.c.bf16 %v4344_v54, %v4343_v53  ;;  %v4512_v48 = vld [vmem:[%s8096_s5 + $0xbc8] sm:$0xff]  ;;  %v5628_v50 = vpack.c.bf16 %v4494_v44, %v4493_v42  ;;  %v4495_v54 = vld [vmem:[%s8096_s5 + $0xb40] sm:$0xff]  ;;  %v4502_v29 = vld [vmem:[%s8096_s5 + $0xb78] sm:$0xff] }
 0x3c6   :  { %5401 = vmatpush3.bf16.msra.mxu0 %v5400_v60  ;;  %v4327_v60 = vld [vmem:[%s8096_s5 + $0x600] sm:$0xff]  ;;  %v4336_v53 = vld [vmem:[%s8096_s5 + $0x648] sm:$0xff]  ;;  %v4409_v44 = vld [vmem:[%s8096_s5 + $0x890] sm:$0xff] }
 0x3c7   :  { %5561 = vmatpush3.bf16.msra.mxu1 %v5560_v61  ;;  %5403 = vmatprep.subr.bf16.mxu0 %v5402_v62  ;;  %v4328_v61 = vld [vmem:[%s8096_s5 + $0x608] sm:$0xff]  ;;  %v4487_v62 = vld [vmem:[%s8096_s5 + $0xb00] sm:$0xff] }
 0x3c8   :  { %5563 = vmatprep.subr.bf16.mxu1 %v5562_v2  ;;  %v4346_v2 = vld [vmem:[%s8096_s5 + $0x698] sm:$0xff]  ;;  %v5456_v7 = vpack.c.bf16 %v4328_v61, %v4327_v60  ;;  %v5472_v61 = vpack.c.bf16 %v4336_v53, %v4335_v52  ;;  %v4407_v30 = vld [vmem:[%s8096_s5 + $0x880] sm:$0xff]  ;;  %v4552_v42 = vld [vmem:[%s8096_s5 + $0xd08] sm:$0xff] }
 0x3c9   :  { %v5458_v17 = vpack.c.bf16 %v4346_v2, %v4345_v1  ;;  %v4514_v60 = vld [vmem:[%s8096_s5 + $0xbd8] sm:$0xff]  ;;  %v4497_v2 = vld [vmem:[%s8096_s5 + $0xb50] sm:$0xff]  ;;  %v4567_v32 = vld [vmem:[%s8096_s5 + $0xd80] sm:$0xff] }
 0x3ca   :  { %5405 = vmatpush3.bf16.msra.mxu0 %v5404_v9  ;;  %v4329_v9 = vld [vmem:[%s8096_s5 + $0x610] sm:$0xff]  ;;  %v4338_v1 = vld [vmem:[%s8096_s5 + $0x658] sm:$0xff]  ;;  %v4551_v41 = vld [vmem:[%s8096_s5 + $0xd00] sm:$0xff] }
 0x3cb   :  { %5565 = vmatpush3.bf16.msra.mxu1 %v5564_v10  ;;  %5407 = vmatprep.subr.bf16.mxu0 %v5406_v11  ;;  %v4330_v10 = vld [vmem:[%s8096_s5 + $0x618] sm:$0xff]  ;;  %v5616_v11 = vpack.c.bf16 %v4488_v0, %v4487_v62  ;;  %v5632_v62 = vpack.c.bf16 %v4496_v56, %v4495_v54  ;;  %v4337_v0 = vld [vmem:[%s8096_s5 + $0x650] sm:$0xff] }
 0x3cc   :  { %5567 = vmatprep.subr.bf16.mxu1 %v5566_v15  ;;  %v2630_v15 = vld [vmem:[#allocation3 + $0x10] sm:$0x3]  ;;  %v5460_v25 = vpack.c.bf16 %v4330_v10, %v4329_v9  ;;  %v4516_v9 = vld [vmem:[%s8096_s5 + $0xbe8] sm:$0xff]  ;;  %v5476_v10 = vpack.c.bf16 %v4338_v1, %v4337_v0  ;;  %v4394_v53 = vld [vmem:[%s8096_s5 + $0x818] sm:$0xff] }
 0x3cd   :  { %v4393_v52 = vld [vmem:[%s8096_s5 + $0x810] sm:$0xff] }
 0x3ce   :  { %5409 = vmatpush3.bf16.msra.mxu0 %v5408_v21  ;;  %v5618_v21 = vpack.c.bf16 %v4506_v6, %v4505_v5  ;;  %v4498_v5 = vld [vmem:[%s8096_s5 + $0xb58] sm:$0xff]  ;;  %v4355_v6 = vld [vmem:[%s8096_s5 + $0x6e0] sm:$0xff]  ;;  %v4553_v54 = vld [vmem:[%s8096_s5 + $0xd10] sm:$0xff]  ;;  %v5524_v1 = vpack.c.bf16 %v4394_v53, %v4393_v52 }
 0x3cf   :  { %5569 = vmatpush3.bf16.msra.mxu1 %v5568_v22  ;;  %5411 = vmatprep.subr.bf16.mxu0 %v5410_v23  ;;  %v4507_v22 = vld [vmem:[%s8096_s5 + $0xba0] sm:$0xff]  ;;  %v4508_v23 = vld [vmem:[%s8096_s5 + $0xba8] sm:$0xff] }
 0x3d0   :  { %5571 = vmatprep.subr.bf16.mxu1 %v5570_v27  ;;  %v5462_v27 = vpack.c.bf16 %v4348_v19, %v4347_v18  ;;  %v5622_v31 = vpack.c.bf16 %v4508_v23, %v4507_v22  ;;  %v4357_v18 = vld [vmem:[%s8096_s5 + $0x6f0] sm:$0xff]  ;;  %v4358_v19 = vld [vmem:[%s8096_s5 + $0x6f8] sm:$0xff]  ;;  %v5480_v22 = vpack.c.bf16 %v4340_v14, %v4339_v13  ;;  %v4403_v53 = vld [vmem:[%s8096_s5 + $0x860] sm:$0xff] }
 0x3d1   :  { %v4574_v13 = vld [vmem:[%s8096_s5 + $0xdb8] sm:$0xff] }
 0x3d2   :  { %5413 = vmatpush3.bf16.msra.mxu0 %v5412_v33  ;;  %v4349_v33 = vld [vmem:[%s8096_s5 + $0x6b0] sm:$0xff] }
 0x3d3   :  { %5573 = vmatpush3.bf16.msra.mxu1 %v5572_v34  ;;  %5415 = vmatprep.subr.bf16.mxu0 %v5414_v35  ;;  %v4350_v34 = vld [vmem:[%s8096_s5 + $0x6b8] sm:$0xff]  ;;  %v4509_v35 = vld [vmem:[%s8096_s5 + $0xbb0] sm:$0xff] }
 0x3d4   :  { %5575 = vmatprep.subr.bf16.mxu1 %v5574_v39  ;;  %v5466_v39 = vpack.c.bf16 %v4350_v34, %v4349_v33  ;;  %v5626_v43 = vpack.c.bf16 %v4510_v36, %v4509_v35  ;;  %v4568_v33 = vld [vmem:[%s8096_s5 + $0xd88] sm:$0xff] }
 0x3d5   :  { %v5678_v40 = vpack.c.bf16 %v4568_v33, %v4567_v32  ;;  %v4560_v33 = vld [vmem:[%s8096_s5 + $0xd48] sm:$0xff] }
 0x3d6   :  { %5417 = vmatpush3.bf16.msra.mxu0 %v5416_v45  ;;  %v4351_v45 = vld [vmem:[%s8096_s5 + $0x6c0] sm:$0xff] }
 0x3d7   :  { %5577 = vmatpush3.bf16.msra.mxu1 %v5576_v46  ;;  %5419 = vmatprep.subr.bf16.mxu0 %v5418_v47  ;;  %v4352_v46 = vld [vmem:[%s8096_s5 + $0x6c8] sm:$0xff]  ;;  %v4511_v47 = vld [vmem:[%s8096_s5 + $0xbc0] sm:$0xff] }
 0x3d8   :  { %5579 = vmatprep.subr.bf16.mxu1 %v5578_v51  ;;  %v5470_v51 = vpack.c.bf16 %v4352_v46, %v4351_v45  ;;  %v5630_v55 = vpack.c.bf16 %v4512_v48, %v4511_v47  ;;  %v4410_v45 = vld [vmem:[%s8096_s5 + $0x898] sm:$0xff]  ;;  %v4569_v48 = vld [vmem:[%s8096_s5 + $0xd90] sm:$0xff] }
 0x3d9   :  { %v3621_v47 = vld [vmem:[#allocation3 + $0x38] sm:$0xc]  ;;  %v5522_v56 = vpack.c.bf16 %v4410_v45, %v4409_v44 }
 0x3da   :  { %5421 = vmatpush3.bf16.msra.mxu0 %v5420_v57  ;;  %v4353_v57 = vld [vmem:[%s8096_s5 + $0x6d0] sm:$0xff]  ;;  %v3658_v0 = vrot.slane %v3621_v47, 2  ;;  %v4562_v45 = vld [vmem:[%s8096_s5 + $0xd58] sm:$0xff]  ;;  %v4420_v47 = vld [vmem:[%s8096_s5 + $0x8e8] sm:$0xff] }
 0x3db   :  { %5581 = vmatpush3.bf16.msra.mxu1 %v5580_v58  ;;  %5455 = vmatprep.subr.bf16.mxu0 %v5454_v59  ;;  %v4354_v58 = vld [vmem:[%s8096_s5 + $0x6d8] sm:$0xff]  ;;  %v4513_v59 = vld [vmem:[%s8096_s5 + $0xbd0] sm:$0xff] }
 0x3dc   :  { %5615 = vmatprep.subr.bf16.mxu1 %v5614_v63  ;;  %v5474_v63 = vpack.c.bf16 %v4354_v58, %v4353_v57  ;;  %v5634_v4 = vpack.c.bf16 %v4514_v60, %v4513_v59  ;;  %v4554_v57 = vld [vmem:[%s8096_s5 + $0xd18] sm:$0xff]  ;;  %v4411_v58 = vld [vmem:[%s8096_s5 + $0x8a0] sm:$0xff]  ;;  %v4412_v59 = vld [vmem:[%s8096_s5 + $0x8a8] sm:$0xff] }
 0x3dd   :  { %2730 = vmatmul.mubr.f32.vlgmr.msra.gmra.mrb[10].mxu0 %v2630_v15  ;;  %v4499_v15 = vld [vmem:[%s8096_s5 + $0xb60] sm:$0xff] }
 0x3de   :  { %3284 = vmatmul.mubr.f32.vlgmr.msra.gmra.mrb[16].mxu1 %v3215_v16  ;;  %5457 = vmatpush3.bf16.msra.mxu0 %v5456_v7  ;;  %v4356_v7 = vld [vmem:[%s8096_s5 + $0x6e8] sm:$0xff]  ;;  %v5638_v16 = vpack.c.bf16 %v4516_v9, %v4515_v8 }
 0x3df   :  { %2953 = vmatprep.mubr.f32.mxu0 %v2886_v20  ;;  %5617 = vmatpush3.bf16.msra.mxu1 %v5616_v11  ;;  %v5636_v11 = vpack.c.bf16 %v4498_v5, %v4497_v2  ;;  %v5478_v12 = vpack.c.bf16 %v4356_v7, %v4355_v6  ;;  %v4517_v20 = vld [vmem:[%s8096_s5 + $0xbf0] sm:$0xff]  ;;  %v5684_v2 = vpack.c.bf16 %v4554_v57, %v4553_v54  ;;  %v4395_v5 = vld [vmem:[%s8096_s5 + $0x820] sm:$0xff]  ;;  %v4396_v6 = vld [vmem:[%s8096_s5 + $0x828] sm:$0xff] }
 0x3e0   :  { %3507 = vmatprep.mubr.f32.mxu1 %v3440_v24  ;;  %5459 = vmatprep.subr.bf16.mxu0 %v5458_v17  ;;  %v4500_v17 = vld [vmem:[%s8096_s5 + $0xb68] sm:$0xff]  ;;  %v5482_v24 = vpack.c.bf16 %v4358_v19, %v4357_v18  ;;  %v4555_v7 = vld [vmem:[%s8096_s5 + $0xd20] sm:$0xff]  ;;  %v5528_v14 = vpack.c.bf16 %v4396_v6, %v4395_v5  ;;  %v4398_v18 = vld [vmem:[%s8096_s5 + $0x838] sm:$0xff] }
 0x3e1   :  { %5619 = vmatprep.subr.bf16.mxu1 %v5618_v21  ;;  %v4518_v21 = vld [vmem:[%s8096_s5 + $0xbf8] sm:$0xff]  ;;  %v5640_v23 = vpack.c.bf16 %v4500_v17, %v4499_v15  ;;  %v4556_v9 = vld [vmem:[%s8096_s5 + $0xd28] sm:$0xff]  ;;  %v4397_v17 = vld [vmem:[%s8096_s5 + $0x830] sm:$0xff] }
 0x3e2   :  { %5461 = vmatpush3.bf16.msra.mxu0 %v5460_v25  ;;  %v4341_v25 = vld [vmem:[%s8096_s5 + $0x670] sm:$0xff]  ;;  %v5642_v28 = vpack.c.bf16 %v4518_v21, %v4517_v20  ;;  %v5688_v15 = vpack.c.bf16 %v4556_v9, %v4555_v7  ;;  %v4558_v21 = vld [vmem:[%s8096_s5 + $0xd38] sm:$0xff]  ;;  %v4404_v54 = vld [vmem:[%s8096_s5 + $0x868] sm:$0xff] }
 0x3e3   :  { %5621 = vmatpush3.bf16.msra.mxu1 %v5620_v26  ;;  %5463 = vmatprep.subr.bf16.mxu0 %v5462_v27  ;;  %v4342_v26 = vld [vmem:[%s8096_s5 + $0x678] sm:$0xff]  ;;  %v4501_v27 = vld [vmem:[%s8096_s5 + $0xb70] sm:$0xff]  ;;  %v4564_v57 = vld [vmem:[%s8096_s5 + $0xd68] sm:$0xff] }
 0x3e4   :  { %5623 = vmatprep.subr.bf16.mxu1 %v5622_v31  ;;  %v4408_v31 = vld [vmem:[%s8096_s5 + $0x888] sm:$0xff]  ;;  %v5484_v34 = vpack.c.bf16 %v4342_v26, %v4341_v25  ;;  %v5644_v35 = vpack.c.bf16 %v4502_v29, %v4501_v27  ;;  %v4557_v19 = vld [vmem:[%s8096_s5 + $0xd30] sm:$0xff]  ;;  %v5532_v26 = vpack.c.bf16 %v4398_v18, %v4397_v17  ;;  %v4399_v29 = vld [vmem:[%s8096_s5 + $0x840] sm:$0xff] }
 0x3e5   :  { %v5518_v36 = vpack.c.bf16 %v4408_v31, %v4407_v30  ;;  %v4576_v25 = vld [vmem:[%s8096_s5 + $0xdc8] sm:$0xff]  ;;  %v5692_v27 = vpack.c.bf16 %v4558_v21, %v4557_v19  ;;  %v4559_v31 = vld [vmem:[%s8096_s5 + $0xd40] sm:$0xff]  ;;  %v4566_v6 = vld [vmem:[%s8096_s5 + $0xd78] sm:$0xff] }
 0x3e6   :  { %5465 = vmatpush3.bf16.msra.mxu0 %v5464_v37  ;;  %v4391_v37 = vld [vmem:[%s8096_s5 + $0x800] sm:$0xff]  ;;  %v4400_v30 = vld [vmem:[%s8096_s5 + $0x848] sm:$0xff]  ;;  %v4473_v21 = vld [vmem:[%s8096_s5 + $0xa90] sm:$0xff] }
 0x3e7   :  { %5625 = vmatpush3.bf16.msra.mxu1 %v5624_v38  ;;  %5467 = vmatprep.subr.bf16.mxu0 %v5466_v39  ;;  %v4392_v38 = vld [vmem:[%s8096_s5 + $0x808] sm:$0xff]  ;;  %v2848_v39 = vld [vmem:[#allocation3 + $0x10] sm:$0x30]  ;;  %v4471_v7 = vld [vmem:[%s8096_s5 + $0xa80] sm:$0xff] }
 0x3e8   :  { %5627 = vmatprep.subr.bf16.mxu1 %v5626_v43  ;;  %v3402_v43 = vld [vmem:[#allocation3 + $0x20] sm:$0xc0]  ;;  %v5520_v46 = vpack.c.bf16 %v4392_v38, %v4391_v37  ;;  %v4578_v37 = vld [vmem:[%s8096_s5 + $0xdd8] sm:$0xff]  ;;  %v5536_v38 = vpack.c.bf16 %v4400_v30, %v4399_v29  ;;  %v4616_v19 = vld [vmem:[%s8096_s5 + $0xf08] sm:$0xff] }
 0x3e9   :  { %v4631_v9 = vld [vmem:[%s8096_s5 + $0xf80] sm:$0xff]  ;;  %v4457_v29 = vld [vmem:[%s8096_s5 + $0xa10] sm:$0xff]  ;;  %v4458_v30 = vld [vmem:[%s8096_s5 + $0xa18] sm:$0xff] }
 0x3ea   :  { %5469 = vmatpush3.bf16.msra.mxu0 %v5468_v49  ;;  %v4570_v49 = vld [vmem:[%s8096_s5 + $0xd98] sm:$0xff]  ;;  %v4615_v18 = vld [vmem:[%s8096_s5 + $0xf00] sm:$0xff] }
 0x3eb   :  { %5629 = vmatpush3.bf16.msra.mxu1 %v5628_v50  ;;  %5471 = vmatprep.subr.bf16.mxu0 %v5470_v51  ;;  %v2885_v50 = vrot.slane %v2848_v39, 4  ;;  %v5680_v51 = vpack.c.bf16 %v4552_v42, %v4551_v41  ;;  %v5682_v60 = vpack.c.bf16 %v4570_v49, %v4569_v48  ;;  %v5696_v39 = vpack.c.bf16 %v4560_v33, %v4559_v31  ;;  %v4401_v41 = vld [vmem:[%s8096_s5 + $0x850] sm:$0xff]  ;;  %v4402_v42 = vld [vmem:[%s8096_s5 + $0x858] sm:$0xff]  ;;  %v4579_v48 = vld [vmem:[%s8096_s5 + $0xde0] sm:$0xff] }
 0x3ec   :  { %5631 = vmatprep.subr.bf16.mxu1 %v5630_v55  ;;  %v3439_v55 = vrot.slane %v3402_v43, 6  ;;  %v4561_v43 = vld [vmem:[%s8096_s5 + $0xd50] sm:$0xff]  ;;  %v4580_v49 = vld [vmem:[%s8096_s5 + $0xde8] sm:$0xff] }
 0x3ed   :  { %v4617_v31 = vld [vmem:[%s8096_s5 + $0xf10] sm:$0xff] }
 0x3ee   :  { %5473 = vmatpush3.bf16.msra.mxu0 %v5472_v61  ;;  %v4571_v61 = vld [vmem:[%s8096_s5 + $0xda0] sm:$0xff] }
 0x3ef   :  { %5633 = vmatpush3.bf16.msra.mxu1 %v5632_v62  ;;  %5475 = vmatprep.subr.bf16.mxu0 %v5474_v63  ;;  %v4572_v62 = vld [vmem:[%s8096_s5 + $0xda8] sm:$0xff] }
 0x3f0   :  { %5635 = vmatprep.subr.bf16.mxu1 %v5634_v4  ;;  %v3073_v63 = vld [vmem:[#allocation3 + $0x28] sm:$0x3]  ;;  %v5526_v4 = vpack.c.bf16 %v4412_v59, %v4411_v58  ;;  %v5686_v8 = vpack.c.bf16 %v4572_v62, %v4571_v61  ;;  %v4421_v58 = vld [vmem:[%s8096_s5 + $0x8f0] sm:$0xff]  ;;  %v4422_v59 = vld [vmem:[%s8096_s5 + $0x8f8] sm:$0xff]  ;;  %v5544_v62 = vpack.c.bf16 %v4404_v54, %v4403_v53 }
 0x3f1   :  { %v4582_v61 = vld [vmem:[%s8096_s5 + $0xdf8] sm:$0xff] }
 0x3f2   :  { %5477 = vmatpush3.bf16.msra.mxu0 %v5476_v10  ;;  %v4413_v10 = vld [vmem:[%s8096_s5 + $0x8b0] sm:$0xff]  ;;  %v4638_v53 = vld [vmem:[%s8096_s5 + $0xfb8] sm:$0xff] }
 0x3f3   :  { %5637 = vmatpush3.bf16.msra.mxu1 %v5636_v11  ;;  %5479 = vmatprep.subr.bf16.mxu0 %v5478_v12  ;;  %v4414_v11 = vld [vmem:[%s8096_s5 + $0x8b8] sm:$0xff]  ;;  %v4573_v12 = vld [vmem:[%s8096_s5 + $0xdb0] sm:$0xff] }
 0x3f4   :  { %5639 = vmatprep.subr.bf16.mxu1 %v5638_v16  ;;  %v5530_v16 = vpack.c.bf16 %v4414_v11, %v4413_v10  ;;  %v5690_v20 = vpack.c.bf16 %v4574_v13, %v4573_v12  ;;  %v4632_v10 = vld [vmem:[%s8096_s5 + $0xf88] sm:$0xff] }
 0x3f5   :  { %v5742_v17 = vpack.c.bf16 %v4632_v10, %v4631_v9  ;;  %v4624_v10 = vld [vmem:[%s8096_s5 + $0xf48] sm:$0xff] }
 0x3f6   :  { %5481 = vmatpush3.bf16.msra.mxu0 %v5480_v22  ;;  %v4415_v22 = vld [vmem:[%s8096_s5 + $0x8c0] sm:$0xff] }
 0x3f7   :  { %5641 = vmatpush3.bf16.msra.mxu1 %v5640_v23  ;;  %5483 = vmatprep.subr.bf16.mxu0 %v5482_v24  ;;  %v4416_v23 = vld [vmem:[%s8096_s5 + $0x8c8] sm:$0xff]  ;;  %v4575_v24 = vld [vmem:[%s8096_s5 + $0xdc0] sm:$0xff] }
 0x3f8   :  { %5643 = vmatprep.subr.bf16.mxu1 %v5642_v28  ;;  %v5534_v28 = vpack.c.bf16 %v4416_v23, %v4415_v22  ;;  %v5694_v32 = vpack.c.bf16 %v4576_v25, %v4575_v24  ;;  %v4474_v22 = vld [vmem:[%s8096_s5 + $0xa98] sm:$0xff]  ;;  %v3072_v23 = vld [vmem:[#allocation3 + $0x20] sm:$0x3] }
 0x3f9   :  { %v3845_v25 = vld [vmem:[#allocation3 + $0x38] sm:$0xc0]  ;;  %v5586_v33 = vpack.c.bf16 %v4474_v22, %v4473_v21 }
 0x3fa   :  { %5485 = vmatpush3.bf16.msra.mxu0 %v5484_v34  ;;  %v4417_v34 = vld [vmem:[%s8096_s5 + $0x8d0] sm:$0xff]  ;;  %v4626_v22 = vld [vmem:[%s8096_s5 + $0xf58] sm:$0xff] }
 0x3fb   :  { %5645 = vmatpush3.bf16.msra.mxu1 %v5644_v35  ;;  %5519 = vmatprep.subr.bf16.mxu0 %v5518_v36  ;;  %v4418_v35 = vld [vmem:[%s8096_s5 + $0x8d8] sm:$0xff]  ;;  %v4577_v36 = vld [vmem:[%s8096_s5 + $0xdd0] sm:$0xff] }
 0x3fc   :  { %5679 = vmatprep.subr.bf16.mxu1 %v5678_v40  ;;  %v5538_v40 = vpack.c.bf16 %v4418_v35, %v4417_v34  ;;  %v5698_v44 = vpack.c.bf16 %v4578_v37, %v4577_v36  ;;  %v4618_v34 = vld [vmem:[%s8096_s5 + $0xf18] sm:$0xff]  ;;  %v4475_v35 = vld [vmem:[%s8096_s5 + $0xaa0] sm:$0xff]  ;;  %v4476_v36 = vld [vmem:[%s8096_s5 + $0xaa8] sm:$0xff] }
 0x3fd   :  { %2954 = vmatmul.mubr.f32.vlgmr.msra.gmra.mrb[12].mxu0 %v2885_v50  ;;  %v5540_v50 = vpack.c.bf16 %v4402_v42, %v4401_v41  ;;  %v3882_v41 = vrot.slane %v3845_v25, 6  ;;  %v5588_v42 = vpack.c.bf16 %v4458_v30, %v4457_v29  ;;  %v4643_v25 = vld [vmem:[%s8096_s5 + $0xfe0] sm:$0xff] }
 0x3fe   :  { %3508 = vmatmul.mubr.f32.vlgmr.msra.gmra.mrb[18].mxu1 %v3439_v55  ;;  %5521 = vmatpush3.bf16.msra.mxu0 %v5520_v46  ;;  %v4419_v46 = vld [vmem:[%s8096_s5 + $0x8e0] sm:$0xff] }
 0x3ff   :  { %3171 = vmatprep.mubr.f32.mxu0 %v3073_v63  ;;  %5681 = vmatpush3.bf16.msra.mxu1 %v5680_v51  ;;  %v5700_v51 = vpack.c.bf16 %v4562_v45, %v4561_v43  ;;  %v5542_v52 = vpack.c.bf16 %v4420_v47, %v4419_v46  ;;  %v4563_v55 = vld [vmem:[%s8096_s5 + $0xd60] sm:$0xff]  ;;  %v5748_v43 = vpack.c.bf16 %v4618_v34, %v4617_v31  ;;  %v4460_v46 = vld [vmem:[%s8096_s5 + $0xa28] sm:$0xff] }
 0x400   :  { %3725 = vmatprep.mubr.f32.mxu1 %v3658_v0  ;;  %5523 = vmatprep.subr.bf16.mxu0 %v5522_v56  ;;  %v5702_v56 = vpack.c.bf16 %v4580_v49, %v4579_v48  ;;  %v5704_v63 = vpack.c.bf16 %v4564_v57, %v4563_v55  ;;  %v5546_v0 = vpack.c.bf16 %v4422_v59, %v4421_v58  ;;  %v4459_v45 = vld [vmem:[%s8096_s5 + $0xa20] sm:$0xff]  ;;  %v4620_v49 = vld [vmem:[%s8096_s5 + $0xf28] sm:$0xff]  ;;  %v4461_v57 = vld [vmem:[%s8096_s5 + $0xa30] sm:$0xff] }
 0x401   :  { %5683 = vmatprep.subr.bf16.mxu1 %v5682_v60  ;;  %v4581_v60 = vld [vmem:[%s8096_s5 + $0xdf0] sm:$0xff]  ;;  %v4619_v47 = vld [vmem:[%s8096_s5 + $0xf20] sm:$0xff]  ;;  %v5592_v54 = vpack.c.bf16 %v4460_v46, %v4459_v45  ;;  %v4462_v58 = vld [vmem:[%s8096_s5 + $0xa38] sm:$0xff] }
 0x402   :  { %5525 = vmatpush3.bf16.msra.mxu0 %v5524_v1  ;;  %v4405_v1 = vld [vmem:[%s8096_s5 + $0x870] sm:$0xff]  ;;  %v5706_v5 = vpack.c.bf16 %v4582_v61, %v4581_v60  ;;  %v5752_v55 = vpack.c.bf16 %v4620_v49, %v4619_v47  ;;  %v4622_v61 = vld [vmem:[%s8096_s5 + $0xf38] sm:$0xff]  ;;  %v4467_v30 = vld [vmem:[%s8096_s5 + $0xa60] sm:$0xff] }
 0x403   :  { %5685 = vmatpush3.bf16.msra.mxu1 %v5684_v2  ;;  %5527 = vmatprep.subr.bf16.mxu0 %v5526_v4  ;;  %v4406_v2 = vld [vmem:[%s8096_s5 + $0x878] sm:$0xff]  ;;  %v4565_v4 = vld [vmem:[%s8096_s5 + $0xd70] sm:$0xff]  ;;  %v4468_v31 = vld [vmem:[%s8096_s5 + $0xa68] sm:$0xff] }
 0x404   :  { %5687 = vmatprep.subr.bf16.mxu1 %v5686_v8  ;;  %v4472_v8 = vld [vmem:[%s8096_s5 + $0xa88] sm:$0xff]  ;;  %v5548_v11 = vpack.c.bf16 %v4406_v2, %v4405_v1  ;;  %v5708_v12 = vpack.c.bf16 %v4566_v6, %v4565_v4  ;;  %v4621_v59 = vld [vmem:[%s8096_s5 + $0xf30] sm:$0xff]  ;;  %v5596_v2 = vpack.c.bf16 %v4462_v58, %v4461_v57  ;;  %v4463_v6 = vld [vmem:[%s8096_s5 + $0xa40] sm:$0xff] }
 0x405   :  { %v5582_v13 = vpack.c.bf16 %v4472_v8, %v4471_v7  ;;  %v4640_v1 = vld [vmem:[%s8096_s5 + $0xfc8] sm:$0xff]  ;;  %v5756_v4 = vpack.c.bf16 %v4622_v61, %v4621_v59  ;;  %v4623_v8 = vld [vmem:[%s8096_s5 + $0xf40] sm:$0xff]  ;;  %v4630_v46 = vld [vmem:[%s8096_s5 + $0xf78] sm:$0xff] }
 0x406   :  { %5529 = vmatpush3.bf16.msra.mxu0 %v5528_v14  ;;  %v4455_v14 = vld [vmem:[%s8096_s5 + $0xa00] sm:$0xff]  ;;  %v4464_v7 = vld [vmem:[%s8096_s5 + $0xa48] sm:$0xff]  ;;  %v3844_v57 = vld [vmem:[#allocation3 + $0x30] sm:$0xc0] }
 0x407   :  { %5689 = vmatpush3.bf16.msra.mxu1 %v5688_v15  ;;  %5531 = vmatprep.subr.bf16.mxu0 %v5530_v16  ;;  %v4456_v15 = vld [vmem:[%s8096_s5 + $0xa08] sm:$0xff]  ;;  %v3620_v16 = vld [vmem:[#allocation3 + $0x30] sm:$0xc]  ;;  %v4535_v47 = vld [vmem:[%s8096_s5 + $0xc80] sm:$0xff] }
 0x408   :  { %5691 = vmatprep.subr.bf16.mxu1 %v5690_v20  ;;  %v3291_v20 = vld [vmem:[#allocation3 + $0x28] sm:$0x30]  ;;  %v5584_v24 = vpack.c.bf16 %v4456_v15, %v4455_v14  ;;  %v4642_v14 = vld [vmem:[%s8096_s5 + $0xfd8] sm:$0xff]  ;;  %v5600_v15 = vpack.c.bf16 %v4464_v7, %v4463_v6  ;;  %v4521_v61 = vld [vmem:[%s8096_s5 + $0xc10] sm:$0xff] }
 0x409   :  { %v3328_v37 = vrot.slane %v3291_v20, 4  ;;  %v4625_v20 = vld [vmem:[%s8096_s5 + $0xf50] sm:$0xff]  ;;  %v4628_v34 = vld [vmem:[%s8096_s5 + $0xf68] sm:$0xff]  ;;  %v4523_v6 = vld [vmem:[%s8096_s5 + $0xc20] sm:$0xff] }
 0x40a   :  { %5533 = vmatpush3.bf16.msra.mxu0 %v5532_v26  ;;  %v4633_v26 = vld [vmem:[%s8096_s5 + $0xf90] sm:$0xff]  ;;  %v4524_v7 = vld [vmem:[%s8096_s5 + $0xc28] sm:$0xff] }
 0x40b   :  { %5693 = vmatpush3.bf16.msra.mxu1 %v5692_v27  ;;  %5535 = vmatprep.subr.bf16.mxu0 %v5534_v28  ;;  %v4634_v27 = vld [vmem:[%s8096_s5 + $0xf98] sm:$0xff]  ;;  %v5744_v28 = vpack.c.bf16 %v4616_v19, %v4615_v18  ;;  %v4465_v18 = vld [vmem:[%s8096_s5 + $0xa50] sm:$0xff] }
 0x40c   :  { %5695 = vmatprep.subr.bf16.mxu1 %v5694_v32  ;;  %v3657_v32 = vrot.slane %v3620_v16, 2  ;;  %v5760_v16 = vpack.c.bf16 %v4624_v10, %v4623_v8  ;;  %v4466_v19 = vld [vmem:[%s8096_s5 + $0xa58] sm:$0xff]  ;;  %v4541_v8 = vld [vmem:[%s8096_s5 + $0xcb0] sm:$0xff]  ;;  %v5656_v10 = vpack.c.bf16 %v4524_v7, %v4523_v6 }
 0x40d   :  { %v4589_v6 = vld [vmem:[%s8096_s5 + $0xe30] sm:$0xff]  ;;  %v4590_v7 = vld [vmem:[%s8096_s5 + $0xe38] sm:$0xff] }
 0x40e   :  { %5537 = vmatpush3.bf16.msra.mxu0 %v5536_v38  ;;  %v5746_v38 = vpack.c.bf16 %v4634_v27, %v4633_v26  ;;  %v4644_v26 = vld [vmem:[%s8096_s5 + $0xfe8] sm:$0xff]  ;;  %v5604_v27 = vpack.c.bf16 %v4466_v19, %v4465_v18  ;;  %v4527_v18 = vld [vmem:[%s8096_s5 + $0xc40] sm:$0xff] }
 0x40f   :  { %5697 = vmatpush3.bf16.msra.mxu1 %v5696_v39  ;;  %5539 = vmatprep.subr.bf16.mxu0 %v5538_v40  ;;  %v4635_v39 = vld [vmem:[%s8096_s5 + $0xfa0] sm:$0xff]  ;;  %v4636_v40 = vld [vmem:[%s8096_s5 + $0xfa8] sm:$0xff] }
 0x410   :  { %5699 = vmatprep.subr.bf16.mxu1 %v5698_v44  ;;  %v5590_v44 = vpack.c.bf16 %v4476_v36, %v4475_v35  ;;  %v5750_v48 = vpack.c.bf16 %v4636_v40, %v4635_v39  ;;  %v4485_v35 = vld [vmem:[%s8096_s5 + $0xaf0] sm:$0xff]  ;;  %v4486_v36 = vld [vmem:[%s8096_s5 + $0xaf8] sm:$0xff]  ;;  %v5608_v39 = vpack.c.bf16 %v4468_v31, %v4467_v30  ;;  %v4528_v19 = vld [vmem:[%s8096_s5 + $0xc48] sm:$0xff] }
 0x411   :  { %v4531_v30 = vld [vmem:[%s8096_s5 + $0xc60] sm:$0xff]  ;;  %v4532_v31 = vld [vmem:[%s8096_s5 + $0xc68] sm:$0xff] }
 0x412   :  { %5541 = vmatpush3.bf16.msra.mxu0 %v5540_v50  ;;  %v4477_v50 = vld [vmem:[%s8096_s5 + $0xab0] sm:$0xff] }
 0x413   :  { %5701 = vmatpush3.bf16.msra.mxu1 %v5700_v51  ;;  %5543 = vmatprep.subr.bf16.mxu0 %v5542_v52  ;;  %v4478_v51 = vld [vmem:[%s8096_s5 + $0xab8] sm:$0xff]  ;;  %v4637_v52 = vld [vmem:[%s8096_s5 + $0xfb0] sm:$0xff] }
 0x414   :  { %5703 = vmatprep.subr.bf16.mxu1 %v5702_v56  ;;  %v5594_v56 = vpack.c.bf16 %v4478_v51, %v4477_v50  ;;  %v5754_v60 = vpack.c.bf16 %v4638_v53, %v4637_v52  ;;  %v4519_v52 = vld [vmem:[%s8096_s5 + $0xc00] sm:$0xff]  ;;  %v4520_v53 = vld [vmem:[%s8096_s5 + $0xc08] sm:$0xff] }
 0x415   :  { %v5648_v58 = vpack.c.bf16 %v4520_v53, %v4519_v52  ;;  %v3733_v52 = vld [vmem:[#allocation3 + $0x38] sm:$0x30] }
 0x416   :  { %5545 = vmatpush3.bf16.msra.mxu0 %v5544_v62  ;;  %v4479_v62 = vld [vmem:[%s8096_s5 + $0xac0] sm:$0xff] }
 0x417   :  { %5705 = vmatpush3.bf16.msra.mxu1 %v5704_v63  ;;  %5547 = vmatprep.subr.bf16.mxu0 %v5546_v0  ;;  %v4480_v63 = vld [vmem:[%s8096_s5 + $0xac8] sm:$0xff]  ;;  %v4639_v0 = vld [vmem:[%s8096_s5 + $0xfc0] sm:$0xff] }
 0x418   :  { %5707 = vmatprep.subr.bf16.mxu1 %v5706_v5  ;;  %v5598_v5 = vpack.c.bf16 %v4480_v63, %v4479_v62  ;;  %v5758_v9 = vpack.c.bf16 %v4640_v1, %v4639_v0  ;;  %v4522_v62 = vld [vmem:[%s8096_s5 + $0xc18] sm:$0xff]  ;;  %v3881_v63 = vrot.slane %v3844_v57, 6  ;;  %v4539_v0 = vld [vmem:[%s8096_s5 + $0xca0] sm:$0xff]  ;;  %v4540_v1 = vld [vmem:[%s8096_s5 + $0xca8] sm:$0xff] }
 0x419   :  { %v3514_v57 = vld [vmem:[#allocation3 + $0x30] sm:$0x3] }
 0x41a   :  { %5549 = vmatpush3.bf16.msra.mxu0 %v5548_v11  ;;  %v4481_v11 = vld [vmem:[%s8096_s5 + $0xad0] sm:$0xff] }
 0x41b   :  { %5709 = vmatpush3.bf16.msra.mxu1 %v5708_v12  ;;  %5583 = vmatprep.subr.bf16.mxu0 %v5582_v13  ;;  %v4482_v12 = vld [vmem:[%s8096_s5 + $0xad8] sm:$0xff]  ;;  %v4641_v13 = vld [vmem:[%s8096_s5 + $0xfd0] sm:$0xff] }
 0x41c   :  { %5743 = vmatprep.subr.bf16.mxu1 %v5742_v17  ;;  %v5602_v17 = vpack.c.bf16 %v4482_v12, %v4481_v11  ;;  %v5762_v21 = vpack.c.bf16 %v4642_v14, %v4641_v13  ;;  %v4525_v12 = vld [vmem:[%s8096_s5 + $0xc30] sm:$0xff]  ;;  %v4526_v13 = vld [vmem:[%s8096_s5 + $0xc38] sm:$0xff]  ;;  %v4543_v14 = vld [vmem:[%s8096_s5 + $0xcc0] sm:$0xff] }
 0x41d   :  { %3172 = vmatmul.mubr.f32.vlgmr.msra.gmra.mrb[14].mxu0 %v3072_v23  ;;  %v4483_v23 = vld [vmem:[%s8096_s5 + $0xae0] sm:$0xff] }
 0x41e   :  { %3726 = vmatmul.mubr.f32.vlgmr.msra.gmra.mrb[20].mxu1 %v3657_v32  ;;  %5585 = vmatpush3.bf16.msra.mxu0 %v5584_v24  ;;  %v4484_v24 = vld [vmem:[%s8096_s5 + $0xae8] sm:$0xff]  ;;  %v4627_v32 = vld [vmem:[%s8096_s5 + $0xf60] sm:$0xff] }
 0x41f   :  { %3395 = vmatprep.mubr.f32.mxu0 %v3328_v37  ;;  %5745 = vmatpush3.bf16.msra.mxu1 %v5744_v28  ;;  %v5764_v28 = vpack.c.bf16 %v4626_v22, %v4625_v20  ;;  %v5606_v29 = vpack.c.bf16 %v4484_v24, %v4483_v23  ;;  %v4645_v37 = vld [vmem:[%s8096_s5 + $0xff0] sm:$0xff]  ;;  %v5768_v40 = vpack.c.bf16 %v4628_v34, %v4627_v32 }
 0x420   :  { %3949 = vmatprep.mubr.f32.mxu1 %v3882_v41  ;;  %5587 = vmatprep.subr.bf16.mxu0 %v5586_v33  ;;  %v5766_v33 = vpack.c.bf16 %v4644_v26, %v4643_v25  ;;  %v5610_v41 = vpack.c.bf16 %v4486_v36, %v4485_v35  ;;  %v4545_v20 = vld [vmem:[%s8096_s5 + $0xcd0] sm:$0xff]  ;;  %v5664_v22 = vpack.c.bf16 %v4528_v19, %v4527_v18  ;;  %v4530_v25 = vld [vmem:[%s8096_s5 + $0xc58] sm:$0xff]  ;;  %v4547_v26 = vld [vmem:[%s8096_s5 + $0xce0] sm:$0xff] }
 0x421   :  { %5747 = vmatprep.subr.bf16.mxu1 %v5746_v38  ;;  %v4646_v38 = vld [vmem:[%s8096_s5 + $0xff8] sm:$0xff]  ;;  %v4529_v24 = vld [vmem:[%s8096_s5 + $0xc50] sm:$0xff] }
 0x422   :  { %5589 = vmatpush3.bf16.msra.mxu0 %v5588_v42  ;;  %v4469_v42 = vld [vmem:[%s8096_s5 + $0xa70] sm:$0xff]  ;;  %v5770_v45 = vpack.c.bf16 %v4646_v38, %v4645_v37  ;;  %v4550_v35 = vld [vmem:[%s8096_s5 + $0xcf8] sm:$0xff] }
 0x423   :  { %5749 = vmatpush3.bf16.msra.mxu1 %v5748_v43  ;;  %5591 = vmatprep.subr.bf16.mxu0 %v5590_v44  ;;  %v4470_v43 = vld [vmem:[%s8096_s5 + $0xa78] sm:$0xff]  ;;  %v4629_v44 = vld [vmem:[%s8096_s5 + $0xf70] sm:$0xff] }
 0x424   :  { %5751 = vmatprep.subr.bf16.mxu1 %v5750_v48  ;;  %v4536_v48 = vld [vmem:[%s8096_s5 + $0xc88] sm:$0xff]  ;;  %v5612_v49 = vpack.c.bf16 %v4470_v43, %v4469_v42  ;;  %v5772_v50 = vpack.c.bf16 %v4630_v46, %v4629_v44  ;;  %v4549_v34 = vld [vmem:[%s8096_s5 + $0xcf0] sm:$0xff]  ;;  %v4534_v43 = vld [vmem:[%s8096_s5 + $0xc78] sm:$0xff] }
 0x425   :  { %v5646_v51 = vpack.c.bf16 %v4536_v48, %v4535_v47  ;;  %v4533_v42 = vld [vmem:[%s8096_s5 + $0xc70] sm:$0xff]  ;;  %v4599_v44 = vld [vmem:[%s8096_s5 + $0xe80] sm:$0xff]  ;;  %v4594_v19 = vld [vmem:[%s8096_s5 + $0xe58] sm:$0xff] }
 0x426   :  { %5593 = vmatpush3.bf16.msra.mxu0 %v5592_v54  ;;  %v3290_v54 = vld [vmem:[#allocation3 + $0x20] sm:$0x30]  ;;  %v5676_v46 = vpack.c.bf16 %v4534_v43, %v4533_v42  ;;  %v4593_v18 = vld [vmem:[%s8096_s5 + $0xe50] sm:$0xff] }
 0x427   :  { %5753 = vmatpush3.bf16.msra.mxu1 %v5752_v55  ;;  %5595 = vmatprep.subr.bf16.mxu0 %v5594_v56  ;;  %v4537_v55 = vld [vmem:[%s8096_s5 + $0xc90] sm:$0xff]  ;;  %v4538_v56 = vld [vmem:[%s8096_s5 + $0xc98] sm:$0xff]  ;;  %v3327_v59 = vrot.slane %v3290_v54, 4  ;;  %v4583_v48 = vld [vmem:[%s8096_s5 + $0xe00] sm:$0xff] }
 0x428   :  { %5755 = vmatprep.subr.bf16.mxu1 %v5754_v60  ;;  %v5650_v60 = vpack.c.bf16 %v4538_v56, %v4537_v55  ;;  %v4585_v55 = vld [vmem:[%s8096_s5 + $0xe10] sm:$0xff]  ;;  %v4586_v56 = vld [vmem:[%s8096_s5 + $0xe18] sm:$0xff] }
 0x429   :  { %v3732_v42 = vld [vmem:[#allocation3 + $0x30] sm:$0x30] }
 0x42a   :  { %5597 = vmatpush3.bf16.msra.mxu0 %v5596_v2  ;;  %v3515_v2 = vld [vmem:[#allocation3 + $0x38] sm:$0x3]  ;;  %v3769_v43 = vrot.slane %v3732_v42, 4 }
 0x42b   :  { %5757 = vmatpush3.bf16.msra.mxu1 %v5756_v4  ;;  %5599 = vmatprep.subr.bf16.mxu0 %v5598_v5  ;;  %v5652_v4 = vpack.c.bf16 %v4522_v62, %v4521_v61  ;;  %v5654_v5 = vpack.c.bf16 %v4540_v1, %v4539_v0  ;;  %v5716_v61 = vpack.c.bf16 %v4586_v56, %v4585_v55  ;;  %v4588_v0 = vld [vmem:[%s8096_s5 + $0xe28] sm:$0xff]  ;;  %v4605_v1 = vld [vmem:[%s8096_s5 + $0xeb0] sm:$0xff] }
 0x42c   :  { %5759 = vmatprep.subr.bf16.mxu1 %v5758_v9  ;;  %v4542_v9 = vld [vmem:[%s8096_s5 + $0xcb8] sm:$0xff] }
 0x42d   :  { %v5658_v11 = vpack.c.bf16 %v4542_v9, %v4541_v8  ;;  %v4607_v8 = vld [vmem:[%s8096_s5 + $0xec0] sm:$0xff]  ;;  %v4608_v9 = vld [vmem:[%s8096_s5 + $0xec8] sm:$0xff] }
 0x42e   :  { %5601 = vmatpush3.bf16.msra.mxu0 %v5600_v15  ;;  %v4544_v15 = vld [vmem:[%s8096_s5 + $0xcc8] sm:$0xff] }
 0x42f   :  { %5761 = vmatpush3.bf16.msra.mxu1 %v5760_v16  ;;  %5603 = vmatprep.subr.bf16.mxu0 %v5602_v17  ;;  %v5660_v16 = vpack.c.bf16 %v4526_v13, %v4525_v12  ;;  %v5662_v17 = vpack.c.bf16 %v4544_v15, %v4543_v14  ;;  %v4591_v12 = vld [vmem:[%s8096_s5 + $0xe40] sm:$0xff]  ;;  %v4592_v13 = vld [vmem:[%s8096_s5 + $0xe48] sm:$0xff]  ;;  %v4609_v14 = vld [vmem:[%s8096_s5 + $0xed0] sm:$0xff] }
 0x430   :  { %5763 = vmatprep.subr.bf16.mxu1 %v5762_v21  ;;  %v4546_v21 = vld [vmem:[%s8096_s5 + $0xcd8] sm:$0xff] }
 0x431   :  { %v5666_v23 = vpack.c.bf16 %v4546_v21, %v4545_v20  ;;  %v4610_v15 = vld [vmem:[%s8096_s5 + $0xed8] sm:$0xff]  ;;  %v4611_v20 = vld [vmem:[%s8096_s5 + $0xee0] sm:$0xff]  ;;  %v4612_v21 = vld [vmem:[%s8096_s5 + $0xee8] sm:$0xff] }
 0x432   :  { %5605 = vmatpush3.bf16.msra.mxu0 %v5604_v27  ;;  %v4548_v27 = vld [vmem:[%s8096_s5 + $0xce8] sm:$0xff] }
 0x433   :  { %5765 = vmatpush3.bf16.msra.mxu1 %v5764_v28  ;;  %5607 = vmatprep.subr.bf16.mxu0 %v5606_v29  ;;  %v5668_v28 = vpack.c.bf16 %v4530_v25, %v4529_v24  ;;  %v5670_v29 = vpack.c.bf16 %v4548_v27, %v4547_v26  ;;  %v4595_v24 = vld [vmem:[%s8096_s5 + $0xe60] sm:$0xff]  ;;  %v4596_v25 = vld [vmem:[%s8096_s5 + $0xe68] sm:$0xff] }
 0x434   :  { %5767 = vmatprep.subr.bf16.mxu1 %v5766_v33 }
 0x436   :  { %5609 = vmatpush3.bf16.msra.mxu0 %v5608_v39 }
 0x437   :  { %5769 = vmatpush3.bf16.msra.mxu1 %v5768_v40  ;;  %5611 = vmatprep.subr.bf16.mxu0 %v5610_v41  ;;  %v5672_v40 = vpack.c.bf16 %v4532_v31, %v4531_v30  ;;  %v5674_v41 = vpack.c.bf16 %v4550_v35, %v4549_v34  ;;  %v5736_v34 = vpack.c.bf16 %v4596_v25, %v4595_v24 }
 0x438   :  { %5771 = vmatprep.subr.bf16.mxu1 %v5770_v45  ;;  %v4600_v45 = vld [vmem:[%s8096_s5 + $0xe88] sm:$0xff] }
 0x439   :  { %v5710_v47 = vpack.c.bf16 %v4600_v45, %v4599_v44 }
 0x43a   :  { %5613 = vmatpush3.bf16.msra.mxu0 %v5612_v49  ;;  %v4584_v49 = vld [vmem:[%s8096_s5 + $0xe08] sm:$0xff] }
 0x43b   :  { %5773 = vmatpush3.bf16.msra.mxu1 %v5772_v50  ;;  %5647 = vmatprep.subr.bf16.mxu0 %v5646_v51  ;;  %v4601_v50 = vld [vmem:[%s8096_s5 + $0xe90] sm:$0xff]  ;;  %v4602_v51 = vld [vmem:[%s8096_s5 + $0xe98] sm:$0xff]  ;;  %v5712_v53 = vpack.c.bf16 %v4584_v49, %v4583_v48 }
 0x43c   :  { %v5714_v54 = vpack.c.bf16 %v4602_v51, %v4601_v50 }
 0x43d   :  { %3396 = vmatmul.mubr.f32.vlgmr.msra.gmra.mrb[16].mxu0 %v3327_v59  ;;  %v4603_v59 = vld [vmem:[%s8096_s5 + $0xea0] sm:$0xff] }
 0x43e   :  { %3950 = vmatmul.mubr.f32.vlgmr.msra.gmra.mrb[22].mxu1 %v3881_v63  ;;  %5649 = vmatpush3.bf16.msra.mxu0 %v5648_v58  ;;  %v3770_v58 = vrot.slane %v3733_v52, 4  ;;  %v4587_v63 = vld [vmem:[%s8096_s5 + $0xe20] sm:$0xff] }
 0x43f   :  { %3613 = vmatprep.mubr.f32.mxu0 %v3515_v2  ;;  %5651 = vmatprep.subr.bf16.mxu0 %v5650_v60  ;;  %v4604_v60 = vld [vmem:[%s8096_s5 + $0xea8] sm:$0xff]  ;;  %v4606_v2 = vld [vmem:[%s8096_s5 + $0xeb8] sm:$0xff] }
 0x440   :  { %v5718_v62 = vpack.c.bf16 %v4604_v60, %v4603_v59 }
 0x442   :  { %5653 = vmatpush3.bf16.msra.mxu0 %v5652_v4  ;;  %v5720_v4 = vpack.c.bf16 %v4588_v0, %v4587_v63 }
 0x443   :  { %5655 = vmatprep.subr.bf16.mxu0 %v5654_v5  ;;  %v5722_v5 = vpack.c.bf16 %v4606_v2, %v4605_v1 }
 0x446   :  { %5657 = vmatpush3.bf16.msra.mxu0 %v5656_v10  ;;  %v5724_v10 = vpack.c.bf16 %v4590_v7, %v4589_v6  ;;  %v6047_v6 = vmov 0.0|0.0  }
 0x447   :  { %5659 = vmatprep.subr.bf16.mxu0 %v5658_v11  ;;  %v5726_v11 = vpack.c.bf16 %v4608_v9, %v4607_v8  ;;  %v3968_v8 = vld [vmem:[%s8098_s7 + $0x18] sm:$0xff] }
 0x44a   :  { %5661 = vmatpush3.bf16.msra.mxu0 %v5660_v16  ;;  %v5728_v16 = vpack.c.bf16 %v4592_v13, %v4591_v12 }
 0x44b   :  { %5663 = vmatprep.subr.bf16.mxu0 %v5662_v17  ;;  %v5730_v17 = vpack.c.bf16 %v4610_v15, %v4609_v14 }
 0x44e   :  { %5665 = vmatpush3.bf16.msra.mxu0 %v5664_v22  ;;  %v5732_v22 = vpack.c.bf16 %v4594_v19, %v4593_v18 }
 0x44f   :  { %5667 = vmatprep.subr.bf16.mxu0 %v5666_v23  ;;  %v5734_v23 = vpack.c.bf16 %v4612_v21, %v4611_v20 }
 0x450   :  { %v4682_v32 = vpop.f32.mrb[4].mxu0  ;;  %v4787_v33 = vpop.f32.mrb[10].mxu1 }
 0x451   :  { %v4683_v36 = vpop.f32.mrb[5].mxu0  ;;  %v4788_v37 = vpop.f32.mrb[11].mxu1 }
 0x452   :  { %v7952_v38 = vadd.f32 %v4683_v36, %v4682_v32  ;;  %v7954_v39 = vadd.f32 %v4788_v37, %v4787_v33  ;;  %5669 = vmatpush3.bf16.msra.mxu0 %v5668_v28  ;;  %v4613_v28 = vld [vmem:[%s8096_s5 + $0xef0] sm:$0xff]  ;;  %v4598_v37 = vld [vmem:[%s8096_s5 + $0xe78] sm:$0xff] }
 0x453   :  { %5671 = vmatprep.subr.bf16.mxu0 %v5670_v29  ;;  %v4614_v29 = vld [vmem:[%s8096_s5 + $0xef8] sm:$0xff]  ;;  %v4597_v36 = vld [vmem:[%s8096_s5 + $0xe70] sm:$0xff] }
 0x454   :  { %v5738_v35 = vpack.c.bf16 %v4614_v29, %v4613_v28 }
 0x456   :  { %5673 = vmatpush3.bf16.msra.mxu0 %v5672_v40 }
 0x457   :  { %5675 = vmatprep.subr.bf16.mxu0 %v5674_v41  ;;  %v5740_v41 = vpack.c.bf16 %v4598_v37, %v4597_v36 }
 0x45a   :  { %5677 = vmatpush3.bf16.msra.mxu0 %v5676_v46 }
 0x45b   :  { %5711 = vmatprep.subr.bf16.mxu0 %v5710_v47 }
 0x45d   :  { %3614 = vmatmul.mubr.f32.vlgmr.msra.gmra.mrb[18].mxu0 %v3514_v57 }
 0x45e   :  { %5713 = vmatpush3.bf16.msra.mxu0 %v5712_v53  ;;  %3837 = vmatprep.mubr.f32.mxu0 %v3770_v58 }
 0x45f   :  { %5715 = vmatprep.subr.bf16.mxu0 %v5714_v54 }
 0x462   :  { %5717 = vmatpush3.bf16.msra.mxu0 %v5716_v61 }
 0x463   :  { %5719 = vmatprep.subr.bf16.mxu0 %v5718_v62 }
 0x466   :  { %5721 = vmatpush3.bf16.msra.mxu0 %v5720_v4  ;;  %v3966_v4 = vld [vmem:[%s8098_s7 + $0x8] sm:$0xff] }
 0x467   :  { %5723 = vmatprep.subr.bf16.mxu0 %v5722_v5  ;;  %v3967_v5 = vld [vmem:[%s8098_s7 + $0x10] sm:$0xff] }
 0x468   :  { %v5778_v9 = vpack.c.bf16 %v3968_v8, %v3967_v5 }
 0x46a   :  { %5725 = vmatpush3.bf16.msra.mxu0 %v5724_v10 }
 0x46b   :  { %5727 = vmatprep.subr.bf16.mxu0 %v5726_v11 }
 0x46e   :  { %5729 = vmatpush3.bf16.msra.mxu0 %v5728_v16 }
 0x46f   :  { %5731 = vmatprep.subr.bf16.mxu0 %v5730_v17 }
 0x470   :  { %v4717_v26 = vpop.f32.mrb[6].mxu0  ;;  %v4857_v27 = vpop.f32.mrb[12].mxu1 }
 0x471   :  { %v4718_v30 = vpop.f32.mrb[7].mxu0  ;;  %v4858_v31 = vpop.f32.mrb[13].mxu1 }
 0x472   :  { %v4719_v32 = vadd.f32 %v4718_v30, %v4717_v26  ;;  %v4859_v33 = vadd.f32 %v4858_v31, %v4857_v27  ;;  %5733 = vmatpush3.bf16.msra.mxu0 %v5732_v22 }
 0x473   :  { %5735 = vmatprep.subr.bf16.mxu0 %v5734_v23 }
 0x474   :  { %v2403_v40 = vadd.f32 %v4719_v32, %v7952_v38 }
 0x476   :  { %5737 = vmatpush3.bf16.msra.mxu0 %v5736_v34  ;;  %v4647_v34 = vld [vmem:[%s8097_s6] ss:$0 sm:$0xff] }
 0x477   :  { %5739 = vmatprep.subr.bf16.mxu0 %v5738_v35 }
 0x47a   :  { %5741 = vmatpush3.bf16.msra.mxu0 %v5740_v41 }
 0x47b   :  { %5774 = vmatprep.subr.bf16.mxu0 %v6047_v6 }
 0x47d   :  { %3838 = vmatmul.mubr.f32.vlgmr.msra.gmra.mrb[20].mxu0 %v3769_v43 }
 0x47e   :  { %5223 = vmatprep.mubr.msk.f32.mxu0 %vm6048_vm10, %v6038_v3 }
 0x490   :  { %v4752_v44 = vpop.f32.mrb[8].mxu0 }
 0x491   :  { %v4927_v45 = vpop.f32.mrb[14].mxu1  ;;  %v4753_v46 = vpop.f32.mrb[9].mxu0 }
 0x492   :  { %v4754_v47 = vadd.f32 %v4753_v46, %v4752_v44  ;;  %v4928_v48 = vpop.f32.mrb[15].mxu1 }
 0x493   :  { %v4929_v49 = vadd.f32 %v4928_v48, %v4927_v45 }
 0x494   :  { %v2517_v50 = vadd.f32 %v4754_v47, %v2403_v40  ;;  %v4648_v40 = vld [vmem:[%s8099_s8] ss:$0 sm:$0xff] }
 0x496   :  { %v2629_v51 = vadd.f32 %v7954_v39, %v2517_v50  ;;  %v3965_v39 = vld [vmem:[%s8098_s7] sm:$0xff] }
 0x497   :  { %v5775_v7 = vpack.c.bf16 %v3966_v4, %v3965_v39 }
 0x499   :  { %5776 = vmatpush3.bf16.msra.mxu0 %v5775_v7 }
 0x49a   :  { %5777 = vmatprep.subr.bf16.mxu0 %v6047_v6 }
 0x49d   :  { %5779 = vmatpush3.bf16.msra.mxu0 %v5778_v9 }
 0x4b0   :  { %v4822_v52 = vpop.f32.mrb[10].mxu0 }
 0x4b1   :  { %v4997_v53 = vpop.f32.mrb[16].mxu1  ;;  %v4823_v54 = vpop.f32.mrb[11].mxu0 }
 0x4b2   :  { %v4824_v38 = vadd.f32 %v4823_v54, %v4822_v52  ;;  %v4998_v55 = vpop.f32.mrb[17].mxu1 }
 0x4b3   :  { %v4999_v56 = vadd.f32 %v4998_v55, %v4997_v53 }
 0x4b4   :  { %v2735_v57 = vadd.f32 %v4824_v38, %v2629_v51 }
 0x4b6   :  { %v2847_v58 = vadd.f32 %v4859_v33, %v2735_v57 }
 0x4d0   :  { %v4892_v59 = vpop.f32.mrb[12].mxu0 }
 0x4d1   :  { %v5067_v60 = vpop.f32.mrb[18].mxu1  ;;  %v4893_v61 = vpop.f32.mrb[13].mxu0 }
 0x4d2   :  { %v4894_v62 = vadd.f32 %v4893_v61, %v4892_v59  ;;  %v5068_v63 = vpop.f32.mrb[19].mxu1 }
 0x4d3   :  { %v5069_v0 = vadd.f32 %v5068_v63, %v5067_v60 }
 0x4d4   :  { %v2959_v1 = vadd.f32 %v4894_v62, %v2847_v58 }
 0x4d6   :  { %v3071_v2 = vadd.f32 %v4929_v49, %v2959_v1 }
 0x4f0   :  { %v4962_v10 = vpop.f32.mrb[14].mxu0 }
 0x4f1   :  { %v5137_v11 = vpop.f32.mrb[20].mxu1  ;;  %v4963_v12 = vpop.f32.mrb[15].mxu0 }
 0x4f2   :  { %v4964_v13 = vadd.f32 %v4963_v12, %v4962_v10  ;;  %v5138_v14 = vpop.f32.mrb[21].mxu1 }
 0x4f3   :  { %v5139_v15 = vadd.f32 %v5138_v14, %v5137_v11 }
 0x4f4   :  { %v3177_v16 = vadd.f32 %v4964_v13, %v3071_v2 }
 0x4f6   :  { %v3289_v17 = vadd.f32 %v4999_v56, %v3177_v16 }
 0x510   :  { %v5032_v18 = vpop.f32.mrb[16].mxu0 }
 0x511   :  { %v5207_v19 = vpop.f32.mrb[22].mxu1  ;;  %v5033_v20 = vpop.f32.mrb[17].mxu0 }
 0x512   :  { %v5034_v21 = vadd.f32 %v5033_v20, %v5032_v18  ;;  %v5208_v22 = vpop.f32.mrb[23].mxu1 }
 0x513   :  { %v5209_v23 = vadd.f32 %v5208_v22, %v5207_v19 }
 0x514   :  { %v3401_v24 = vadd.f32 %v5034_v21, %v3289_v17 }
 0x516   :  { %v3513_v3 = vadd.f32 %v5069_v0, %v3401_v24 }
 0x530   :  { %v5102_v25 = vpop.f32.mrb[18].mxu0 }
 0x531   :  { %v5103_v26 = vpop.f32.mrb[19].mxu0 }
 0x532   :  { %v5104_v27 = vadd.f32 %v5103_v26, %v5102_v25 }
 0x534   :  { %v3619_v28 = vadd.f32 %v5104_v27, %v3513_v3 }
 0x536   :  { %v3731_v29 = vadd.f32 %v5139_v15, %v3619_v28 }
 0x550   :  { %v5172_v30 = vpop.f32.mrb[20].mxu0 }
 0x551   :  { %v5173_v31 = vpop.f32.mrb[21].mxu0 }
 0x552   :  { %v5174_v32 = vadd.f32 %v5173_v31, %v5172_v30 }
 0x554   :  { %v3843_v33 = vadd.f32 %v5174_v32, %v3731_v29 }
 0x556   :  { %v3955_v35 = vadd.f32 %v5209_v23, %v3843_v33 }
 0x558   :  { %v3963_v36 = vadd.f32 %v4647_v34, %v3955_v35 }
 0x55a   :  { %v3964_v37 = vmax.f32 %v3963_v36, 0.0 }
 0x55c   :  { %5224 = vmatmul.mubr.msk.f32.vlgmr.msra.gmra.mrb[22].mxu0 %vm3976_vm11, %v3964_v37 }
 0x62f   :  { %v4046_v41 = vpop.f32.mrb[22].mxu0 }
 0x630   :  { %v4047_v42 = vadd.f32 %v4648_v40, %v4046_v41  ;;  %v5225_v43 = vpop.f32.mrb[23].mxu0 }
 0x632   :  { %4050 = vst [vmem:[#allocation4] sm:$0x3] %v4047_v42 }
 0x633   :  { %6024 = shalt.err (!%p6021_p4)
}
 0x634   :  { %s6025_s18 = scalar_lea.hbm %s8100_s9, 32 }
 0x635   :  { %p6026_p5 = scmp.ne.s32.totalorder %s8100_s9, %s6025_s18  ;;  %p6029_p6 = scmp.lt.u32.totalorder %s6025_s18, %s8100_s9 }
 0x637   :  { %p6031_p7 = pnand %p6029_p6, %p6026_p5 }
 0x639   :  { %6034 = shalt.err (!%p6031_p7)
}
 0x63a   :  { %4060 = dma.vmem_to_hbm [thread:$0]  %s4058_s16, 32, %s8100_s9, [#allocation5]  }
 0x63b   :  { %6035 = dma.done.wait [#allocation5], 32  }
 0x63c   :  { %6036 = vsyncadd [#allocation5], 4294967264 }
 0x63d   :  { %4064 = vsyncpa [#allocation5], 1 }

</bundles_post_ra>
